<compile_context>
chip_gen: v5e
topology: v5e:2x2
jax: 0.10.0
libtpu: 0.0.40
codegen_flags: <defaults>
</compile_context>

<pallas_src>
import numpy as np
import jax
import jax.numpy as jnp
from jax import lax
from jax.experimental import pallas as pl
from jax.experimental.pallas import tpu as pltpu

EPS = 1e-5  # PyTorch GroupNorm default


# -----------------------------------------------------------------------------
# host-side helpers (plain numpy)
# -----------------------------------------------------------------------------
def interp_matrix(out_size, in_size):
    """1-D linear interpolation matrix, align_corners=True (PyTorch semantics)."""
    m = np.zeros((out_size, in_size), np.float32)
    if in_size == 1:
        m[:, 0] = 1.0
        return m
    for i in range(out_size):
        c = i * (in_size - 1) / (out_size - 1)
        f = min(int(np.floor(c)), in_size - 2)
        w = c - f
        m[i, f] += 1.0 - w
        m[i, f + 1] += w
    return m


def conv_band_matrix_flat(w_oikkk, out_w):
    """3x3x3 conv weights -> one flat (9*out_w*Cin, out_w*Cout) banded matrix.

    Index convention: row = (kd*3 + kh)*out_w*Cin + iw*Cin + ci,
                      col = ow*Cout + co, value = w[co, ci, kd, kh, iw-ow+1],
    so that a single matmul of the (R, 9*L) concatenation of (kd, kh)-shifted
    slabs against this matrix performs the full padded 3x3x3 convolution
    (width taps + channel contraction folded into K).
    """
    co_n, ci_n = w_oikkk.shape[0], w_oikkk.shape[1]
    B = np.zeros((3, 3, out_w * ci_n, out_w * co_n), np.float32)
    for kd in range(3):
        for kh in range(3):
            for ow in range(out_w):
                for kw in range(3):
                    iw = ow + kw - 1
                    if 0 <= iw < out_w:
                        B[kd, kh, iw * ci_n:(iw + 1) * ci_n,
                          ow * co_n:(ow + 1) * co_n] = w_oikkk[:, :, kd, kh, kw].T
    return B.reshape(9 * out_w * ci_n, out_w * co_n)


# -----------------------------------------------------------------------------
# fused VDecoderBlock: one Pallas kernel per batch element
# -----------------------------------------------------------------------------
def vdecoder_block_pallas(x_ncdhw, params, num_groups=8, *,
                          out_dtype=jnp.float32, channels_last=False):
    (w_up, b_up, g1, be1, w1, b1, g2, be2, w2, b2) = params
    N, Cin, Din, Hin, Win = x_ncdhw.shape
    C = int(w_up.shape[0])                      # output channels
    OD, OH, OW = 2 * Din, 2 * Hin, 2 * Win
    L = OW * C                                  # folded (w, channel) lane axis
    R = OD * OH                                 # folded (d, h) row axis
    cg = C // num_groups
    inv_n = 1.0 / float(R * OW * cg)            # 1 / elements-per-group
    GPAD = 128                                  # lane-padded group axis
    PADR = ((OH + 1 + 7) // 8) * 8              # sublane-aligned D/H row halo
    bf16, f32 = jnp.bfloat16, jnp.float32

    # --- host-side constant matrices (all small, O(spatial^2 * C)) ---
    MW = interp_matrix(OW, Win)
    MH = interp_matrix(OH, Hin)
    MD = interp_matrix(OD, Din)
    # 1x1 conv fused into the W-axis upsample:  (Win*Cin, OW*C)
    kw_up = np.kron(MW.T, np.asarray(w_up, np.float32).T)
    # fused D & H upsample (single matrix): (OD*OH, Din*Hin)
    kdh_up = np.kron(MD, MH)

    # factorized, exact 0/1 GroupNorm reduce / broadcast matrices over the
    # (w, c)-interleaved lane axis; columns/rows padded to 128 lanes.
    lane_gid = np.tile(np.arange(C) // cg, OW)                   # (L,)
    red = np.zeros((L, GPAD), np.float32)
    red[np.arange(L), lane_gid] = 1.0
    bcast = red.T.copy()                                         # (GPAD, L)

    # flat banded per-(kd, kh, kw) conv matrices: (9*L, L)
    B1 = conv_band_matrix_flat(np.asarray(w1, np.float32), OW)
    B2 = conv_band_matrix_flat(np.asarray(w2, np.float32), OW)

    # seven per-channel vectors packed into one aligned (8, L) f32 tile
    tile_l = lambda v: np.tile(np.asarray(v, np.float32), OW)
    vecs = np.stack([tile_l(b_up), tile_l(g1), tile_l(be1), tile_l(b1),
                     tile_l(g2), tile_l(be2), tile_l(b2),
                     np.zeros(L, np.float32)], axis=0)           # (8, L)

    # device arrays: bf16 for MXU operands, f32 for exact 0/1 masks + params
    kw_up_d = jnp.asarray(kw_up, bf16)
    kdh_up_d = jnp.asarray(kdh_up, bf16)
    red_d = jnp.asarray(red, f32)
    bcast_d = jnp.asarray(bcast, f32)
    B1_d = jnp.asarray(B1, bf16)
    B2_d = jnp.asarray(B2, bf16)
    vecs_d = jnp.asarray(vecs, f32)

    # input: channels-last with W folded into lanes, bf16
    x_cl = jnp.transpose(x_ncdhw, (0, 2, 3, 4, 1)).reshape(
        N, Din * Hin, Win * Cin).astype(bf16)

    def kernel(x_ref, kwup_ref, kdh_ref, red_ref, bcast_ref, vec_ref,
               B1_ref, B2_ref, o_ref):
        vec = vec_ref[...]                                       # (8, L) f32
        bup, g1r, be1r, b1r = vec[0:1], vec[1:2], vec[2:3], vec[3:4]
        g2r, be2r, b2r = vec[4:5], vec[5:6], vec[6:7]

        # ---- fused 1x1 conv + separable trilinear x2 upsample: 2 dots ----
        t = jnp.dot(x_ref[...], kwup_ref[...],
                    preferred_element_type=f32) + bup            # (Din*Hin, L)
        res = jnp.dot(kdh_ref[...], t.astype(bf16),
                      preferred_element_type=f32)                # (R, L)
        # park the residual in the output block (bounds its live range)
        o_ref[...] = res.astype(o_ref.dtype)

        # H-plane boundary masks (valid-source rows for the kh=0 / kh=2 taps)
        row_h = lax.broadcasted_iota(jnp.int32, (R, L), 0) % OH
        mask_lo = row_h >= 1
        mask_hi = row_h <= OH - 2
        zero_slab = jnp.zeros((R, L), bf16)
        zpad = jnp.zeros((PADR, L), bf16)

        def gn_relu(x, gamma, beta):
            # GroupNorm (biased variance) + ReLU.  Stats via exact 0/1 reduce
            # and broadcast matrices; 1/n scale applied in f32 afterwards.
            s = jnp.sum(x, axis=0, keepdims=True)                # (1, L) f32
            sq = jnp.sum(x * x, axis=0, keepdims=True)           # (1, L) f32
            st = jnp.concatenate([s, sq], axis=0)                # (2, L)
            gsum = jnp.dot(st, red_ref[...],
                           preferred_element_type=f32)           # (2, GPAD)
            gb = jnp.dot(gsum, bcast_ref[...],
                         preferred_element_type=f32)             # (2, L)
            mean = gb[0:1, :] * inv_n
            var = jnp.maximum(gb[1:2, :] * inv_n - mean * mean, 0.0)
            # TODO(synk): at production group sizes switch to per-tile partial
            #             sums / two-pass variance when D-tiling is added.
            y = (x - mean) * (lax.rsqrt(var + EPS) * gamma) + beta
            return jnp.maximum(y, 0.0)

        def conv3(y, B_ref, bias):
            # 3x3x3 conv, padding 1: all 27 taps + channels in ONE dot.
            # lhs = (R, 9*L) concat of D/H row-shifted slabs of the zero-padded
            # slab; D padding comes from the row halo, H padding from masks.
            yp = jnp.concatenate([zpad, y.astype(bf16), zpad], axis=0)
            slabs = []
            for kd in range(3):
                for kh in range(3):
                    off = (kd - 1) * OH + (kh - 1)
                    s = yp[PADR + off: PADR + off + R, :]        # (R, L)
                    if kh == 0:
                        s = jnp.where(mask_lo, s, zero_slab)
                    elif kh == 2:
                        s = jnp.where(mask_hi, s, zero_slab)
                    slabs.append(s)
            lhs = jnp.concatenate(slabs, axis=1)                 # (R, 9*L)
            return jnp.dot(lhs, B_ref[...],
                           preferred_element_type=f32) + bias    # (R, L) f32

        h = conv3(gn_relu(res, g1r, be1r), B1_ref, b1r)
        h = conv3(gn_relu(h, g2r, be2r), B2_ref, b2r)
        o_ref[...] = (h + o_ref[...].astype(f32)).astype(o_ref.dtype)

    rep = lambda nd: (lambda b: (0,) * nd)
    out2 = pl.pallas_call(
        kernel,
        out_shape=jax.ShapeDtypeStruct((N, R, L), out_dtype),
        grid=(N,),
        in_specs=[
            pl.BlockSpec((None, Din * Hin, Win * Cin), lambda b: (b, 0, 0)),
            pl.BlockSpec((Win * Cin, L), rep(2)),     # fused 1x1 + W upsample
            pl.BlockSpec((R, Din * Hin), rep(2)),     # fused D/H upsample
            pl.BlockSpec((L, GPAD), rep(2)),          # GN group reduce (0/1)
            pl.BlockSpec((GPAD, L), rep(2)),          # GN group broadcast (0/1)
            pl.BlockSpec((8, L), rep(2)),             # packed per-channel vecs
            pl.BlockSpec((9 * L, L), rep(2)),         # conv1 flat band matrix
            pl.BlockSpec((9 * L, L), rep(2)),         # conv2 flat band matrix
        ],
        out_specs=pl.BlockSpec((None, R, L), lambda b: (b, 0, 0)),
        compiler_params=pltpu.CompilerParams(
            dimension_semantics=("parallel",),        # batch elems independent
            vmem_limit_bytes=32 * 1024 * 1024),
    )(x_cl, kw_up_d, kdh_up_d, red_d, bcast_d, vecs_d, B1_d, B2_d)

    # (N, OD*OH, OW*C) -> channels-last 5D view; NCDHW only if requested
    out = out2.reshape(N, OD, OH, OW, C)
    if channels_last:
        return out
    return jnp.transpose(out, (0, 4, 1, 2, 3))


# -----------------------------------------------------------------------------
# pure-JAX reference (mirrors the PyTorch module semantics) for validation
# -----------------------------------------------------------------------------
def vdecoder_block_reference(x_ncdhw, params, num_groups=8):
    (w_up, b_up, g1, be1, w1, b1, g2, be2, w2, b2) = params
    N, Cin, D, H, W = x_ncdhw.shape
    OD, OH, OW = 2 * D, 2 * H, 2 * W
    md = jnp.asarray(interp_matrix(OD, D))
    mh = jnp.asarray(interp_matrix(OH, H))
    mw = jnp.asarray(interp_matrix(OW, W))

    hp = lax.Precision.HIGHEST
    t = jnp.einsum('nidhw,oi->nodhw', x_ncdhw, w_up, precision=hp) \
        + b_up[None, :, None, None, None]
    t = jnp.einsum('ncdhw,xd->ncxhw', t, md, precision=hp)
    t = jnp.einsum('ncxhw,yh->ncxyw', t, mh, precision=hp)
    t = jnp.einsum('ncxyw,zw->ncxyz', t, mw, precision=hp)
    residual = t

    def gn(y, gamma, beta):
        n_, c_, d_, h_, w_ = y.shape
        yg = y.reshape(n_, num_groups, c_ // num_groups, d_, h_, w_)
        mean = jnp.mean(yg, axis=(2, 3, 4, 5), keepdims=True)
        var = jnp.mean((yg - mean) ** 2, axis=(2, 3, 4, 5), keepdims=True)
        yn = ((yg - mean) / jnp.sqrt(var + EPS)).reshape(y.shape)
        return yn * gamma[None, :, None, None, None] + beta[None, :, None, None, None]

    def conv3(y, w, b):
        return lax.conv_general_dilated(
            y, w, window_strides=(1, 1, 1), padding=((1, 1), (1, 1), (1, 1)),
            dimension_numbers=('NCDHW', 'OIDHW', 'NCDHW'),
            precision=hp) + b[None, :, None, None, None]

    h = conv3(jax.nn.relu(gn(t, g1, be1)), w1, b1)
    h = conv3(jax.nn.relu(gn(h, g2, be2)), w2, b2)
    return h + residual


# -----------------------------------------------------------------------------
if __name__ == "__main__":
    N, Cin, Cout = 2, 32, 16
    D = H = W = 4
    num_groups = 8

    key = jax.random.PRNGKey(0)
    ks = jax.random.split(key, 11)
    x = jax.random.normal(ks[0], (N, Cin, D, H, W), jnp.float32)

    # Deterministic synthetic parameters (shapes follow the module __init__).
    w_up = 0.10 * jax.random.normal(ks[1], (Cout, Cin), jnp.float32)       # 1x1x1 conv
    b_up = 0.10 * jax.random.normal(ks[2], (Cout,), jnp.float32)
    g1 = 1.0 + 0.10 * jax.random.normal(ks[3], (Cout,), jnp.float32)       # GroupNorm 1
    be1 = 0.10 * jax.random.normal(ks[4], (Cout,), jnp.float32)
    w1 = 0.05 * jax.random.normal(ks[5], (Cout, Cout, 3, 3, 3), jnp.float32)
    b1 = 0.10 * jax.random.normal(ks[6], (Cout,), jnp.float32)
    g2 = 1.0 + 0.10 * jax.random.normal(ks[7], (Cout,), jnp.float32)       # GroupNorm 2
    be2 = 0.10 * jax.random.normal(ks[8], (Cout,), jnp.float32)
    w2 = 0.05 * jax.random.normal(ks[9], (Cout, Cout, 3, 3, 3), jnp.float32)
    b2 = 0.10 * jax.random.normal(ks[10], (Cout,), jnp.float32)

    params = (w_up, b_up, g1, be1, w1, b1, g2, be2, w2, b2)

    out = vdecoder_block_pallas(x, params, num_groups=num_groups)
    out = jax.block_until_ready(out)

    ref = vdecoder_block_reference(x, params, num_groups=num_groups)
    # bf16 MXU operands (f32 accumulation) vs an f32 HIGHEST-precision reference
    np.testing.assert_allclose(np.asarray(out), np.asarray(ref), rtol=5e-2, atol=5e-2)
    assert out.shape == (N, Cout, 2 * D, 2 * H, 2 * W)

    print("KERNEL_OK")
</pallas_src>

<mosaic_0001>
module attributes {stable_mosaic.version = 11 : i64} {
  func.func @kernel(%arg0: i32, %arg1: memref<1x16x128xbf16, #tpu.memory_space<vmem>>, %arg2: memref<128x128xbf16, #tpu.memory_space<vmem>>, %arg3: memref<64x16xbf16, #tpu.memory_space<vmem>>, %arg4: memref<128x128xf32, #tpu.memory_space<vmem>>, %arg5: memref<128x128xf32, #tpu.memory_space<vmem>>, %arg6: memref<8x128xf32, #tpu.memory_space<vmem>>, %arg7: memref<1152x128xbf16, #tpu.memory_space<vmem>>, %arg8: memref<1152x128xbf16, #tpu.memory_space<vmem>>, %arg9: memref<1x64x128xf32, #tpu.memory_space<vmem>>) attributes {dimension_semantics = [#tpu.dimension_semantics<parallel>], iteration_bounds = array<i64: 2>, scalar_prefetch = 0 : i64, scratch_operands = 0 : i64, tpu.core_type = #tpu.core_type<tc>, window_params = [{transform_indices = @transform_0, window_bounds = array<i64: 1, 16, 128>}, {pipeline_mode = #tpu.pipeline_mode<synchronous>, transform_indices = @transform_1, window_bounds = array<i64: 128, 128>}, {pipeline_mode = #tpu.pipeline_mode<synchronous>, transform_indices = @transform_2, window_bounds = array<i64: 64, 16>}, {pipeline_mode = #tpu.pipeline_mode<synchronous>, transform_indices = @transform_3, window_bounds = array<i64: 128, 128>}, {pipeline_mode = #tpu.pipeline_mode<synchronous>, transform_indices = @transform_4, window_bounds = array<i64: 128, 128>}, {pipeline_mode = #tpu.pipeline_mode<synchronous>, transform_indices = @transform_5, window_bounds = array<i64: 8, 128>}, {pipeline_mode = #tpu.pipeline_mode<synchronous>, transform_indices = @transform_6, window_bounds = array<i64: 1152, 128>}, {pipeline_mode = #tpu.pipeline_mode<synchronous>, transform_indices = @transform_7, window_bounds = array<i64: 1152, 128>}, {transform_indices = @transform_8, window_bounds = array<i64: 1, 64, 128>}]} {
    %c0 = arith.constant 0 : index
    %c0_0 = arith.constant 0 : index
    %0 = vector.load %arg6[%c0, %c0_0] : memref<8x128xf32, #tpu.memory_space<vmem>>, vector<8x128xf32>
    %1 = vector.extract_strided_slice %0 {offsets = [0, 0], sizes = [1, 128], strides = [1, 1]} : vector<8x128xf32> to vector<1x128xf32>
    %2 = vector.extract_strided_slice %0 {offsets = [1, 0], sizes = [1, 128], strides = [1, 1]} : vector<8x128xf32> to vector<1x128xf32>
    %3 = vector.extract_strided_slice %0 {offsets = [2, 0], sizes = [1, 128], strides = [1, 1]} : vector<8x128xf32> to vector<1x128xf32>
    %4 = vector.extract_strided_slice %0 {offsets = [3, 0], sizes = [1, 128], strides = [1, 1]} : vector<8x128xf32> to vector<1x128xf32>
    %5 = vector.extract_strided_slice %0 {offsets = [4, 0], sizes = [1, 128], strides = [1, 1]} : vector<8x128xf32> to vector<1x128xf32>
    %6 = vector.extract_strided_slice %0 {offsets = [5, 0], sizes = [1, 128], strides = [1, 1]} : vector<8x128xf32> to vector<1x128xf32>
    %7 = vector.extract_strided_slice %0 {offsets = [6, 0], sizes = [1, 128], strides = [1, 1]} : vector<8x128xf32> to vector<1x128xf32>
    %c0_1 = arith.constant 0 : index
    %c0_2 = arith.constant 0 : index
    %c0_3 = arith.constant 0 : index
    %8 = vector.load %arg1[%c0_1, %c0_2, %c0_3] : memref<1x16x128xbf16, #tpu.memory_space<vmem>>, vector<1x16x128xbf16>
    %9 = vector.shape_cast %8 : vector<1x16x128xbf16> to vector<16x128xbf16>
    %c0_4 = arith.constant 0 : index
    %c0_5 = arith.constant 0 : index
    %10 = vector.load %arg2[%c0_4, %c0_5] : memref<128x128xbf16, #tpu.memory_space<vmem>>, vector<128x128xbf16>
    %cst = arith.constant dense<0.000000e+00> : vector<16x128xf32>
    %11 = tpu.matmul %9, %10, %cst {dimension_numbers = #tpu.dot_dimension_numbers<[1], [0], [0], [1], [0, 0, 1, 1], [], []>} : vector<16x128xbf16>, vector<128x128xbf16>, vector<16x128xf32> -> vector<16x128xf32>
    %12 = vector.broadcast %1 : vector<1x128xf32> to vector<16x128xf32>
    %13 = arith.addf %11, %12 : vector<16x128xf32>
    %c0_6 = arith.constant 0 : index
    %c0_7 = arith.constant 0 : index
    %14 = vector.load %arg3[%c0_6, %c0_7] : memref<64x16xbf16, #tpu.memory_space<vmem>>, vector<64x16xbf16>
    %15 = arith.truncf %13 : vector<16x128xf32> to vector<16x128xbf16>
    %cst_8 = arith.constant dense<0.000000e+00> : vector<64x128xf32>
    %16 = tpu.matmul %14, %15, %cst_8 {dimension_numbers = #tpu.dot_dimension_numbers<[1], [0], [0], [1], [0, 0, 1, 1], [], []>} : vector<64x16xbf16>, vector<16x128xbf16>, vector<64x128xf32> -> vector<64x128xf32>
    %c0_9 = arith.constant 0 : index
    %c0_10 = arith.constant 0 : index
    %c0_11 = arith.constant 0 : index
    %17 = vector.load %arg9[%c0_9, %c0_10, %c0_11] : memref<1x64x128xf32, #tpu.memory_space<vmem>>, vector<1x64x128xf32>
    %18 = vector.shape_cast %17 : vector<1x64x128xf32> to vector<64x128xf32>
    %19 = vector.shape_cast %16 : vector<64x128xf32> to vector<1x64x128xf32>
    tpu.vector_store %arg9[%c0_9, %c0_10, %c0_11], %19 {strides = array<i32>} : memref<1x64x128xf32, #tpu.memory_space<vmem>>, vector<1x64x128xf32>,
    %20 = tpu.iota {dimensions = array<i32: 0>} : vector<64x128xi32>
    %c8_i32 = arith.constant 8 : i32
    %c0_i32 = arith.constant 0 : i32
    %21 = arith.cmpi eq, %c8_i32, %c0_i32 : i32
    %c1_i32 = arith.constant 1 : i32
    %22 = arith.select %21, %c1_i32, %c8_i32 : i32
    %23 = vector.broadcast %22 : i32 to vector<64x128xi32>
    %24 = arith.remsi %20, %23 : vector<64x128xi32>
    %c0_i32_12 = arith.constant 0 : i32
    %25 = vector.broadcast %c0_i32_12 : i32 to vector<64x128xi32>
    %26 = arith.cmpi ne, %24, %25 : vector<64x128xi32>
    %c0_i32_13 = arith.constant 0 : i32
    %27 = vector.broadcast %c0_i32_13 : i32 to vector<64x128xi32>
    %28 = arith.cmpi slt, %24, %27 : vector<64x128xi32>
    %c0_i32_14 = arith.constant 0 : i32
    %29 = arith.cmpi slt, %22, %c0_i32_14 : i32
    %30 = vector.broadcast %29 : i1 to vector<64x128xi1>
    %31 = vector.broadcast %30 : vector<64x128xi1> to vector<64x128xi1>
    %32 = arith.xori %28, %31 : vector<64x128xi1>
    %33 = arith.andi %32, %26 : vector<64x128xi1>
    %34 = vector.broadcast %22 : i32 to vector<64x128xi32>
    %35 = arith.addi %24, %34 : vector<64x128xi32>
    %36 = arith.select %33, %35, %24 : vector<64x128xi1>, vector<64x128xi32>
    %c1_i32_15 = arith.constant 1 : i32
    %37 = vector.broadcast %c1_i32_15 : i32 to vector<64x128xi32>
    %38 = arith.cmpi sge, %36, %37 : vector<64x128xi32>
    %c6_i32 = arith.constant 6 : i32
    %39 = vector.broadcast %c6_i32 : i32 to vector<64x128xi32>
    %40 = arith.cmpi sle, %36, %39 : vector<64x128xi32>
    %cst_16 = arith.constant 0.000000e+00 : bf16
    %41 = vector.broadcast %cst_16 : bf16 to vector<64x128xbf16>
    %cst_17 = arith.constant 0.000000e+00 : bf16
    %42 = vector.broadcast %cst_17 : bf16 to vector<16x128xbf16>
    %cst_18 = arith.constant dense<0.000000e+00> : vector<128xf32>
    %43 = vector.multi_reduction <add>, %16, %cst_18 [0] : vector<64x128xf32> to vector<128xf32>
    %44 = vector.shape_cast %43 : vector<128xf32> to vector<1x128xf32>
    %45 = arith.mulf %16, %16 : vector<64x128xf32>
    %cst_19 = arith.constant dense<0.000000e+00> : vector<128xf32>
    %46 = vector.multi_reduction <add>, %45, %cst_19 [0] : vector<64x128xf32> to vector<128xf32>
    %47 = vector.shape_cast %46 : vector<128xf32> to vector<1x128xf32>
    %48 = tpu.concatenate %44, %47 in 0 : vector<1x128xf32>, vector<1x128xf32> -> vector<2x128xf32>
    %c0_20 = arith.constant 0 : index
    %c0_21 = arith.constant 0 : index
    %49 = vector.load %arg4[%c0_20, %c0_21] : memref<128x128xf32, #tpu.memory_space<vmem>>, vector<128x128xf32>
    %cst_22 = arith.constant dense<0.000000e+00> : vector<2x128xf32>
    %50 = tpu.matmul %48, %49, %cst_22 {dimension_numbers = #tpu.dot_dimension_numbers<[1], [0], [0], [1], [0, 0, 1, 1], [], []>} : vector<2x128xf32>, vector<128x128xf32>, vector<2x128xf32> -> vector<2x128xf32>
    %c0_23 = arith.constant 0 : index
    %c0_24 = arith.constant 0 : index
    %51 = vector.load %arg5[%c0_23, %c0_24] : memref<128x128xf32, #tpu.memory_space<vmem>>, vector<128x128xf32>
    %cst_25 = arith.constant dense<0.000000e+00> : vector<2x128xf32>
    %52 = tpu.matmul %50, %51, %cst_25 {dimension_numbers = #tpu.dot_dimension_numbers<[1], [0], [0], [1], [0, 0, 1, 1], [], []>} : vector<2x128xf32>, vector<128x128xf32>, vector<2x128xf32> -> vector<2x128xf32>
    %53 = vector.extract_strided_slice %52 {offsets = [0, 0], sizes = [1, 128], strides = [1, 1]} : vector<2x128xf32> to vector<1x128xf32>
    %cst_26 = arith.constant 9.765625E-4 : f32
    %54 = vector.broadcast %cst_26 : f32 to vector<1x128xf32>
    %55 = arith.mulf %53, %54 : vector<1x128xf32>
    %56 = vector.extract_strided_slice %52 {offsets = [1, 0], sizes = [1, 128], strides = [1, 1]} : vector<2x128xf32> to vector<1x128xf32>
    %cst_27 = arith.constant 9.765625E-4 : f32
    %57 = vector.broadcast %cst_27 : f32 to vector<1x128xf32>
    %58 = arith.mulf %56, %57 : vector<1x128xf32>
    %59 = arith.mulf %55, %55 : vector<1x128xf32>
    %60 = arith.subf %58, %59 : vector<1x128xf32>
    %cst_28 = arith.constant 0.000000e+00 : f32
    %61 = vector.broadcast %cst_28 : f32 to vector<1x128xf32>
    %62 = arith.maximumf %60, %61 : vector<1x128xf32>
    %63 = vector.broadcast %55 : vector<1x128xf32> to vector<64x128xf32>
    %64 = arith.subf %16, %63 : vector<64x128xf32>
    %cst_29 = arith.constant 9.99999974E-6 : f32
    %65 = vector.broadcast %cst_29 : f32 to vector<1x128xf32>
    %66 = arith.addf %62, %65 : vector<1x128xf32>
    %67 = math.rsqrt %66 : vector<1x128xf32>
    %68 = arith.mulf %67, %2 : vector<1x128xf32>
    %69 = vector.broadcast %68 : vector<1x128xf32> to vector<64x128xf32>
    %70 = arith.mulf %64, %69 : vector<64x128xf32>
    %71 = vector.broadcast %3 : vector<1x128xf32> to vector<64x128xf32>
    %72 = arith.addf %70, %71 : vector<64x128xf32>
    %cst_30 = arith.constant 0.000000e+00 : f32
    %73 = vector.broadcast %cst_30 : f32 to vector<64x128xf32>
    %74 = arith.maximumf %72, %73 : vector<64x128xf32>
    %75 = arith.truncf %74 : vector<64x128xf32> to vector<64x128xbf16>
    %76 = tpu.concatenate %42, %75, %42 in 0 : vector<16x128xbf16>, vector<64x128xbf16>, vector<16x128xbf16> -> vector<96x128xbf16>
    %77 = vector.extract_strided_slice %76 {offsets = [7, 0], sizes = [64, 128], strides = [1, 1]} : vector<96x128xbf16> to vector<64x128xbf16>
    %78 = arith.select %38, %77, %41 : vector<64x128xi1>, vector<64x128xbf16>
    %79 = vector.extract_strided_slice %76 {offsets = [8, 0], sizes = [64, 128], strides = [1, 1]} : vector<96x128xbf16> to vector<64x128xbf16>
    %80 = vector.extract_strided_slice %76 {offsets = [9, 0], sizes = [64, 128], strides = [1, 1]} : vector<96x128xbf16> to vector<64x128xbf16>
    %81 = arith.select %40, %80, %41 : vector<64x128xi1>, vector<64x128xbf16>
    %82 = vector.extract_strided_slice %76 {offsets = [15, 0], sizes = [64, 128], strides = [1, 1]} : vector<96x128xbf16> to vector<64x128xbf16>
    %83 = arith.select %38, %82, %41 : vector<64x128xi1>, vector<64x128xbf16>
    %84 = vector.extract_strided_slice %76 {offsets = [16, 0], sizes = [64, 128], strides = [1, 1]} : vector<96x128xbf16> to vector<64x128xbf16>
    %85 = vector.extract_strided_slice %76 {offsets = [17, 0], sizes = [64, 128], strides = [1, 1]} : vector<96x128xbf16> to vector<64x128xbf16>
    %86 = arith.select %40, %85, %41 : vector<64x128xi1>, vector<64x128xbf16>
    %87 = vector.extract_strided_slice %76 {offsets = [23, 0], sizes = [64, 128], strides = [1, 1]} : vector<96x128xbf16> to vector<64x128xbf16>
    %88 = arith.select %38, %87, %41 : vector<64x128xi1>, vector<64x128xbf16>
    %89 = vector.extract_strided_slice %76 {offsets = [24, 0], sizes = [64, 128], strides = [1, 1]} : vector<96x128xbf16> to vector<64x128xbf16>
    %90 = vector.extract_strided_slice %76 {offsets = [25, 0], sizes = [64, 128], strides = [1, 1]} : vector<96x128xbf16> to vector<64x128xbf16>
    %91 = arith.select %40, %90, %41 : vector<64x128xi1>, vector<64x128xbf16>
    %92 = tpu.concatenate %78, %79, %81, %83, %84, %86, %88, %89, %91 in 1 : vector<64x128xbf16>, vector<64x128xbf16>, vector<64x128xbf16>, vector<64x128xbf16>, vector<64x128xbf16>, vector<64x128xbf16>, vector<64x128xbf16>, vector<64x128xbf16>, vector<64x128xbf16> -> vector<64x1152xbf16>
    %c0_31 = arith.constant 0 : index
    %c0_32 = arith.constant 0 : index
    %93 = vector.load %arg7[%c0_31, %c0_32] : memref<1152x128xbf16, #tpu.memory_space<vmem>>, vector<1152x128xbf16>
    %cst_33 = arith.constant dense<0.000000e+00> : vector<64x128xf32>
    %94 = tpu.matmul %92, %93, %cst_33 {dimension_numbers = #tpu.dot_dimension_numbers<[1], [0], [0], [1], [0, 0, 1, 1], [], []>} : vector<64x1152xbf16>, vector<1152x128xbf16>, vector<64x128xf32> -> vector<64x128xf32>
    %95 = vector.broadcast %4 : vector<1x128xf32> to vector<64x128xf32>
    %96 = arith.addf %94, %95 : vector<64x128xf32>
    %cst_34 = arith.constant dense<0.000000e+00> : vector<128xf32>
    %97 = vector.multi_reduction <add>, %96, %cst_34 [0] : vector<64x128xf32> to vector<128xf32>
    %98 = vector.shape_cast %97 : vector<128xf32> to vector<1x128xf32>
    %99 = arith.mulf %96, %96 : vector<64x128xf32>
    %cst_35 = arith.constant dense<0.000000e+00> : vector<128xf32>
    %100 = vector.multi_reduction <add>, %99, %cst_35 [0] : vector<64x128xf32> to vector<128xf32>
    %101 = vector.shape_cast %100 : vector<128xf32> to vector<1x128xf32>
    %102 = tpu.concatenate %98, %101 in 0 : vector<1x128xf32>, vector<1x128xf32> -> vector<2x128xf32>
    %c0_36 = arith.constant 0 : index
    %c0_37 = arith.constant 0 : index
    %103 = vector.load %arg4[%c0_36, %c0_37] : memref<128x128xf32, #tpu.memory_space<vmem>>, vector<128x128xf32>
    %cst_38 = arith.constant dense<0.000000e+00> : vector<2x128xf32>
    %104 = tpu.matmul %102, %103, %cst_38 {dimension_numbers = #tpu.dot_dimension_numbers<[1], [0], [0], [1], [0, 0, 1, 1], [], []>} : vector<2x128xf32>, vector<128x128xf32>, vector<2x128xf32> -> vector<2x128xf32>
    %c0_39 = arith.constant 0 : index
    %c0_40 = arith.constant 0 : index
    %105 = vector.load %arg5[%c0_39, %c0_40] : memref<128x128xf32, #tpu.memory_space<vmem>>, vector<128x128xf32>
    %cst_41 = arith.constant dense<0.000000e+00> : vector<2x128xf32>
    %106 = tpu.matmul %104, %105, %cst_41 {dimension_numbers = #tpu.dot_dimension_numbers<[1], [0], [0], [1], [0, 0, 1, 1], [], []>} : vector<2x128xf32>, vector<128x128xf32>, vector<2x128xf32> -> vector<2x128xf32>
    %107 = vector.extract_strided_slice %106 {offsets = [0, 0], sizes = [1, 128], strides = [1, 1]} : vector<2x128xf32> to vector<1x128xf32>
    %cst_42 = arith.constant 9.765625E-4 : f32
    %108 = vector.broadcast %cst_42 : f32 to vector<1x128xf32>
    %109 = arith.mulf %107, %108 : vector<1x128xf32>
    %110 = vector.extract_strided_slice %106 {offsets = [1, 0], sizes = [1, 128], strides = [1, 1]} : vector<2x128xf32> to vector<1x128xf32>
    %cst_43 = arith.constant 9.765625E-4 : f32
    %111 = vector.broadcast %cst_43 : f32 to vector<1x128xf32>
    %112 = arith.mulf %110, %111 : vector<1x128xf32>
    %113 = arith.mulf %109, %109 : vector<1x128xf32>
    %114 = arith.subf %112, %113 : vector<1x128xf32>
    %cst_44 = arith.constant 0.000000e+00 : f32
    %115 = vector.broadcast %cst_44 : f32 to vector<1x128xf32>
    %116 = arith.maximumf %114, %115 : vector<1x128xf32>
    %117 = vector.broadcast %109 : vector<1x128xf32> to vector<64x128xf32>
    %118 = arith.subf %96, %117 : vector<64x128xf32>
    %cst_45 = arith.constant 9.99999974E-6 : f32
    %119 = vector.broadcast %cst_45 : f32 to vector<1x128xf32>
    %120 = arith.addf %116, %119 : vector<1x128xf32>
    %121 = math.rsqrt %120 : vector<1x128xf32>
    %122 = arith.mulf %121, %5 : vector<1x128xf32>
    %123 = vector.broadcast %122 : vector<1x128xf32> to vector<64x128xf32>
    %124 = arith.mulf %118, %123 : vector<64x128xf32>
    %125 = vector.broadcast %6 : vector<1x128xf32> to vector<64x128xf32>
    %126 = arith.addf %124, %125 : vector<64x128xf32>
    %cst_46 = arith.constant 0.000000e+00 : f32
    %127 = vector.broadcast %cst_46 : f32 to vector<64x128xf32>
    %128 = arith.maximumf %126, %127 : vector<64x128xf32>
    %129 = arith.truncf %128 : vector<64x128xf32> to vector<64x128xbf16>
    %130 = tpu.concatenate %42, %129, %42 in 0 : vector<16x128xbf16>, vector<64x128xbf16>, vector<16x128xbf16> -> vector<96x128xbf16>
    %131 = vector.extract_strided_slice %130 {offsets = [7, 0], sizes = [64, 128], strides = [1, 1]} : vector<96x128xbf16> to vector<64x128xbf16>
    %132 = arith.select %38, %131, %41 : vector<64x128xi1>, vector<64x128xbf16>
    %133 = vector.extract_strided_slice %130 {offsets = [8, 0], sizes = [64, 128], strides = [1, 1]} : vector<96x128xbf16> to vector<64x128xbf16>
    %134 = vector.extract_strided_slice %130 {offsets = [9, 0], sizes = [64, 128], strides = [1, 1]} : vector<96x128xbf16> to vector<64x128xbf16>
    %135 = arith.select %40, %134, %41 : vector<64x128xi1>, vector<64x128xbf16>
    %136 = vector.extract_strided_slice %130 {offsets = [15, 0], sizes = [64, 128], strides = [1, 1]} : vector<96x128xbf16> to vector<64x128xbf16>
    %137 = arith.select %38, %136, %41 : vector<64x128xi1>, vector<64x128xbf16>
    %138 = vector.extract_strided_slice %130 {offsets = [16, 0], sizes = [64, 128], strides = [1, 1]} : vector<96x128xbf16> to vector<64x128xbf16>
    %139 = vector.extract_strided_slice %130 {offsets = [17, 0], sizes = [64, 128], strides = [1, 1]} : vector<96x128xbf16> to vector<64x128xbf16>
    %140 = arith.select %40, %139, %41 : vector<64x128xi1>, vector<64x128xbf16>
    %141 = vector.extract_strided_slice %130 {offsets = [23, 0], sizes = [64, 128], strides = [1, 1]} : vector<96x128xbf16> to vector<64x128xbf16>
    %142 = arith.select %38, %141, %41 : vector<64x128xi1>, vector<64x128xbf16>
    %143 = vector.extract_strided_slice %130 {offsets = [24, 0], sizes = [64, 128], strides = [1, 1]} : vector<96x128xbf16> to vector<64x128xbf16>
    %144 = vector.extract_strided_slice %130 {offsets = [25, 0], sizes = [64, 128], strides = [1, 1]} : vector<96x128xbf16> to vector<64x128xbf16>
    %145 = arith.select %40, %144, %41 : vector<64x128xi1>, vector<64x128xbf16>
    %146 = tpu.concatenate %132, %133, %135, %137, %138, %140, %142, %143, %145 in 1 : vector<64x128xbf16>, vector<64x128xbf16>, vector<64x128xbf16>, vector<64x128xbf16>, vector<64x128xbf16>, vector<64x128xbf16>, vector<64x128xbf16>, vector<64x128xbf16>, vector<64x128xbf16> -> vector<64x1152xbf16>
    %c0_47 = arith.constant 0 : index
    %c0_48 = arith.constant 0 : index
    %147 = vector.load %arg8[%c0_47, %c0_48] : memref<1152x128xbf16, #tpu.memory_space<vmem>>, vector<1152x128xbf16>
    %cst_49 = arith.constant dense<0.000000e+00> : vector<64x128xf32>
    %148 = tpu.matmul %146, %147, %cst_49 {dimension_numbers = #tpu.dot_dimension_numbers<[1], [0], [0], [1], [0, 0, 1, 1], [], []>} : vector<64x1152xbf16>, vector<1152x128xbf16>, vector<64x128xf32> -> vector<64x128xf32>
    %149 = vector.broadcast %7 : vector<1x128xf32> to vector<64x128xf32>
    %150 = arith.addf %148, %149 : vector<64x128xf32>
    %c0_50 = arith.constant 0 : index
    %c0_51 = arith.constant 0 : index
    %c0_52 = arith.constant 0 : index
    %151 = vector.load %arg9[%c0_50, %c0_51, %c0_52] : memref<1x64x128xf32, #tpu.memory_space<vmem>>, vector<1x64x128xf32>
    %152 = vector.shape_cast %151 : vector<1x64x128xf32> to vector<64x128xf32>
    %153 = arith.addf %150, %152 : vector<64x128xf32>
    %c0_53 = arith.constant 0 : index
    %c0_54 = arith.constant 0 : index
    %c0_55 = arith.constant 0 : index
    %154 = vector.load %arg9[%c0_53, %c0_54, %c0_55] : memref<1x64x128xf32, #tpu.memory_space<vmem>>, vector<1x64x128xf32>
    %155 = vector.shape_cast %154 : vector<1x64x128xf32> to vector<64x128xf32>
    %156 = vector.shape_cast %153 : vector<64x128xf32> to vector<1x64x128xf32>
    tpu.vector_store %arg9[%c0_53, %c0_54, %c0_55], %156 {strides = array<i32>} : memref<1x64x128xf32, #tpu.memory_space<vmem>>, vector<1x64x128xf32>,
    return
  }
  func.func @transform_0(%arg0: i32) -> (i32, i32, i32) {
    %c0_i32 = arith.constant 0 : i32
    %c0_i32_0 = arith.constant 0 : i32
    %c0_i32_1 = arith.constant 0 : i32
    return %arg0, %c0_i32, %c0_i32_0 : i32, i32, i32
  }
  func.func @transform_1(%arg0: i32) -> (i32, i32) {
    %c0_i32 = arith.constant 0 : i32
    %c0_i32_0 = arith.constant 0 : i32
    %c0_i32_1 = arith.constant 0 : i32
    return %c0_i32, %c0_i32_0 : i32, i32
  }
  func.func @transform_2(%arg0: i32) -> (i32, i32) {
    %c0_i32 = arith.constant 0 : i32
    %c0_i32_0 = arith.constant 0 : i32
    %c0_i32_1 = arith.constant 0 : i32
    return %c0_i32, %c0_i32_0 : i32, i32
  }
  func.func @transform_3(%arg0: i32) -> (i32, i32) {
    %c0_i32 = arith.constant 0 : i32
    %c0_i32_0 = arith.constant 0 : i32
    %c0_i32_1 = arith.constant 0 : i32
    return %c0_i32, %c0_i32_0 : i32, i32
  }
  func.func @transform_4(%arg0: i32) -> (i32, i32) {
    %c0_i32 = arith.constant 0 : i32
    %c0_i32_0 = arith.constant 0 : i32
    %c0_i32_1 = arith.constant 0 : i32
    return %c0_i32, %c0_i32_0 : i32, i32
  }
  func.func @transform_5(%arg0: i32) -> (i32, i32) {
    %c0_i32 = arith.constant 0 : i32
    %c0_i32_0 = arith.constant 0 : i32
    %c0_i32_1 = arith.constant 0 : i32
    return %c0_i32, %c0_i32_0 : i32, i32
  }
  func.func @transform_6(%arg0: i32) -> (i32, i32) {
    %c0_i32 = arith.constant 0 : i32
    %c0_i32_0 = arith.constant 0 : i32
    %c0_i32_1 = arith.constant 0 : i32
    return %c0_i32, %c0_i32_0 : i32, i32
  }
  func.func @transform_7(%arg0: i32) -> (i32, i32) {
    %c0_i32 = arith.constant 0 : i32
    %c0_i32_0 = arith.constant 0 : i32
    %c0_i32_1 = arith.constant 0 : i32
    return %c0_i32, %c0_i32_0 : i32, i32
  }
  func.func @transform_8(%arg0: i32) -> (i32, i32, i32) {
    %c0_i32 = arith.constant 0 : i32
    %c0_i32_0 = arith.constant 0 : i32
    %c0_i32_1 = arith.constant 0 : i32
    return %arg0, %c0_i32, %c0_i32_0 : i32, i32, i32
  }
}

</mosaic_0001>

<bundles_post_ra>
// kernel: tpu_custom_call.1
= control target key start
LH: loop header
LB: loop body
LE: loop exit
PB: predicated region body
PF: predicated region fallthrough
CT: control target
= control target key end

     0   :  { %s7155_s0 = inlined_call_operand.vmem [shape: bf16[2,16,128], index: 0, kind: input, shape index: {}]   ;;  %s7156_s1 = inlined_call_operand.hbm [shape: bf16[128,128], index: 1, kind: input, shape index: {}]   ;;  %s7157_s2 = inlined_call_operand.vmem [shape: bf16[64,16], index: 2, kind: input, shape index: {}]   ;;  %s7158_s3 = inlined_call_operand.hbm [shape: f32[128,128], index: 3, kind: input, shape index: {}]   ;;  %s7159_s4 = inlined_call_operand.hbm [shape: f32[128,128], index: 4, kind: input, shape index: {}]   ;;  %s7160_s5 = inlined_call_operand.vmem [shape: f32[8,128], index: 5, kind: input, shape index: {}]   ;;  %s7161_s6 = inlined_call_operand.hbm [shape: bf16[1152,128], index: 6, kind: input, shape index: {}]   ;;  %s7162_s7 = inlined_call_operand.hbm [shape: bf16[1152,128], index: 7, kind: input, shape index: {}]   ;;  %s7163_s8 = inlined_call_operand.hbm [shape: f32[2,64,128], index: 8, kind: output, shape index: {}]  }
   0x1   :  { %7261 = sst [smem:[#allocation51_spill]] %s7156_s1 }
   0x2   :  { %7262 = sst [smem:[#allocation52_spill]] %s7158_s3 }
   0x3   :  { %7263 = sst [smem:[#allocation53_spill]] %s7161_s6 }
   0x4   :  { %13 = vsyncpa [#allocation3], 0 }
   0x5   :  { %14 = vsyncpa [#allocation6], 0 }
   0x6   :  { %15 = vsyncpa [#allocation9], 0 }
   0x7   :  { %16 = vsyncpa [#allocation4], 0 }
   0x8   :  { %18 = vsyncpa [#allocation4 + $0x1], 0  ;;  %s5399_s27 = smov 0   ;;  %s5401_s28 = smov 0  }
   0x9   :  { %s5403_s29 = smov 0   ;;  %s5405_s30 = smov 0  }
   0xa LB: > { %7264 = sst [smem:[#allocation16_spill]] %s5336_s29  ;;  %s5420_s9 = sadd.s32 4294967295, %s5340_s30   ;;  %s5340_s30 = sphi %s5405_s30, %s7592_s30   ;;  %s5336_s29 = sphi %s5403_s29, %s7594_s29   ;;  %s5332_s28 = sphi %s5401_s28, %s7596_s28   ;;  %s5328_s27 = sphi %s5399_s27, %s7595_s27  }
   0xb   : > { %s4159_s10 = sadd.s32 4294967294, %s5340_s30   ;;  %s5424_s11 = sadd.s32 1, %s5340_s30  }
   0xc   : > { %7265 = sst [smem:[#allocation17_spill]] %s5424_s11  ;;  %s204_s12 = sadd.s32 1, %s5336_s29 }
   0xd   : > { %s201_s13 = ssub.s32 %s5340_s30, %s5424_s11  ;;  %p214_p0 = scmp.ne.s32.totalorder %s5336_s29, %s5332_s28 }
   0xe   : > { %p202_p1 = scmp.eq.s32.totalorder %s201_s13, 0  ;;  %p215_p2 = scmp.eq.s32.totalorder %s5420_s9, 1 }
   0xf   : > { %p220_p3 = scmp.ne.s32.totalorder %s5332_s28, %s5328_s27  ;;  %p221_p4 = scmp.eq.s32.totalorder %s4159_s10, 1 }
  0x10   : > { %s5435_s14 = scalar_select %p202_p1, %s5336_s29, %s204_s12  }
  0x11   : > { %p5437_p5 = por %p215_p2, %p214_p0  ;;  %p5441_p6 = por %p221_p4, %p220_p3 }
  0x12   : > { %7266 = sst [smem:[#allocation18_spill]] %s5435_s14  ;;  %p4160_p7 = scmp.ge.s32.totalorder %s5340_s30, 1 }
  0x13   : > { %p228_p8 = scmp.lt.s32.totalorder %s5340_s30, 3  ;;  %p5023_p9 = scmp.eq.s32.totalorder %s5420_s9, 0 }
  0x14   : > { %s7270_s3 = sld [smem:[#allocation52_spill]]  ;;  %s5342_s21 = smov [#allocation5]  }
  0x15   : > { %p5448_p10 = pnand %p4160_p7, %p228_p8  ;;  %s258_s22 = sshll.u32 %s5342_s21, 4  ;;  %s259_s22 = int_to_ptr.vmem [resolvable:$true] %s258_s22 }
  0x16   : > { %s7272_s6 = sld [smem:[#allocation53_spill]]  ;;  %s5343_s10 = smov 128  }
  0x17   : > { %p5003_p11 = pneg %p5448_p10  ;;  %s5344_s12 = smov 8  }
  0x18   : > { %s5345_s13 = smov [#allocation8]   ;;  %s7273_s1 = sld [smem:[#allocation51_spill]] }
  0x19   : > { %p5459_p12 = pnand %p5023_p9, %p5003_p11  ;;  %s289_s18 = sshll.u32 %s5345_s13, 4  ;;  %s290_s18 = int_to_ptr.vmem [resolvable:$true] %s289_s18 }
  0x1a   : > { %s256_s20 = sshll.u32 %s7270_s3, 4  ;;  %s5346_s14 = smov 64   ;;  %s257_s20 = int_to_ptr.hbm [resolvable:$true] %s256_s20 }
  0x1b   : > { %5009 = dma.hbm_to_vmem [thread:$0]  (!%p5459_p12), %s257_s20, 2048, %s259_s22, [#allocation6], %s5343_s10, %s5343_s10, %s5344_s12  }
  0x1c   : > { %s287_s26 = sshll.u32 %s7272_s6, 4  ;;  %s5347_s24 = smov 4   ;;  %s288_s26 = int_to_ptr.hbm [resolvable:$true] %s287_s26 }
  0x1d   : > { %5015 = dma.hbm_to_vmem [thread:$0]  (!%p5459_p12), %s288_s26, 9216, %s290_s18, [#allocation9], %s5346_s14, %s5346_s14, %s5347_s24  }
  0x1e   : > { %s239_s3 = sshll.u32 %s7273_s1, 4  ;;  %s270_s29 = sshll.u32 %s7159_s4, 4  ;;  %s240_s3 = int_to_ptr.hbm [resolvable:$true] %s239_s3  ;;  %s271_s29 = int_to_ptr.hbm [resolvable:$true] %s270_s29 }
  0x1f   : > { %s5348_s20 = smov [#allocation2]   ;;  %s5349_s13 = smov [#allocation7]  }
  0x20   : > { %s241_s22 = sshll.u32 %s5348_s20, 4  ;;  %s272_s19 = sshll.u32 %s5349_s13, 4  ;;  %s242_s22 = int_to_ptr.vmem [resolvable:$true] %s241_s22  ;;  %s273_s19 = int_to_ptr.vmem [resolvable:$true] %s272_s19 }
  0x21   : > { %5006 = dma.hbm_to_vmem [thread:$0]  (!%p5459_p12), %s240_s3, 1024, %s242_s22, [#allocation3], %s5346_s14, %s5346_s14, %s5347_s24  }
  0x22   : > { %s301_s11 = sshll.u32 %s7162_s7, 4  ;;  %s5350_s26 = smov [#allocation10]   ;;  %s302_s11 = int_to_ptr.hbm [resolvable:$true] %s301_s11 }
  0x23   : > { %5012 = dma.hbm_to_vmem [thread:$0]  (!%p5459_p12), %s271_s29, 2048, %s273_s19, [#allocation6], %s5343_s10, %s5343_s10, %s5344_s12  }
  0x24   : > { %s303_s6 = sshll.u32 %s5350_s26, 4  ;;  %327 = sbr.rel (%p5448_p10) target bundleno = 1690 (0x69a), region = 52  ;;  %s304_s6 = int_to_ptr.vmem [resolvable:$true] %s303_s6 }
  0x25   : > { %5018 = dma.hbm_to_vmem [thread:$0]  (!%p5459_p12), %s302_s11, 9216, %s304_s6, [#allocation9], %s5346_s14, %s5346_s14, %s5347_s24  }
  0x29   : > { %5311 = dma.done.wait (%p5023_p9), [#allocation3], 1024  }
  0x2a   : > { %5313 = vsyncadd (%p5023_p9), [#allocation3], 4294966272 }
  0x2b   : > { %5315 = dma.done.wait (%p5023_p9), [#allocation6], 4096  }
  0x2c   : > { %5317 = vsyncadd (%p5023_p9), [#allocation6], 4294963200 }
  0x2d   : > { %5319 = dma.done.wait (%p5023_p9), [#allocation9], 18432  }
  0x2e   : > { %5321 = vsyncadd (%p5023_p9), [#allocation9], 4294948864  ;;  %v4822_v0 = vld [vmem:[#allocation2 + $0x38] sm:$0xff]  ;;  %v4821_v1 = vld [vmem:[#allocation2 + $0x30] sm:$0xff]  ;;  %p382_p13 = scmp.lt.s32.totalorder %s5420_s9, 1  ;;  %vm507_vm0 = vcmask 130048  }
  0x2f   : > { %464 = vmatpush.bf16.msra.mxu0 %v4822_v0  ;;  %v4820_v2 = vld [vmem:[#allocation2 + $0x28] sm:$0xff]  ;;  %v4819_v3 = vld [vmem:[#allocation2 + $0x20] sm:$0xff]  ;;  %v4818_v4 = vld [vmem:[#allocation2 + $0x18] sm:$0xff]  ;;  %s379_s19 = sand.u32 1, %s5332_s28   ;;  %vm7170_vm1 = vcmask 1040384   ;;  %s4971_s11 = sshll.u32 %s5420_s9, 6 }
  0x30   : > { %v4817_v5 = vld [vmem:[#allocation2 + $0x10] sm:$0xff]  ;;  %s383_s1 = scalar_select %p382_p13, %s5420_s9, 1  ;;  %v4816_v6 = vld [vmem:[#allocation2 + $0x8] sm:$0xff]  ;;  %v4815_v7 = vld [vmem:[#allocation2] sm:$0xff] }
  0x31   : > { %v5507_v10 = vld [vmem:[%s7160_s5] sm:$0xff]  ;;  %v4825_v17 = vld [vmem:[%s7157_s2 + $0x10] sm:$0xff]  ;;  %v4824_v18 = vld [vmem:[%s7157_s2 + $0x8] sm:$0xff]  ;;  %s4173_s21 = sshll.u32 %s379_s19, 6  ;;  %s4043_s23 = scalar_lea.hbm %s7163_s8, %s4971_s11 }
  0x32   : > { %s4813_s3 = sshll.u32 %s383_s1, 3  ;;  %v409_v11 = vperm.slane %v5507_v10, 0  ;;  %v4823_v16 = vld [vmem:[%s7157_s2] sm:$0xff]  ;;  %v4826_v19 = vld [vmem:[%s7157_s2 + $0x18] sm:$0xff]  ;;  %v728_v21 = vld [vmem:[#allocation5 + $0x70] sm:$0xff]  ;;  %s5527_s26 = scalar_lea.vmem [#allocation11], %s4173_s21 }
  0x33   : > { %465 = vmatpush.bf16.msra.mxu0 %v4821_v1  ;;  %s386_s14 = scalar_lea.vmem %s7155_s0, %s4813_s3  ;;  %v729_v20 = vld [vmem:[#allocation5 + $0x78] sm:$0xff]  ;;  %v727_v22 = vld [vmem:[#allocation5 + $0x68] sm:$0xff]  ;;  %v726_v23 = vld [vmem:[#allocation5 + $0x60] sm:$0xff]  ;;  %s4044_s10 = sshll.u32 %s5527_s26, 4  ;;  %s4045_s10 = int_to_ptr.vmem [resolvable:$true] %s4044_s10 }
  0x34   : > { %v4814_v8 = vld [vmem:[%s386_s14] sm:$0xff]  ;;  %v725_v24 = vld [vmem:[#allocation5 + $0x58] sm:$0xff]  ;;  %v724_v25 = vld [vmem:[#allocation5 + $0x50] sm:$0xff]  ;;  %s4046_s12 = sshll.u32 %s4043_s23, 4  ;;  %s4032_s9 = scalar_lea.sflag [#allocation4], %s379_s19  ;;  %s4047_s12 = int_to_ptr.hbm [resolvable:$true] %s4046_s12 }
  0x35   : > { %v723_v26 = vld [vmem:[#allocation5 + $0x48] sm:$0xff]  ;;  %v722_v28 = vld [vmem:[#allocation5 + $0x40] sm:$0xff]  ;;  %v721_v29 = vld [vmem:[#allocation5 + $0x38] sm:$0xff]  ;;  %s5280_s18 = sshra.s32 %s4047_s12, 4  ;;  %s5286_s22 = scalar_lea.hbm %s7163_s8, 128  ;;  %s5281_s18 = int_to_ptr.hbm [resolvable:$true] %s5280_s18 }
  0x36   : > { %v720_v30 = vld [vmem:[#allocation5 + $0x30] sm:$0xff]  ;;  %v719_v31 = vld [vmem:[#allocation5 + $0x28] sm:$0xff]  ;;  %v718_v33 = vld [vmem:[#allocation5 + $0x20] sm:$0xff]  ;;  %s5282_s24 = scalar_lea.hbm %s5281_s18, 64  ;;  %p5287_p3 = scmp.lt.s32.totalorder %s5281_s18, %s7163_s8 }
  0x37   : > { %466 = vmatpush.bf16.msra.mxu0 %v4820_v2  ;;  %v717_v35 = vld [vmem:[#allocation5 + $0x18] sm:$0xff]  ;;  %v716_v36 = vld [vmem:[#allocation5 + $0x10] sm:$0xff]  ;;  %v715_v37 = vld [vmem:[#allocation5 + $0x8] sm:$0xff]  ;;  %p5283_p0 = scmp.ne.s32.totalorder %s5281_s18, %s5282_s24  ;;  %p5288_p4 = scmp.lt.s32.totalorder %s5286_s22, %s5282_s24 }
  0x38   : > { %v714_v39 = vld [vmem:[#allocation5] sm:$0xff]  ;;  %v765_v41 = vld [vmem:[#allocation7 + $0x78] sm:$0xff]  ;;  %v764_v42 = vld [vmem:[#allocation7 + $0x70] sm:$0xff] }
  0x39   : > { %766 = vmatpush.msra.mxu3 %v765_v41  ;;  %v763_v44 = vld [vmem:[#allocation7 + $0x68] sm:$0xff]  ;;  %v762_v49 = vld [vmem:[#allocation7 + $0x60] sm:$0xff]  ;;  %v761_v53 = vld [vmem:[#allocation7 + $0x58] sm:$0xff]  ;;  %p5284_p1 = pnand %p5283_p0, %p5437_p5  ;;  %p5289_p7 = por %p5288_p4, %p5287_p3 }
  0x3a   : > { %v760_v57 = vld [vmem:[#allocation7 + $0x50] sm:$0xff]  ;;  %v759_v61 = vld [vmem:[#allocation7 + $0x48] sm:$0xff]  ;;  %v758_v2 = vld [vmem:[#allocation7 + $0x40] sm:$0xff] }
  0x3b   : > { %467 = vmatpush.bf16.msra.mxu0 %v4819_v3  ;;  %767 = vmatpush.msra.mxu3 %v764_v42  ;;  %v4850_v41 = vld [vmem:[#allocation8 + $0xb8] sm:$0xff]  ;;  %p5285_p2 = pneg %p5284_p1 }
  0x3c   : > { %v4858_v42 = vld [vmem:[#allocation8 + $0xf8] sm:$0xff] }
  0x3d   : > { %768 = vmatpush.msra.mxu3 %v763_v44  ;;  %p5290_p8 = pnand %p5289_p7, %p5285_p2 }
  0x3f   : > { %468 = vmatpush.bf16.msra.mxu0 %v4818_v4  ;;  %769 = vmatpush.msra.mxu3 %v762_v49 }
  0x41   : > { %770 = vmatpush.msra.mxu3 %v761_v53 }
  0x43   : > { %469 = vmatpush.bf16.msra.mxu0 %v4817_v5  ;;  %771 = vmatpush.msra.mxu3 %v760_v57  ;;  %v4857_v57 = vld [vmem:[#allocation8 + $0xf0] sm:$0xff] }
  0x45   : > { %772 = vmatpush.msra.mxu3 %v759_v61 }
  0x47   : > { %470 = vmatpush.bf16.msra.mxu0 %v4816_v6  ;;  %v757_v6 = vld [vmem:[#allocation7 + $0x38] sm:$0xff]  ;;  %773 = vmatpush.msra.mxu3 %v758_v2 }
  0x49   : > { %774 = vmatpush.msra.mxu3 %v757_v6  ;;  %v7176_v6 = vmov 0  }
  0x4b   : > { %471 = vmatpush.bf16.msra.mxu0 %v4815_v7 }
  0x4e   : > { %472 = vmatmul.bf16.vlgmr.msra.gmra.mxu0 %v4814_v8 }
  0xcb   : > { %v473_v9 = vpop.f32.mrf.mxu0 }
  0xcc   : > { %v474_v13 = vadd.f32 %v473_v9, %v409_v11 }
  0xd3   : > { %v475_v12 = vpop.f32.mrf.mxu0 }
  0xd4   : > { %v476_v14 = vadd.f32 %v475_v12, %v409_v11  ;;  %v756_v11 = vld [vmem:[#allocation7 + $0x30] sm:$0xff] }
  0xd5   : > { %775 = vmatpush.msra.mxu3 %v756_v11 }
  0xd6   : > { %v486_v15 = vpack.c.bf16 %v476_v14, %v474_v13  ;;  %v755_v14 = vld [vmem:[#allocation7 + $0x28] sm:$0xff] }
  0xd7   : > { %776 = vmatpush.msra.mxu3 %v755_v14 }
  0xd8   : > { %527 = vmatpush.bf16.msra.mxu1 %v486_v15  ;;  %4972 = vmatpush.bf16.msra.mxu2 %v486_v15 }
  0xdb   : > { %4228 = vmatmul.msk.bf16.vlgmr.msra.gmra.mxu1 %vm507_vm0, %v4823_v16  ;;  %4230 = vmatmul.msk.bf16.vlgmr.msra.gmra.mxu2 %vm507_vm0, %v4825_v17  ;;  %v754_v17 = vld [vmem:[#allocation7 + $0x20] sm:$0xff] }
  0xdc   : > { %730 = vmatpush.msrb.mxu2 %v729_v20  ;;  %v753_v20 = vld [vmem:[#allocation7 + $0x18] sm:$0xff]  ;;  %777 = vmatpush.msra.mxu3 %v754_v17  ;;  %v4831_v17 = vld [vmem:[#allocation8 + $0x20] sm:$0xff] }
  0xdd   : > { %2339 = vmatpush.bf16.msrb.mxu1 %v4858_v42 }
  0xde   : > { %731 = vmatpush.msrb.mxu2 %v728_v21  ;;  %778 = vmatpush.msra.mxu3 %v753_v20 }
  0xe0   : > { %732 = vmatpush.msrb.mxu2 %v727_v22 }
  0xe1   : > { %2340 = vmatpush.bf16.msrb.mxu1 %v4857_v57 }
  0xe2   : > { %733 = vmatpush.msrb.mxu2 %v726_v23  ;;  %v752_v23 = vld [vmem:[#allocation7 + $0x10] sm:$0xff] }
  0xe3   : > { %779 = vmatpush.msra.mxu3 %v752_v23  ;;  %v4837_v23 = vld [vmem:[#allocation8 + $0x50] sm:$0xff] }
  0xe4   : > { %734 = vmatpush.msrb.mxu2 %v725_v24 }
  0xe6   : > { %735 = vmatpush.msrb.mxu2 %v724_v25 }
  0xe8   : > { %736 = vmatpush.msrb.mxu2 %v723_v26  ;;  %v751_v26 = vld [vmem:[#allocation7 + $0x8] sm:$0xff] }
  0xe9   : > { %780 = vmatpush.msra.mxu3 %v751_v26 }
  0xea   : > { %737 = vmatpush.msrb.mxu2 %v722_v28 }
  0xeb   : > { %4229 = vmatmul.msk.bf16.gmra.mxu1 %vm507_vm0, %v4824_v18  ;;  %4231 = vmatmul.msk.bf16.gmra.mxu2 %vm507_vm0, %v4826_v19 }
  0xec   : > { %738 = vmatpush.msrb.mxu2 %v721_v29 }
  0xee   : > { %739 = vmatpush.msrb.mxu2 %v720_v30 }
  0xf0   : > { %740 = vmatpush.msrb.mxu2 %v719_v31 }
  0xf2   : > { %741 = vmatpush.msrb.mxu2 %v718_v33  ;;  %v750_v33 = vld [vmem:[#allocation7] sm:$0xff] }
  0xf3   : > { %781 = vmatpush.msra.mxu3 %v750_v33  ;;  %v4847_v33 = vld [vmem:[#allocation8 + $0xa0] sm:$0xff] }
  0xf4   : > { %742 = vmatpush.msrb.mxu2 %v717_v35 }
  0xf5   : > { %2310 = vmatpush.bf16.msrb.mxu3 %v4850_v41  ;;  %v4830_v41 = vld [vmem:[#allocation8 + $0x18] sm:$0xff] }
  0xf6   : > { %743 = vmatpush.msrb.mxu2 %v716_v36  ;;  %v557_v36 = vlaneseq }
  0xf8   : > { %744 = vmatpush.msrb.mxu2 %v715_v37  ;;  %v4834_v37 = vld [vmem:[#allocation8 + $0x38] sm:$0xff] }
  0xf9   : > { %2252 = vmatpush.bf16.msrb.mxu0 %v4834_v37 }
  0xfa   : > { %745 = vmatpush.msrb.mxu2 %v714_v39  ;;  %v5584_v39 = vshrl.u32 %v557_v36, 7 }
  0xfc   : > { %v560_v44 = vadd.s32 16, %v5584_v39  ;;  %v570_v49 = vand.u32 7, %v5584_v39 }
  0xfe   : > { %vm5592_vm2 = vcmp.ge.s32.totalorder %v570_v49, 1  ;;  %vm5611_vm7 = vcmp.le.s32.totalorder %v570_v49, 6 }
  0xff   : > { %vm872_vm6 = vmpackc.low %vm5592_vm2, %vm5592_vm2 }
 0x100   : > { %vm968_vm14 = vmpackc.low %vm5611_vm7, %vm5611_vm7 }
 0x101   : > { %v976_v42 = vsel %vm968_vm14, 65537, %v7176_v6 }
 0x158   : > { %v5525_v27 = vpop.f32.mrf.mxu1 }
 0x159   : > { %549 = vst [vmem:[%s5527_s26] sm:$0xff] %v5525_v27  ;;  %v691_v45 = vmul.f32 %v5525_v27, %v5525_v27 }
 0x15e   : > { %v5531_v32 = vpop.f32.mrf.mxu2 }
 0x15f   : > { %553 = vst [vmem:[%s5527_s26 + $0x20] sm:$0xff] %v5531_v32  ;;  %v695_v58 = vmul.f32 %v5531_v32, %v5531_v32 }
 0x160   : > { %v5535_v34 = vpop.f32.mrf.mxu1 }
 0x161   : > { %550 = vst [vmem:[%s5527_s26 + $0x8] sm:$0xff] %v5535_v34  ;;  %v692_v43 = vmul.f32 %v5535_v34, %v5535_v34  ;;  %v678_v46 = vadd.f32 %v5535_v34, %v5525_v27 }
 0x163   : > { %v699_v51 = vadd.f32 %v692_v43, %v691_v45  ;;  %v559_v43 = vadd.s32 8, %v5584_v39  ;;  %v561_v45 = vadd.s32 24, %v5584_v39 }
 0x165   : > { %v591_v53 = vand.u32 7, %v561_v45 }
 0x166   : > { %v5539_v38 = vpop.f32.mrf.mxu2 }
 0x167   : > { %554 = vst [vmem:[%s5527_s26 + $0x28] sm:$0xff] %v5539_v38  ;;  %v696_v62 = vmul.f32 %v5539_v38, %v5539_v38  ;;  %vm5604_vm5 = vcmp.ge.s32.totalorder %v591_v53, 1  ;;  %vm5635_vm13 = vcmp.le.s32.totalorder %v591_v53, 6  ;;  %v4839_v53 = vld [vmem:[#allocation8 + $0x60] sm:$0xff] }
 0x168   : > { %v5543_v40 = vpop.f32.mrf.mxu1  ;;  %vm875_vm12 = vmpackc.low %vm5604_vm5, %vm5604_vm5 }
 0x169   : > { %551 = vst [vmem:[%s5527_s26 + $0x10] sm:$0xff] %v5543_v40  ;;  %v693_v47 = vmul.f32 %v5543_v40, %v5543_v40  ;;  %v679_v50 = vadd.f32 %v678_v46, %v5543_v40  ;;  %v4833_v46 = vld [vmem:[#allocation8 + $0x30] sm:$0xff] }
 0x16a   : > { %2253 = vmatpush.bf16.msrb.mxu0 %v4833_v46 }
 0x16b   : > { %v700_v54 = vadd.f32 %v699_v51, %v693_v47  ;;  %v562_v47 = vadd.s32 32, %v5584_v39  ;;  %v584_v51 = vand.u32 7, %v560_v44 }
 0x16d   : > { %vm5600_vm4 = vcmp.ge.s32.totalorder %v584_v51, 1  ;;  %vm5627_vm11 = vcmp.le.s32.totalorder %v584_v51, 6 }
 0x16e   : > { %v5555_v48 = vpop.f32.mrf.mxu2  ;;  %vm874_vm10 = vmpackc.low %vm5600_vm4, %vm5600_vm4 }
 0x16f   : > { %555 = vst [vmem:[%s5527_s26 + $0x30] sm:$0xff] %v5555_v48  ;;  %v697_v3 = vmul.f32 %v5555_v48, %v5555_v48  ;;  %vm970_vm2 = vmpackc.low %vm5627_vm11, %vm5627_vm11 }
 0x170   : > { %v5560_v52 = vpop.f32.mrf.mxu1  ;;  %v978_v44 = vsel %vm970_vm2, 65537, %v7176_v6 }
 0x171   : > { %552 = vst [vmem:[%s5527_s26 + $0x18] sm:$0xff] %v5560_v52  ;;  %v680_v55 = vadd.f32 %v679_v50, %v5560_v52  ;;  %v694_v56 = vmul.f32 %v5560_v52, %v5560_v52  ;;  %v577_v50 = vand.u32 7, %v559_v43 }
 0x173   : > { %v681_v59 = vadd.f32 %v680_v55, %v5531_v32  ;;  %v701_v60 = vadd.f32 %v700_v54, %v694_v56  ;;  %v4842_v54 = vld [vmem:[#allocation8 + $0x78] sm:$0xff]  ;;  %v563_v55 = vadd.s32 40, %v5584_v39  ;;  %v4849_v56 = vld [vmem:[#allocation8 + $0xb0] sm:$0xff]  ;;  %vm5596_vm3 = vcmp.ge.s32.totalorder %v577_v50, 1 }
 0x174   : > { %2281 = vmatpush.bf16.msra.mxu2 %v4842_v54  ;;  %2311 = vmatpush.bf16.msrb.mxu3 %v4849_v56  ;;  %vm873_vm8 = vmpackc.low %vm5596_vm3, %vm5596_vm3  ;;  %vm5618_vm9 = vcmp.le.s32.totalorder %v577_v50, 6  ;;  %v984_v56 = vunpack.c.l.b16 %v976_v42 }
 0x175   : > { %v702_v63 = vadd.f32 %v701_v60, %v695_v58  ;;  %v682_v0 = vadd.f32 %v681_v59, %v5539_v38  ;;  %vm969_vm15 = vmpackc.low %vm5618_vm9, %vm5618_vm9  ;;  %v4846_v58 = vld [vmem:[#allocation8 + $0x98] sm:$0xff]  ;;  %vm7175_vm9 = vsmask.f32 3328 }
 0x176   : > { %v5573_v1 = vpop.f32.mrf.mxu2  ;;  %v977_v43 = vsel %vm969_vm15, 65537, %v7176_v6  ;;  %v4854_v59 = vld [vmem:[#allocation8 + $0xd8] sm:$0xff]  ;;  %vm7181_vm15 = vsmask.f32 7424 }
 0x177   : > { %556 = vst [vmem:[%s5527_s26 + $0x38] sm:$0xff] %v5573_v1  ;;  %v683_v4 = vadd.f32 %v682_v0, %v5555_v48  ;;  %v703_v5 = vadd.f32 %v702_v63, %v696_v62  ;;  %v698_v8 = vmul.f32 %v5573_v1, %v5573_v1  ;;  %v4832_v62 = vld [vmem:[#allocation8 + $0x28] sm:$0xff]  ;;  %v985_v60 = vunpack.c.l.b16 %v977_v43  ;;  %v4829_v63 = vld [vmem:[#allocation8 + $0x10] sm:$0xff]  ;;  %v4827_v43 = vld [vmem:[#allocation8] sm:$0xff] }
 0x178   : > { %2254 = vmatpush.bf16.msrb.mxu0 %v4832_v62 }
 0x179   : > { %v684_v7 = vadd.f32 %v683_v4, %v5573_v1  ;;  %v704_v9 = vadd.f32 %v703_v5, %v697_v3  ;;  %v598_v3 = vand.u32 7, %v562_v47  ;;  %v4841_v4 = vld [vmem:[#allocation8 + $0x70] sm:$0xff] }
 0x17a   : > { %2282 = vmatpush.bf16.msra.mxu2 %v4841_v4 }
 0x17b   : > { %v685_v12 = vrot.slane %v684_v7, 4  ;;  %v705_v13 = vadd.f32 %v704_v9, %v698_v8  ;;  %v881_v8 = vsel %vm873_vm8, 65537, %v7176_v6  ;;  %v605_v9 = vand.u32 7, %v563_v55 }
 0x17c   : > { %v889_v20 = vunpack.c.l.b16 %v881_v8  ;;  %vm5646_vm0 = vcmp.le.s32.totalorder %v598_v3, 6  ;;  %2255 = vmatpush.bf16.msrb.mxu0 %v4831_v17  ;;  %vm5659_vm4 = vcmp.ge.s32.totalorder %v598_v3, 1 }
 0x17d   : > { %v686_v15 = vadd.f32 %v685_v12, %v684_v7  ;;  %v706_v16 = vrot.slane %v705_v13, 4  ;;  %v880_v7 = vsel %vm872_vm6, 65537, %v7176_v6  ;;  %v4848_v12 = vld [vmem:[#allocation8 + $0xa8] sm:$0xff]  ;;  %vm5655_vm3 = vcmp.le.s32.totalorder %v605_v9, 6  ;;  %vm971_vm6 = vmpackc.low %vm5635_vm13, %vm5635_vm13 }
 0x17e   : > { %2312 = vmatpush.bf16.msrb.mxu3 %v4848_v12  ;;  %vm5663_vm5 = vcmp.ge.s32.totalorder %v605_v9, 1  ;;  %vm972_vm8 = vmpackc.low %vm5646_vm0, %vm5646_vm0  ;;  %v979_v45 = vsel %vm971_vm6, 65537, %v7176_v6  ;;  %v4845_v12 = vld [vmem:[#allocation8 + $0x90] sm:$0xff] }
 0x17f   : > { %v687_v18 = vrot.slane %v686_v15, 2  ;;  %v707_v19 = vadd.f32 %v706_v16, %v705_v13  ;;  %v4856_v13 = vld [vmem:[#allocation8 + $0xe8] sm:$0xff]  ;;  %v888_v16 = vunpack.c.l.b16 %v880_v7  ;;  %vm973_vm7 = vmpackc.low %vm5655_vm3, %vm5655_vm3  ;;  %v980_v54 = vsel %vm972_vm8, 65537, %v7176_v6 }
 0x180   : > { %2341 = vmatpush.bf16.msrb.mxu1 %v4856_v13  ;;  %2256 = vmatpush.bf16.msrb.mxu0 %v4830_v41  ;;  %v981_v55 = vsel %vm973_vm7, 65537, %v7176_v6  ;;  %v987_v62 = vunpack.c.l.b16 %v979_v45  ;;  %v4853_v13 = vld [vmem:[#allocation8 + $0xd0] sm:$0xff]  ;;  %vm877_vm11 = vmpackc.low %vm5663_vm5, %vm5663_vm5 }
 0x181   : > { %v688_v21 = vadd.f32 %v687_v18, %v686_v15  ;;  %v708_v22 = vrot.slane %v707_v19, 2  ;;  %v882_v15 = vsel %vm874_vm10, 65537, %v7176_v6  ;;  %v5670_v37 = vpack.c.b16 %v889_v20, %v888_v16  ;;  %vm876_vm10 = vmpackc.low %vm5659_vm4, %vm5659_vm4 }
 0x182   : > { %2313 = vmatpush.bf16.msrb.mxu3 %v4847_v33  ;;  %v988_v16 = vunpack.c.l.b16 %v980_v54  ;;  %v989_v20 = vunpack.c.l.b16 %v981_v55  ;;  %v4852_v33 = vld [vmem:[#allocation8 + $0xc8] sm:$0xff]  ;;  %v1429_v54 = vrot.slane %v7176_v6, 3 }
 0x183   : > { %v689_v24 = vrot.slane %v688_v21, 1  ;;  %v709_v25 = vadd.f32 %v708_v22, %v707_v19  ;;  %v883_v19 = vsel %vm875_vm12, 65537, %v7176_v6  ;;  %v890_v22 = vunpack.c.l.b16 %v882_v15 }
 0x184   : > { %v891_v36 = vunpack.c.l.b16 %v883_v19  ;;  %v902_v49 = vshrl.u32 %v5670_v37, 16  ;;  %v905_v50 = vshll.u32 %v5670_v37, 16  ;;  %2257 = vmatpush.bf16.msrb.mxu0 %v4829_v63  ;;  %v4828_v19 = vld [vmem:[#allocation8 + $0x8] sm:$0xff]  ;;  %vm7182_vm12 = vsmask.f32 4352 }
 0x185   : > { %v710_v28 = vrot.slane %v709_v25, 1  ;;  %v690_v29 = vadd.f32 %v689_v24, %v688_v21 }
 0x186   : > { %v5697_v47 = vpack.c.b16 %v891_v36, %v890_v22  ;;  %v907_v2 = vrot.slane %v905_v50, 5  ;;  %2314 = vmatpush.bf16.msrb.mxu3 %v4846_v58  ;;  %v5746_v36 = vpack.c.b16 %v989_v20, %v988_v16  ;;  %v884_v58 = vsel %vm876_vm10, 65537, %v7176_v6  ;;  %v4843_v16 = vld [vmem:[#allocation8 + $0x80] sm:$0xff]  ;;  %v4866_v20 = vld [vmem:[#allocation8 + $0x138] sm:$0xff] }
 0x187   : > { %v711_v30 = vadd.f32 %v710_v28, %v709_v25  ;;  %v4840_v25 = vld [vmem:[#allocation8 + $0x68] sm:$0xff]  ;;  %v885_v28 = vsel %vm877_vm11, 65537, %v7176_v6 }
 0x188   : > { %2283 = vmatpush.bf16.msra.mxu2 %v4840_v25  ;;  %v910_v3 = vshrl.u32 %v5697_v47, 16  ;;  %v913_v4 = vshll.u32 %v5697_v47, 16  ;;  %2258 = vmatpush.bf16.msrb.mxu0 %v4828_v19  ;;  %v4851_v19 = vld [vmem:[#allocation8 + $0xc0] sm:$0xff] }
 0x189   : > { %v713_v31 = vsel %vm7170_vm1, %v690_v29, %v711_v30  ;;  %v5795_v29 = vunpack.c.h.b16 %v7176_v6 }
 0x18a   : > { %746 = vmatmul.f32.vlgmr.msrb.gmra.mxu2 %v713_v31  ;;  %v5668_v31 = vperm.slane %v5507_v10, 2  ;;  %v912_v14 = vrot.slane %v910_v3, 4  ;;  %v915_v15 = vrot.slane %v913_v4, 5  ;;  %2315 = vmatpush.bf16.msrb.mxu3 %v4845_v12 }
 0x18c   : > { %2284 = vmatpush.bf16.msra.mxu2 %v4839_v53  ;;  %2259 = vmatpush.bf16.msrb.mxu0 %v4827_v43 }
 0x190   : > { %2368 = vmatpush.bf16.msra.mxu0 %v4866_v20 }
 0x20d   : > { %v747_v35 = vpop.f32.mrf.mxu2 }
 0x20e   : > { %782 = vmatmul.f32.vlgmr.msra.gmra.mxu3 %v747_v35  ;;  %v4855_v35 = vld [vmem:[#allocation8 + $0xe0] sm:$0xff] }
 0x20f   : > { %2342 = vmatpush.bf16.msrb.mxu1 %v4855_v35  ;;  %v5744_v35 = vor.u32 %v915_v15, %v912_v14  ;;  %v7168_v14 = vshll.u32 %v5746_v36, 16 }
 0x213   : > { %2343 = vmatpush.bf16.msrb.mxu1 %v4854_v59 }
 0x217   : > { %2344 = vmatpush.bf16.msrb.mxu1 %v4853_v13 }
 0x21b   : > { %2345 = vmatpush.bf16.msrb.mxu1 %v4852_v33  ;;  %v893_v33 = vunpack.c.l.b16 %v885_v28 }
 0x21f   : > { %2346 = vmatpush.bf16.msrb.mxu1 %v4851_v19 }
 0x291   : > { %v783_v61 = vpop.f32.mrf.mxu3 }
 0x292   : > { %v786_v0 = vmul.f32 0.0009765625, %v783_v61  ;;  %v986_v61 = vunpack.c.l.b16 %v978_v44  ;;  %v5754_v44 = vunpack.c.l.b16 %v7176_v6 }
 0x294   : > { %v787_v11 = vmul.f32 %v786_v0, %v786_v0  ;;  %v5650_v24 = vperm.slane %v786_v0, 0  ;;  %v5739_v26 = vpack.c.b16 %v987_v62, %v986_v61 }
 0x296   : > { %v789_v21 = vrot.slane %v787_v11, 7  ;;  %v794_v51 = vsub.f32 %v5525_v27, %v5650_v24  ;;  %v795_v5 = vsub.f32 %v5535_v34, %v5650_v24  ;;  %v796_v7 = vsub.f32 %v5543_v40, %v5650_v24  ;;  %v4838_v11 = vld [vmem:[#allocation8 + $0x58] sm:$0xff] }
 0x297   : > { %v797_v8 = vsub.f32 %v5560_v52, %v5650_v24  ;;  %v798_v9 = vsub.f32 %v5531_v32, %v5650_v24  ;;  %v799_v17 = vsub.f32 %v5539_v38, %v5650_v24  ;;  %v800_v18 = vsub.f32 %v5555_v48, %v5650_v24  ;;  %2285 = vmatpush.bf16.msra.mxu2 %v4838_v11 }
 0x298   : > { %v791_v30 = vsub.f32 %v786_v0, %v789_v21  ;;  %v904_v0 = vrot.slane %v902_v49, 4  ;;  %v5733_v21 = vpack.c.b16 %v985_v60, %v984_v56  ;;  %v801_v22 = vsub.f32 %v5573_v1, %v5650_v24  ;;  %v4836_v60 = vld [vmem:[#allocation8 + $0x48] sm:$0xff] }
 0x299   : > { %v7189_v45 = vshrl.u32 %v5739_v26, 16  ;;  %v7167_v11 = vshrl.u32 %v5746_v36, 16  ;;  %v7322_v27 = vmov 0 }
 0x29a   : > { %v792_v46 = vmax.f32 %v791_v30, 0.0  ;;  %v5737_v25 = vor.u32 %v907_v2, %v904_v0  ;;  %v4844_v30 = vld [vmem:[#allocation8 + $0x88] sm:$0xff]  ;;  %v7190_v41 = vshrl.u32 %v5733_v21, 16  ;;  %v7188_v42 = vshll.u32 %v5733_v21, 16 }
 0x29b   : > { %2286 = vmatpush.bf16.msra.mxu2 %v4837_v23  ;;  %v1008_v61 = vrot.slane %v7189_v45, 3  ;;  %2316 = vmatpush.bf16.msrb.mxu3 %v4844_v30  ;;  %v5788_v0 = vrot.slane %v7176_v6, 4  ;;  %v1017_v23 = vrot.slane %v7167_v11, 3  ;;  %v892_v30 = vunpack.c.l.b16 %v884_v58 }
 0x29c   : > { %v5708_v57 = vadd.f32 1e-05, %v792_v46  ;;  %v7169_v46 = vshll.u32 %v5739_v26, 16  ;;  %v1000_v55 = vrot.slane %v7190_v41, 3  ;;  %v1003_v56 = vrot.slane %v7188_v42, 4 }
 0x29d   : > { %v917_v63 = vsel %vm7175_vm9, %v5737_v25, %v5744_v35  ;;  %7298 = vst [vmem:[#allocation19_spill] sm:$0xff] %v5788_v0  ;;  %v5799_v15 = vor.u32 %v1429_v54, %v5788_v0  ;;  %v1065_v58 = vrot.slane %v905_v50, 1 }
 0x29e   : > { %5078 = vrsqrt.f32 %v5708_v57  ;;  %vm809_vm13 = vweird.f32 %v5708_v57  ;;  %v1011_v62 = vrot.slane %v7169_v46, 4  ;;  %v5790_v2 = vor.u32 %v1003_v56, %v1000_v55  ;;  %v4835_v56 = vld [vmem:[#allocation8 + $0x40] sm:$0xff] }
 0x29f   : > { %7299 = vst [vmem:[#allocation20_spill] sm:$0xff] %v5799_v15  ;;  %2287 = vmatpush.bf16.msra.mxu2 %v4836_v60  ;;  %v936_v43 = vunpack.c.l.b16 %v917_v63  ;;  %v937_v54 = vunpack.c.h.b16 %v917_v63  ;;  %2317 = vmatpush.bf16.msrb.mxu3 %v4843_v16  ;;  %v1066_v63 = vor.u32 %v1065_v58, %v902_v49 }
 0x2a0   : > { %v1012_v13 = vor.u32 %v1011_v62, %v1008_v61  ;;  %v1020_v61 = vrot.slane %v7168_v14, 4  ;;  %v5808_v62 = vpack.c.b16 %v893_v33, %v892_v30 }
 0x2a1   : > { %vm5834_vm2 = vcmp.ne.s32.totalorder %v936_v43, %v5754_v44  ;;  %vm5839_vm3 = vcmp.ne.s32.totalorder %v937_v54, %v5795_v29 }
 0x2a2   : > { %v5812_v60 = vor.u32 %v1020_v61, %v1017_v23  ;;  %v922_v46 = vshll.u32 %v5808_v62, 16  ;;  %v919_v20 = vshrl.u32 %v5808_v62, 16 }
 0x2a3   : > { %2288 = vmatpush.bf16.msra.mxu2 %v4835_v56 }
 0x2a4   : > { %v5758_v53 = vpop.eup %5078  ;;  %v1022_v50 = vsel %vm7182_vm12, %v1012_v13, %v5812_v60  ;;  %v5830_v49 = vrot.slane %v922_v46, 1 }
 0x2a5   : > { %v804_v59 = vmul.f32 %v5758_v53, %v5708_v57  ;;  %vm810_vm14 = vweird.f32 %v5758_v53  ;;  %v1040_v23 = vunpack.c.h.b16 %v1022_v50 }
 0x2a6   : > { %vm811_vm0 = vmor %vm809_vm13, %vm810_vm14  ;;  %vm7174_vm14 = vcmask 1046528  }
 0x2a7   : > { %v805_v12 = vmul.f32 %v5758_v53, %v804_v59  ;;  %v1013_v59 = vsel %vm7182_vm12, %v5790_v2, %v1012_v13  ;;  %vm5869_vm8 = vcmp.ne.s32.totalorder %v1040_v23, %v5795_v29 }
 0x2a8   : > { %v1032_v11 = vunpack.c.l.b16 %v1013_v59  ;;  %v1033_v14 = vunpack.c.h.b16 %v1013_v59 }
 0x2a9   : > { %v806_v55 = vmul.f32 0.5, %v805_v12  ;;  %v1067_v12 = vrot.slane %v913_v4, 1  ;;  %v1039_v4 = vunpack.c.l.b16 %v1022_v50 }
 0x2aa   : > { %vm5845_vm4 = vcmp.ne.s32.totalorder %v1032_v11, %v5754_v44  ;;  %vm5855_vm5 = vcmp.ne.s32.totalorder %v1033_v14, %v5795_v29  ;;  %v7313_v14 = vmov 0 }
 0x2ab   : > { %v807_v28 = vsub.f32 1.5, %v806_v55  ;;  %v1069_v19 = vor.u32 %v1067_v12, %v910_v3  ;;  %v1068_v37 = vsel %vm7181_vm15, %v1066_v63, %v1067_v12  ;;  %vm5864_vm6 = vcmp.ne.s32.totalorder %v1039_v4, %v5754_v44  ;;  %vm5943_vm1 = vmpackc.low %vm5855_vm5, %vm5845_vm4 }
 0x2ac   : > { %v1076_v57 = vunpack.c.l.b16 %v1068_v37  ;;  %v1077_v3 = vunpack.c.h.b16 %v1068_v37  ;;  %v924_v12 = vrot.slane %v922_v46, 5  ;;  %v5884_v63 = vadd.s32 48, %v5584_v39  ;;  %v4864_v37 = vld [vmem:[#allocation8 + $0x128] sm:$0xff] }
 0x2ad   : > { %v808_v16 = vmul.f32 %v5758_v53, %v807_v28  ;;  %v1071_v43 = vsel %vm7181_vm15, %v1069_v19, %v5830_v49  ;;  %v7316_v28 = vmov 0  ;;  %vm7173_vm4 = vcmask 1043456  }
 0x2ae   : > { %v1083_v59 = vunpack.c.l.b16 %v1071_v43  ;;  %v1084_v61 = vunpack.c.h.b16 %v1071_v43  ;;  %vm5874_vm7 = vcmp.ne.s32.totalorder %v1076_v57, %v5754_v44  ;;  %vm5879_vm10 = vcmp.ne.s32.totalorder %v1077_v3, %v5795_v29 }
 0x2af   : > { %v812_v30 = vsel %vm811_vm0, %v5758_v53, %v808_v16  ;;  %v5850_v53 = vrot.slane %v7176_v6, 1  ;;  %v7314_v14 = vsel %vm5874_vm7, 4294967295, %v7313_v14  ;;  %v7317_v28 = vsel %vm5879_vm10, 4294967295, %v7316_v28  ;;  %vm5935_vm0 = vmpackc.low %vm5839_vm3, %vm5834_vm2 }
 0x2b0   : > { %v813_v33 = vmul.f32 %v812_v30, %v5507_v10  ;;  %v5861_v10 = vrot.slane %v919_v20, 4  ;;  %7315 = vst [vmem:[#allocation22_spill] sm:$0xff] %v7314_v14  ;;  %v5887_v16 = vadd.s32 56, %v5584_v39  ;;  %vm5902_vm11 = vcmp.ne.s32.totalorder %v1083_v59, %v5754_v44  ;;  %vm5951_vm2 = vmpackc.low %vm5869_vm8, %vm5864_vm6 }
 0x2b1   : > { %7306 = vst [vmem:[#allocation21_spill] sm:$0xff] %v5850_v53  ;;  %v7319_v39 = vmov 0  ;;  %vm5907_vm13 = vcmp.ne.s32.totalorder %v1084_v61, %v5795_v29  ;;  %vm7172_vm3 = vmpackc.low %vm5879_vm10, %vm5874_vm7 }
 0x2b2   : > { %v814_v11 = vperm.slane %v813_v33, 1  ;;  %7318 = vst [vmem:[#allocation23_spill] sm:$0xff] %v7317_v28  ;;  %v7320_v39 = vsel %vm5902_vm11, 4294967295, %v7319_v39  ;;  %v7323_v27 = vsel %vm5907_vm13, 4294967295, %v7322_v27  ;;  %v5964_v54 = vor.u32 %v924_v12, %v5861_v10  ;;  %vm7171_vm5 = vmpackc.low %vm5907_vm13, %vm5902_vm11 }
 0x2b3   : > { %7321 = vst [vmem:[#allocation24_spill] sm:$0xff] %v7320_v39  ;;  %vm7354_vm13 = vsmask.f32 4352 }
 0x2b4   : > { %v815_v50 = vmul.f32 %v814_v11, %v794_v51  ;;  %v816_v19 = vmul.f32 %v814_v11, %v795_v5  ;;  %v817_v4 = vmul.f32 %v814_v11, %v796_v7  ;;  %v818_v46 = vmul.f32 %v814_v11, %v797_v8  ;;  %7324 = vst [vmem:[#allocation25_spill] sm:$0xff] %v7323_v27 }
 0x2b5   : > { %v819_v34 = vmul.f32 %v814_v11, %v798_v9  ;;  %v820_v40 = vmul.f32 %v814_v11, %v799_v17  ;;  %v821_v52 = vmul.f32 %v814_v11, %v800_v18  ;;  %v822_v51 = vmul.f32 %v814_v11, %v801_v22  ;;  %v4865_v9 = vld [vmem:[#allocation8 + $0x130] sm:$0xff] }
 0x2b6   : > { %v824_v5 = vadd.f32 %v5668_v31, %v815_v50  ;;  %v825_v7 = vadd.f32 %v5668_v31, %v816_v19  ;;  %v826_v8 = vadd.f32 %v5668_v31, %v817_v4  ;;  %v827_v32 = vadd.f32 %v5668_v31, %v818_v46  ;;  %2369 = vmatpush.bf16.msra.mxu0 %v4865_v9 }
 0x2b7   : > { %v828_v38 = vadd.f32 %v5668_v31, %v819_v34  ;;  %v829_v17 = vadd.f32 %v5668_v31, %v820_v40  ;;  %v830_v48 = vadd.f32 %v5668_v31, %v821_v52  ;;  %v831_v18 = vadd.f32 %v5668_v31, %v822_v51 }
 0x2b8   : > { %v832_v23 = vmax.f32 %v824_v5, 0.0  ;;  %v833_v1 = vmax.f32 %v825_v7, 0.0  ;;  %v834_v24 = vmax.f32 %v826_v8, 0.0  ;;  %v835_v22 = vmax.f32 %v827_v32, 0.0 }
 0x2b9   : > { %v836_v30 = vmax.f32 %v828_v38, 0.0  ;;  %v837_v57 = vmax.f32 %v829_v17, 0.0  ;;  %v838_v3 = vmax.f32 %v830_v48, 0.0  ;;  %v839_v33 = vmax.f32 %v831_v18, 0.0 }
 0x2ba   : > { %v840_v43 = vpack.c.bf16 %v832_v23, %v832_v23  ;;  %v841_v59 = vpack.c.bf16 %v833_v1, %v833_v1  ;;  %v842_v61 = vpack.c.bf16 %v834_v24, %v834_v24  ;;  %v843_v11 = vpack.c.bf16 %v835_v22, %v835_v22  ;;  %2370 = vmatpush.bf16.msra.mxu0 %v4864_v37 }
 0x2bb   : > { %v844_v50 = vpack.c.bf16 %v836_v30, %v836_v30  ;;  %v845_v19 = vpack.c.bf16 %v837_v57, %v837_v57  ;;  %v846_v4 = vpack.c.bf16 %v838_v3, %v838_v3  ;;  %v847_v46 = vpack.c.bf16 %v839_v33, %v839_v33 }
 0x2bc   : > { %v856_v40 = vunpack.c.l.b16 %v840_v43  ;;  %v857_v13 = vunpack.c.l.b16 %v841_v59  ;;  %v858_v52 = vunpack.c.l.b16 %v842_v61  ;;  %v859_v47 = vunpack.c.l.b16 %v843_v11 }
 0x2bd   : > { %v860_v55 = vunpack.c.l.b16 %v844_v50  ;;  %v861_v5 = vunpack.c.l.b16 %v845_v19  ;;  %v862_v56 = vunpack.c.l.b16 %v846_v4  ;;  %v863_v7 = vunpack.c.l.b16 %v847_v46 }
 0x2be   : > { %v5959_v8 = vpack.c.b16 %v859_v47, %v858_v52  ;;  %v5961_v32 = vpack.c.b16 %v857_v13, %v856_v40  ;;  %v612_v38 = vand.u32 7, %v5884_v63  ;;  %v619_v17 = vand.u32 7, %v5887_v16 }
 0x2bf   : > { %v5966_v58 = vpack.c.b16 %v861_v5, %v860_v55  ;;  %v5968_v9 = vpack.c.b16 %v863_v7, %v862_v56 }
 0x2c0   : > { %v964_v48 = vsel %vm5935_vm0, %v5961_v32, 0  ;;  %v1060_v10 = vsel %vm5943_vm1, %v5961_v32, 0  ;;  %v1061_v12 = vsel %vm5951_vm2, %v5959_v8, 0  ;;  %v1104_v18 = vsel %vm7172_vm3, %v5961_v32, 0 }
 0x2c1   : > { %v1433_v23 = vshrl.u32 %v964_v48, 16  ;;  %v1436_v1 = vshll.u32 %v964_v48, 16  ;;  %v1220_v24 = vrot.slane %v1060_v10, 1  ;;  %v5991_v22 = vrot.slane %v1061_v12, 1 }
 0x2c2   : > { %v5999_v37 = vsel %vm7171_vm5, %v5959_v8, 0  ;;  %v1234_v30 = vrot.slane %v1104_v18, 4  ;;  %v7192_v57 = vshll.u32 %v5961_v32, 16  ;;  %v7193_v3 = vshrl.u32 %v5961_v32, 16 }
 0x2c3   : > { %v1435_v33 = vrot.slane %v1433_v23, 3  ;;  %v1438_v43 = vrot.slane %v1436_v1, 4  ;;  %v1221_v59 = vsel %vm7174_vm14, %v5850_v53, %v1220_v24  ;;  %v1223_v61 = vsel %vm7174_vm14, %v1220_v24, %v5991_v22 }
 0x2c4   : > { %v1459_v11 = vshrl.u32 %v1221_v59, 16  ;;  %v1462_v50 = vshll.u32 %v1221_v59, 16  ;;  %v1467_v19 = vshrl.u32 %v1223_v61, 16  ;;  %v1470_v4 = vshll.u32 %v1223_v61, 16 }
 0x2c5   : > { %v6007_v46 = vor.u32 %v1438_v43, %v1435_v33  ;;  %v1235_v40 = vsel %vm7173_vm4, %v5788_v0, %v1234_v30  ;;  %v1236_v13 = vrot.slane %v5999_v37, 4  ;;  %v1184_v52 = vrot.slane %v7192_v57, 1 }
 0x2c6   : > { %v1461_v47 = vrot.slane %v1459_v11, 3  ;;  %v1464_v55 = vrot.slane %v1462_v50, 4  ;;  %v1469_v5 = vrot.slane %v1467_v19, 3  ;;  %v1472_v56 = vrot.slane %v1470_v4, 4 }
 0x2c7   : > { %v1440_v7 = vsel %vm7182_vm12, %v5799_v15, %v6007_v46  ;;  %v1237_v48 = vsel %vm7173_vm4, %v1234_v30, %v1236_v13  ;;  %v1476_v10 = vshrl.u32 %v1235_v40, 16  ;;  %v1479_v12 = vshll.u32 %v1235_v40, 16 }
 0x2c8   : > { %2260 = vmatmul.bf16.vlgmr.msrb.gmra.mxu0 %v1440_v7  ;;  %v1465_v18 = vor.u32 %v1464_v55, %v1461_v47  ;;  %v6020_v23 = vor.u32 %v1472_v56, %v1469_v5  ;;  %v1484_v1 = vshrl.u32 %v1237_v48, 16  ;;  %v1487_v24 = vshll.u32 %v1237_v48, 16 }
 0x2c9   : > { %v1478_v33 = vrot.slane %v1476_v10, 3  ;;  %v1481_v43 = vrot.slane %v1479_v12, 4  ;;  %v1185_v59 = vsel %vm7181_vm15, %v5850_v53, %v1184_v52  ;;  %v1188_v61 = vor.u32 %v7193_v3, %v1184_v52 }
 0x2ca   : > { %v1474_v11 = vsel %vm7182_vm12, %v1465_v18, %v6020_v23  ;;  %v1486_v30 = vrot.slane %v1484_v1, 3  ;;  %v1489_v50 = vrot.slane %v1487_v24, 4  ;;  %v7191_v19 = vshll.u32 %v5959_v8, 16  ;;  %v4863_v1 = vld [vmem:[#allocation8 + $0x120] sm:$0xff] }
 0x2cb   : > { %2318 = vmatmul.bf16.vlgmr.msrb.gmra.mxu3 %v1474_v11  ;;  %v1482_v4 = vor.u32 %v1481_v43, %v1478_v33  ;;  %v1442_v40 = vshrl.u32 %v1185_v59, 16  ;;  %v1445_v47 = vshll.u32 %v1185_v59, 16  ;;  %v926_v55 = vsel %vm7175_vm9, %v5744_v35, %v5964_v54  ;;  %2371 = vmatpush.bf16.msra.mxu0 %v4863_v1 }
 0x2cc   : > { %v6032_v5 = vor.u32 %v1489_v50, %v1486_v30  ;;  %v1192_v52 = vrot.slane %v7191_v19, 1  ;;  %v943_v56 = vunpack.c.l.b16 %v926_v55  ;;  %v944_v7 = vunpack.c.h.b16 %v926_v55 }
 0x2cd   : > { %v1444_v48 = vrot.slane %v1442_v40, 3  ;;  %v1447_v10 = vrot.slane %v1445_v47, 4  ;;  %vm676_vm6 = vcmp.le.s32.totalorder %v612_v38, 6  ;;  %vm6040_vm8 = vcmp.le.s32.totalorder %v619_v17, 6 }
 0x2ce   : > { %v1491_v35 = vsel %vm7182_vm12, %v1482_v4, %v6032_v5  ;;  %v1193_v18 = vsel %vm7181_vm15, %v1188_v61, %v1192_v52  ;;  %vm947_vm5 = vcmp.ne.s32.totalorder %v943_v56, %v5754_v44  ;;  %vm948_vm3 = vcmp.ne.s32.totalorder %v944_v7, %v5795_v29  ;;  %vm974_vm4 = vmpackc.low %vm676_vm6, %vm676_vm6  ;;  %v4862_v4 = vld [vmem:[#allocation8 + $0x118] sm:$0xff] }
 0x2cf   : > { %2347 = vmatmul.bf16.vlgmr.msrb.gmra.mxu1 %v1491_v35  ;;  %v1448_v24 = vor.u32 %v1447_v10, %v1444_v48  ;;  %v1450_v33 = vshrl.u32 %v1193_v18, 16  ;;  %v1453_v43 = vshll.u32 %v1193_v18, 16  ;;  %vm6049_vm14 = vmpackc.low %vm948_vm3, %vm947_vm5  ;;  %v7333_v59 = vmov 0  ;;  %2372 = vmatpush.bf16.msra.mxu0 %v4862_v4 }
 0x2d0   : > { %v7334_v59 = vsel %vm6049_vm14, 4294967295, %v7333_v59  ;;  %v982_v11 = vsel %vm974_vm4, 65537, %v7176_v6  ;;  %v965_v61 = vsel %vm6049_vm14, %v5959_v8, 0  ;;  %vm975_vm9 = vmpackc.low %vm6040_vm8, %vm6040_vm8  ;;  %vm668_vm6 = vcmp.ge.s32.totalorder %v612_v38, 1 }
 0x2d1   : > { %7335 = vst [vmem:[#allocation26_spill] sm:$0xff] %v7334_v59  ;;  %v990_v30 = vunpack.c.l.b16 %v982_v11  ;;  %vm6064_vm3 = vcmp.ge.s32.totalorder %v619_v17, 1  ;;  %v1452_v40 = vrot.slane %v1450_v33, 3  ;;  %v1455_v47 = vrot.slane %v1453_v43, 4  ;;  %vm878_vm4 = vmpackc.low %vm668_vm6, %vm668_vm6 }
 0x2d2   : > { %v1570_v55 = vshrl.u32 %v965_v61, 16  ;;  %v1573_v56 = vshll.u32 %v965_v61, 16  ;;  %v983_v7 = vsel %vm975_vm9, 65537, %v7176_v6  ;;  %vm879_vm5 = vmpackc.low %vm6064_vm3, %vm6064_vm3  ;;  %v886_v63 = vsel %vm878_vm4, 65537, %v7176_v6 }
 0x2d3   : > { %v7194_v16 = vshrl.u32 %v5959_v8, 16  ;;  %v7180_v38 = vshll.u32 %v5966_v58, 16  ;;  %v6075_v17 = vor.u32 %v1455_v47, %v1452_v40  ;;  %v991_v12 = vunpack.c.l.b16 %v983_v7 }
 0x2d4   : > { %v1572_v48 = vrot.slane %v1570_v55, 3  ;;  %v1575_v10 = vrot.slane %v1573_v56, 4  ;;  %v887_v35 = vsel %vm879_vm5, 65537, %v7176_v6  ;;  %v894_v18 = vunpack.c.l.b16 %v886_v63 }
 0x2d5   : > { %v1196_v1 = vor.u32 %v7194_v16, %v1192_v52  ;;  %v1200_v33 = vrot.slane %v7180_v38, 1  ;;  %v1457_v43 = vsel %vm7182_vm12, %v1448_v24, %v6075_v17  ;;  %v6086_v61 = vpack.c.b16 %v991_v12, %v990_v30  ;;  %v4879_v16 = vld [vmem:[#allocation8 + $0x1a0] sm:$0xff] }
 0x2d6   : > { %v6084_v11 = vor.u32 %v1575_v10, %v1572_v48  ;;  %v895_v50 = vunpack.c.l.b16 %v887_v35  ;;  %2289 = vmatmul.bf16.vlgmr.msra.gmra.mxu2 %v1457_v43  ;;  %v7187_v47 = vshrl.u32 %v5966_v58, 16  ;;  %v7178_v55 = vshll.u32 %v5968_v9, 16 }
 0x2d7   : > { %v1201_v40 = vsel %vm7181_vm15, %v1196_v1, %v1200_v33  ;;  %v7179_v4 = vshrl.u32 %v6086_v61, 16  ;;  %v7177_v24 = vshll.u32 %v6086_v61, 16  ;;  %v1072_v30 = vor.u32 %v5830_v49, %v919_v20 }
 0x2d8   : > { %v1577_v52 = vsel %vm7182_vm12, %v6007_v46, %v6084_v11  ;;  %v899_v56 = vpack.c.b16 %v895_v50, %v894_v18  ;;  %v1544_v7 = vshrl.u32 %v1201_v40, 16  ;;  %v1547_v63 = vshll.u32 %v1201_v40, 16 }
 0x2d9   : > { %2265 = vmatmul.bf16.gmra.mxu0 %v1577_v52  ;;  %v1204_v48 = vor.u32 %v7187_v47, %v1200_v33  ;;  %v1026_v10 = vrot.slane %v7179_v4, 3  ;;  %v1029_v46 = vrot.slane %v7177_v24, 4  ;;  %v6107_v62 = vrot.slane %v7178_v55, 1  ;;  %v4874_v4 = vld [vmem:[#allocation8 + $0x178] sm:$0xff]  ;;  %v4872_v47 = vld [vmem:[#allocation8 + $0x168] sm:$0xff] }
 0x2da   : > { %v931_v12 = vshll.u32 %v899_v56, 16  ;;  %v928_v35 = vshrl.u32 %v899_v56, 16  ;;  %v1546_v1 = vrot.slane %v1544_v7, 3  ;;  %v1549_v18 = vrot.slane %v1547_v63, 4  ;;  %2397 = vmatpush.bf16.msrb.mxu2 %v4874_v4 }
 0x2db   : > { %v1030_v20 = vor.u32 %v1029_v46, %v1026_v10  ;;  %v6111_v33 = vsel %vm7181_vm15, %v1204_v48, %v6107_v62  ;;  %v4882_v10 = vld [vmem:[#allocation8 + $0x1b8] sm:$0xff]  ;;  %vm7338_vm9 = vsmask.f32 3328 }
 0x2dc   : > { %v1073_v49 = vrot.slane %v931_v12, 1  ;;  %v930_v43 = vrot.slane %v928_v35, 4  ;;  %v933_v50 = vrot.slane %v931_v12, 5  ;;  %v4890_v46 = vld [vmem:[#allocation8 + $0x1f8] sm:$0xff]  ;;  %v6118_v12 = vor.u32 %v1549_v18, %v1546_v1  ;;  %2426 = vmatpush.bf16.msra.mxu3 %v4882_v10 }
 0x2dd   : > { %v1031_v40 = vsel %vm7182_vm12, %v5812_v60, %v1030_v20  ;;  %v1053_v7 = vunpack.c.l.b16 %v1030_v20  ;;  %v1054_v38 = vunpack.c.h.b16 %v1030_v20  ;;  %v7339_v60 = vmov 0  ;;  %2455 = vmatpush.bf16.msra.mxu1 %v4890_v46 }
 0x2de   : > { %v1074_v52 = vsel %vm7181_vm15, %v1072_v30, %v1073_v49  ;;  %v6116_v56 = vor.u32 %v933_v50, %v930_v43  ;;  %v1046_v63 = vunpack.c.l.b16 %v1031_v40  ;;  %v1047_v6 = vunpack.c.h.b16 %v1031_v40  ;;  %v4861_v30 = vld [vmem:[#allocation8 + $0x110] sm:$0xff] }
 0x2df   : > { %v1090_v24 = vunpack.c.l.b16 %v1074_v52  ;;  %v1091_v55 = vunpack.c.h.b16 %v1074_v52  ;;  %vm6124_vm8 = vcmp.ne.s32.totalorder %v1053_v7, %v5754_v44  ;;  %v7342_v43 = vmov 0  ;;  %v4873_v40 = vld [vmem:[#allocation8 + $0x170] sm:$0xff]  ;;  %2373 = vmatpush.bf16.msra.mxu0 %v4861_v30  ;;  %v4860_v7 = vld [vmem:[#allocation8 + $0x108] sm:$0xff] }
 0x2e0   : > { %v935_v48 = vsel %vm7338_vm9, %v5964_v54, %v6116_v56  ;;  %v7340_v60 = vsel %vm6124_vm8, 4294967295, %v7339_v60  ;;  %vm1050_vm6 = vcmp.ne.s32.totalorder %v1046_v63, %v5754_v44  ;;  %vm1051_vm3 = vcmp.ne.s32.totalorder %v1047_v6, %v5795_v29  ;;  %v4881_v54 = vld [vmem:[#allocation8 + $0x1b0] sm:$0xff]  ;;  %2398 = vmatpush.bf16.msrb.mxu2 %v4873_v40 }
 0x2e1   : > { %7341 = vst [vmem:[#allocation27_spill] sm:$0xff] %v7340_v60  ;;  %vm6131_vm4 = vcmp.ne.s32.totalorder %v1090_v24, %v5754_v44  ;;  %vm6136_vm5 = vcmp.ne.s32.totalorder %v1091_v55, %v5795_v29  ;;  %v7345_v1 = vmov 0  ;;  %vm6140_vm9 = vmpackc.low %vm1051_vm3, %vm1050_vm6  ;;  %v7348_v18 = vmov 0  ;;  %v4889_v55 = vld [vmem:[#allocation8 + $0x1f0] sm:$0xff]  ;;  %2427 = vmatpush.bf16.msra.mxu3 %v4881_v54 }
 0x2e2   : > { %v7343_v43 = vsel %vm6131_vm4, 4294967295, %v7342_v43  ;;  %v7346_v1 = vsel %vm6136_vm5, 4294967295, %v7345_v1  ;;  %v7349_v18 = vsel %vm6140_vm9, 4294967295, %v7348_v18  ;;  %v950_v20 = vunpack.c.l.b16 %v935_v48  ;;  %vm7186_vm6 = vmpackc.low %vm6136_vm5, %vm6131_vm4  ;;  %2456 = vmatpush.bf16.msra.mxu1 %v4889_v55 }
 0x2e3   : > { %7344 = vst [vmem:[#allocation28_spill] sm:$0xff] %v7343_v43  ;;  %v951_v50 = vunpack.c.h.b16 %v935_v48  ;;  %vm6145_vm15 = vcmp.ne.s32.totalorder %v1054_v38, %v5795_v29  ;;  %v7351_v6 = vmov 0  ;;  %v1075_v24 = vor.u32 %v1073_v49, %v928_v35  ;;  %v4880_v48 = vld [vmem:[#allocation8 + $0x1a8] sm:$0xff]  ;;  %2374 = vmatpush.bf16.msra.mxu0 %v4860_v7  ;;  %v4887_v7 = vld [vmem:[#allocation8 + $0x1e0] sm:$0xff] }
 0x2e4   : > { %7347 = vst [vmem:[#allocation29_spill] sm:$0xff] %v7346_v1  ;;  %v7352_v6 = vsel %vm6145_vm15, 4294967295, %v7351_v6  ;;  %v1062_v52 = vsel %vm6140_vm9, %v5966_v58, 0  ;;  %v6162_v4 = vsel %vm7186_vm6, %v5966_v58, 0  ;;  %vm954_vm3 = vcmp.ne.s32.totalorder %v950_v20, %v5754_v44  ;;  %vm7198_vm11 = vmpackc.low %vm6145_vm15, %vm6124_vm8  ;;  %2399 = vmatpush.bf16.msrb.mxu2 %v4872_v47 }
 0x2e5   : > { %7350 = vst [vmem:[#allocation30_spill] sm:$0xff] %v7349_v18  ;;  %v1224_v38 = vrot.slane %v1062_v52, 1  ;;  %vm955_vm12 = vcmp.ne.s32.totalorder %v951_v50, %v5795_v29  ;;  %v7197_v35 = vrot.slane %v6162_v4, 4  ;;  %v6174_v49 = vsel %vm7354_vm13, %v6075_v17, %v6118_v12  ;;  %v4888_v52 = vld [vmem:[#allocation8 + $0x1e8] sm:$0xff]  ;;  %2428 = vmatpush.bf16.msra.mxu3 %v4880_v48  ;;  %v4878_v48 = vld [vmem:[#allocation8 + $0x198] sm:$0xff] }
 0x2e6   : > { %7353 = vst [vmem:[#allocation31_spill] sm:$0xff] %v7352_v6  ;;  %vm6176_vm7 = vmpackc.low %vm955_vm12, %vm954_vm3  ;;  %v7355_v63 = vmov 0  ;;  %v1063_v10 = vsel %vm7198_vm11, %v5968_v9, 0  ;;  %v1624_v46 = vshrl.u32 %v6111_v33, 16  ;;  %vm7358_vm6 = vcmask 1046528   ;;  %2294 = vmatmul.bf16.gmra.mxu2 %v6174_v49  ;;  %2457 = vmatpush.bf16.msra.mxu1 %v4888_v52  ;;  %v4859_v52 = vld [vmem:[#allocation8 + $0x100] sm:$0xff] }
 0x2e7   : > { %v7356_v63 = vsel %vm6176_vm7, 4294967295, %v7355_v63  ;;  %v1225_v30 = vsel %vm7358_vm6, %v5991_v22, %v1224_v38  ;;  %v966_v17 = vsel %vm6176_vm7, %v5966_v58, 0  ;;  %v1097_v20 = vunpack.c.l.b16 %v1075_v24  ;;  %2375 = vmatpush.bf16.msra.mxu0 %v4859_v52 }
 0x2e8   : > { %7357 = vst [vmem:[#allocation32_spill] sm:$0xff] %v7356_v63  ;;  %v1098_v50 = vunpack.c.h.b16 %v1075_v24  ;;  %v1579_v42 = vshrl.u32 %v1225_v30, 16  ;;  %v1582_v45 = vshll.u32 %v1225_v30, 16  ;;  %vm7359_vm12 = vcmask 1043456  }
 0x2e9   : > { %v1239_v54 = vsel %vm7359_vm12, %v1236_v13, %v7197_v35  ;;  %v1642_v22 = vshrl.u32 %v966_v17, 16  ;;  %v1645_v57 = vshll.u32 %v966_v17, 16  ;;  %v6198_v24 = vrot.slane %v1063_v10, 1  ;;  %2429 = vmatpush.bf16.msra.mxu3 %v4879_v16  ;;  %v4871_v16 = vld [vmem:[#allocation8 + $0x160] sm:$0xff]  ;;  %v4886_v17 = vld [vmem:[#allocation8 + $0x1d8] sm:$0xff] }
 0x2ea   : > { %v1588_v41 = vshrl.u32 %v1239_v54, 16  ;;  %v1591_v19 = vshll.u32 %v1239_v54, 16  ;;  %v1581_v55 = vrot.slane %v1579_v42, 3  ;;  %v1584_v40 = vrot.slane %v1582_v45, 4  ;;  %2458 = vmatpush.bf16.msra.mxu1 %v4887_v7  ;;  %2400 = vmatpush.bf16.msrb.mxu2 %v4871_v16  ;;  %v4898_v16 = vld [vmem:[#allocation8 + $0x238] sm:$0xff] }
 0x2eb   : > { %v1644_v3 = vrot.slane %v1642_v22, 3  ;;  %v957_v30 = vunpack.c.l.b16 %v6116_v56  ;;  %v1647_v6 = vrot.slane %v1645_v57, 4  ;;  %v1627_v13 = vshll.u32 %v6111_v33, 16  ;;  %2484 = vmatpush.bf16.msrb.mxu0 %v4898_v16  ;;  %v4875_v16 = vld [vmem:[#allocation8 + $0x180] sm:$0xff] }
 0x2ec   : > { %v1590_v60 = vrot.slane %v1588_v41, 3  ;;  %v1593_v37 = vrot.slane %v1591_v19, 4  ;;  %v6202_v35 = vor.u32 %v1584_v40, %v1581_v55  ;;  %vm6205_vm13 = vcmp.ne.s32.totalorder %v1097_v20, %v5754_v44  ;;  %v4877_v40 = vld [vmem:[#allocation8 + $0x190] sm:$0xff] }
 0x2ed   : > { %v7360_v10 = vmov 0  ;;  %vm6210_vm6 = vcmp.ne.s32.totalorder %v1098_v50, %v5795_v29  ;;  %v7363_v42 = vmov 0  ;;  %v6216_v45 = vor.u32 %v1647_v6, %v1644_v3  ;;  %2430 = vmatpush.bf16.msra.mxu3 %v4878_v48  ;;  %v4869_v48 = vld [vmem:[#allocation8 + $0x150] sm:$0xff] }
 0x2ee   : > { %v7361_v10 = vsel %vm6205_vm13, 4294967295, %v7360_v10  ;;  %v7364_v42 = vsel %vm6210_vm6, 4294967295, %v7363_v42  ;;  %v6214_v41 = vor.u32 %v1593_v37, %v1590_v60  ;;  %vm7366_vm3 = vcmask 1046528   ;;  %vm7200_vm12 = vmpackc.low %vm6210_vm6, %vm6205_vm13  ;;  %2459 = vmatpush.bf16.msra.mxu1 %v4886_v17  ;;  %v4876_v17 = vld [vmem:[#allocation8 + $0x188] sm:$0xff] }
 0x2ef   : > { %7362 = vst [vmem:[#allocation33_spill] sm:$0xff] %v7361_v10  ;;  %v1227_v57 = vsel %vm7366_vm3, %v1224_v38, %v6198_v24  ;;  %v1626_v19 = vrot.slane %v1624_v46, 3  ;;  %vm7367_vm11 = vsmask.f32 4352  ;;  %v1107_v3 = vsel %vm7200_vm12, %v5968_v9, 0 }
 0x2f0   : > { %7365 = vst [vmem:[#allocation34_spill] sm:$0xff] %v7364_v42  ;;  %v1586_v47 = vsel %vm7367_vm11, %v6020_v23, %v6202_v35  ;;  %v958_v33 = vunpack.c.h.b16 %v6116_v56  ;;  %vm6235_vm3 = vcmp.ne.s32.totalorder %v957_v30, %v5754_v44  ;;  %v7368_v60 = vmov 0  ;;  %vm7371_vm8 = vmmov %vm7367_vm11 }
 0x2f1   : > { %v7369_v60 = vsel %vm6235_vm3, 4294967295, %v7368_v60  ;;  %2323 = vmatmul.bf16.gmra.mxu3 %v1586_v47  ;;  %v1595_v23 = vsel %vm7371_vm8, %v6032_v5, %v6214_v41  ;;  %vm7372_vm11 = vmmov %vm7371_vm8  ;;  %v6245_v38 = vrot.slane %v1107_v3, 4  ;;  %v1629_v46 = vrot.slane %v1627_v13, 4 }
 0x2f2   : > { %7370 = vst [vmem:[#allocation35_spill] sm:$0xff] %v7369_v60  ;;  %v1649_v6 = vsel %vm7372_vm11, %v6084_v11, %v6216_v45  ;;  %2352 = vmatmul.bf16.gmra.mxu1 %v1595_v23  ;;  %vm6248_vm12 = vcmp.ne.s32.totalorder %v958_v33, %v5795_v29  ;;  %v7373_v56 = vmov 0  ;;  %v1651_v20 = vshrl.u32 %v1227_v57, 16  ;;  %2431 = vmatpush.bf16.msra.mxu3 %v4877_v40 }
 0x2f3   : > { %2270 = vmatmul.bf16.gmra.mxu0 %v1649_v6  ;;  %v7374_v56 = vsel %vm6248_vm12, 4294967295, %v7373_v56  ;;  %v1654_v5 = vshll.u32 %v1227_v57, 16  ;;  %v7376_v50 = vrot.slane %v6162_v4, 4  ;;  %vm7377_vm8 = vcmask 1043456   ;;  %vm7202_vm11 = vmpackc.low %vm6248_vm12, %vm6235_vm3  ;;  %v4870_v4 = vld [vmem:[#allocation8 + $0x158] sm:$0xff]  ;;  %v4885_v57 = vld [vmem:[#allocation8 + $0x1d0] sm:$0xff] }
 0x2f4   : > { %7375 = vst [vmem:[#allocation36_spill] sm:$0xff] %v7374_v56  ;;  %v967_v55 = vsel %vm7202_vm11, %v5968_v9, 0  ;;  %v6266_v30 = vor.u32 %v1629_v46, %v1626_v19  ;;  %v7201_v7 = vshrl.u32 %v5968_v9, 16  ;;  %v7378_v47 = vshrl.u32 %v5959_v8, 16  ;;  %2401 = vmatpush.bf16.msrb.mxu2 %v4870_v4  ;;  %2460 = vmatpush.bf16.msra.mxu1 %v4885_v57 }
 0x2f5   : > { %v1241_v11 = vsel %vm7377_vm8, %v7376_v50, %v6245_v38  ;;  %v1714_v37 = vshrl.u32 %v967_v55, 16  ;;  %v1717_v13 = vshll.u32 %v967_v55, 16  ;;  %v1653_v33 = vrot.slane %v1651_v20, 3 }
 0x2f6   : > { %v1660_v54 = vshrl.u32 %v1241_v11, 16  ;;  %v1663_v22 = vshll.u32 %v1241_v11, 16  ;;  %v1245_v3 = vrot.slane %v7378_v47, 4  ;;  %v1656_v23 = vrot.slane %v1654_v5, 4  ;;  %2432 = vmatpush.bf16.msra.mxu3 %v4876_v17 }
 0x2f7   : > { %v6274_v6 = vor.u32 %v7201_v7, %v6107_v62  ;;  %v7379_v50 = vshrl.u32 %v5961_v32, 16  ;;  %v7380_v52 = vshll.u32 %v5961_v32, 16  ;;  %vm7381_vm8 = vsmask.f32 4352 }
 0x2f8   : > { %v1662_v19 = vrot.slane %v1660_v54, 3  ;;  %v1665_v46 = vrot.slane %v1663_v22, 4  ;;  %v6283_v20 = vsel %vm7381_vm8, %v6118_v12, %v6266_v30  ;;  %v1716_v62 = vrot.slane %v1714_v37, 3  ;;  %v4884_v54 = vld [vmem:[#allocation8 + $0x1c8] sm:$0xff]  ;;  %2402 = vmatpush.bf16.msrb.mxu2 %v4869_v48  ;;  %vm7383_vm11 = vmmov %vm7381_vm8 }
 0x2f9   : > { %v1242_v11 = vrot.slane %v7379_v50, 4  ;;  %v1243_v55 = vrot.slane %v7380_v52, 5  ;;  %v1719_v5 = vrot.slane %v1717_v13, 4  ;;  %v7382_v22 = vshll.u32 %v5959_v8, 16  ;;  %2299 = vmatmul.bf16.gmra.mxu2 %v6283_v20  ;;  %v4868_v13 = vld [vmem:[#allocation8 + $0x148] sm:$0xff]  ;;  %2461 = vmatpush.bf16.msra.mxu1 %v4884_v54  ;;  %vm7385_vm12 = vmmov %vm7381_vm8 }
 0x2fa   : > { %v6288_v40 = vor.u32 %v1656_v23, %v1653_v33  ;;  %v1732_v47 = vshrl.u32 %v6198_v24, 16  ;;  %v1735_v50 = vshll.u32 %v6198_v24, 16  ;;  %v1723_v52 = vshrl.u32 %v6274_v6, 16  ;;  %v4883_v33 = vld [vmem:[#allocation8 + $0x1c0] sm:$0xff]  ;;  %2433 = vmatpush.bf16.msra.mxu3 %v4875_v16  ;;  %vm7405_vm6 = vmmov %vm7381_vm8 }
 0x2fb   : > { %v1246_v4 = vrot.slane %v7382_v22, 5  ;;  %v6293_v12 = vor.u32 %v1665_v46, %v1662_v19  ;;  %v1726_v37 = vshll.u32 %v6274_v6, 16  ;;  %v1244_v57 = vor.u32 %v1243_v55, %v1242_v11 }
 0x2fc   : > { %v1720_v7 = vor.u32 %v1719_v5, %v1716_v62  ;;  %v1741_v23 = vshrl.u32 %v6245_v38, 16  ;;  %v1744_v24 = vshll.u32 %v6245_v38, 16  ;;  %v1658_v19 = vsel %vm7381_vm8, %v6202_v35, %v6288_v40  ;;  %2403 = vmatpush.bf16.msrb.mxu2 %v4868_v13  ;;  %v4867_v38 = vld [vmem:[#allocation8 + $0x140] sm:$0xff] }
 0x2fd   : > { %v6296_v22 = vor.u32 %v1246_v4, %v1245_v3  ;;  %v6303_v46 = vrot.slane %v1732_v47, 3  ;;  %v6305_v48 = vrot.slane %v1735_v50, 4  ;;  %v1667_v3 = vsel %vm7383_vm11, %v6214_v41, %v6293_v12  ;;  %2462 = vmatpush.bf16.msra.mxu1 %v4883_v33 }
 0x2fe   : > { %v1725_v17 = vrot.slane %v1723_v52, 3  ;;  %v1728_v11 = vrot.slane %v1726_v37, 4  ;;  %vm7384_vm3 = vsmask.f32 3328  ;;  %v1721_v35 = vsel %vm7385_vm12, %v6216_v45, %v1720_v7  ;;  %v4897_v37 = vld [vmem:[#allocation8 + $0x230] sm:$0xff] }
 0x2ff   : > { %v1248_v55 = vsel %vm7384_vm3, %v1244_v57, %v6296_v22  ;;  %v1493_v62 = vshrl.u32 %v1244_v57, 16  ;;  %v7386_v5 = vshrl.u32 %v5733_v21, 16  ;;  %v7387_v4 = vshrl.u32 %v5739_v26, 16  ;;  %2485 = vmatpush.bf16.msrb.mxu0 %v4897_v37 }
 0x300   : > { %v6320_v47 = vrot.slane %v1741_v23, 3  ;;  %v6322_v50 = vrot.slane %v1744_v24, 4  ;;  %v1496_v52 = vshll.u32 %v1244_v57, 16  ;;  %vm7205_vm3 = vsmask.f32 256  ;;  %2404 = vmatpush.bf16.msrb.mxu2 %v4867_v38 }
 0x301   : > { %2328 = vmatmul.bf16.gmra.mxu3 %v1658_v19  ;;  %v1109_v54 = vrot.slane %v7386_v5, 7  ;;  %v6318_v41 = vrot.slane %v7387_v4, 7  ;;  %v1501_v13 = vshrl.u32 %v1248_v55, 16  ;;  %v1504_v45 = vshll.u32 %v1248_v55, 16  ;;  %v5082_v5 = vld [vmem:[#allocation7 + $0x78] sm:$0xff]  ;;  %v4896_v55 = vld [vmem:[#allocation8 + $0x228] sm:$0xff] }
 0x302   : > { %2357 = vmatmul.bf16.gmra.mxu1 %v1667_v3  ;;  %v7388_v7 = vshll.u32 %v5733_v21, 16  ;;  %v7389_v33 = vshll.u32 %v5739_v26, 16  ;;  %2568 = vmatpush.msrb.mxu3 %v5082_v5  ;;  %v1729_v3 = vor.u32 %v1728_v11, %v1725_v17  ;;  %v1152_v57 = vunpack.c.l.b16 %v5737_v25 }
 0x303   : > { %2275 = vmatmul.bf16.gmra.mxu0 %v1721_v35  ;;  %v1153_v24 = vunpack.c.h.b16 %v5737_v25  ;;  %v6333_v35 = vrot.slane %v1493_v62, 3  ;;  %v6336_v5 = vrot.slane %v1496_v52, 4  ;;  %v7390_v38 = vshrl.u32 %v5746_v36, 16  ;;  %v5085_v52 = vld [vmem:[#allocation5 + $0x70] sm:$0xff] }
 0x304   : > { %v1110_v16 = vor.u32 %v1109_v54, %v7388_v7  ;;  %v1112_v19 = vor.u32 %v6318_v41, %v7389_v33  ;;  %v5083_v7 = vld [vmem:[#allocation5 + $0x78] sm:$0xff]  ;;  %v5084_v33 = vld [vmem:[#allocation7 + $0x70] sm:$0xff]  ;;  %v1503_v25 = vrot.slane %v1501_v13, 3  ;;  %v1506_v37 = vrot.slane %v1504_v45, 4  ;;  %2486 = vmatpush.bf16.msrb.mxu0 %v4896_v55  ;;  %v5088_v55 = vld [vmem:[#allocation7 + $0x60] sm:$0xff] }
 0x305   : > { %2548 = vmatpush.msra.mxu2 %v5083_v7  ;;  %2569 = vmatpush.msrb.mxu3 %v5084_v33  ;;  %v6340_v23 = vrot.slane %v7390_v38, 7  ;;  %v7391_v62 = vmov 0  ;;  %v7397_v13 = vmov 0  ;;  %v7400_v45 = vmov 0 }
 0x306   : > { %v1113_v21 = vsel %vm7205_vm3, %v1109_v54, %v1112_v19  ;;  %v1120_v26 = vunpack.c.l.b16 %v1110_v16  ;;  %v1121_v4 = vunpack.c.h.b16 %v1110_v16  ;;  %v7394_v54 = vmov 0  ;;  %v5086_v16 = vld [vmem:[#allocation7 + $0x68] sm:$0xff] }
 0x307   : > { %v1127_v17 = vunpack.c.l.b16 %v1113_v21  ;;  %v1128_v11 = vunpack.c.h.b16 %v1113_v21  ;;  %2549 = vmatpush.msra.mxu2 %v5085_v52  ;;  %2570 = vmatpush.msrb.mxu3 %v5086_v16  ;;  %v7403_v19 = vshrl.u32 %v5966_v58, 16  ;;  %v1730_v7 = vsel %vm7405_vm6, %v6266_v30, %v1729_v3 }
 0x308   : > { %vm6343_vm12 = vcmp.ne.s32.totalorder %v1120_v26, %v5754_v44  ;;  %vm6348_vm11 = vcmp.ne.s32.totalorder %v1121_v4, %v5795_v29  ;;  %v7404_v26 = vshll.u32 %v5966_v58, 16  ;;  %vm6373_vm8 = vcmp.ne.s32.totalorder %v1152_v57, %v5754_v44  ;;  %v5087_v57 = vld [vmem:[#allocation5 + $0x68] sm:$0xff] }
 0x309   : > { %v7392_v62 = vsel %vm6343_vm12, 4294967295, %v7391_v62  ;;  %v7395_v54 = vsel %vm6348_vm11, 4294967295, %v7394_v54  ;;  %vm6357_vm3 = vcmp.ne.s32.totalorder %v1127_v17, %v5754_v44  ;;  %vm6362_vm13 = vcmp.ne.s32.totalorder %v1128_v11, %v5795_v29  ;;  %vm7412_vm6 = vmpackc.low %vm6348_vm11, %vm6343_vm12  ;;  %2550 = vmatpush.msra.mxu2 %v5087_v57  ;;  %2571 = vmatpush.msrb.mxu3 %v5088_v55  ;;  %v5090_v57 = vld [vmem:[#allocation7 + $0x58] sm:$0xff] }
 0x30a   : > { %7393 = vst [vmem:[#allocation37_spill] sm:$0xff] %v7392_v62  ;;  %v7398_v13 = vsel %vm6357_vm3, 4294967295, %v7397_v13  ;;  %v7401_v45 = vsel %vm6362_vm13, 4294967295, %v7400_v45  ;;  %v1249_v21 = vrot.slane %v7403_v19, 4  ;;  %v1250_v4 = vrot.slane %v7404_v26, 5  ;;  %vm7212_vm4 = vmpackc.low %vm6362_vm13, %vm6357_vm3  ;;  %2304 = vmatmul.bf16.gmra.mxu2 %v1730_v7  ;;  %v5089_v7 = vld [vmem:[#allocation5 + $0x60] sm:$0xff] }
 0x30b   : > { %7396 = vst [vmem:[#allocation38_spill] sm:$0xff] %v7395_v54  ;;  %v7406_v33 = vmov 0  ;;  %vm6378_vm15 = vcmp.ne.s32.totalorder %v1153_v24, %v5795_v29  ;;  %v7409_v17 = vmov 0  ;;  %v1148_v3 = vsel %vm7412_vm6, %v5961_v32, 0  ;;  %2551 = vmatpush.msra.mxu2 %v5089_v7  ;;  %2572 = vmatpush.msrb.mxu3 %v5090_v57  ;;  %v5093_v57 = vld [vmem:[#allocation5 + $0x50] sm:$0xff] }
 0x30c   : > { %7399 = vst [vmem:[#allocation39_spill] sm:$0xff] %v7398_v13  ;;  %v7407_v33 = vsel %vm6373_vm8, 4294967295, %v7406_v33  ;;  %v7410_v17 = vsel %vm6378_vm15, 4294967295, %v7409_v17  ;;  %v6398_v24 = vsel %vm7212_vm4, %v5959_v8, 0  ;;  %vm7213_vm5 = vcmask 1042432   ;;  %v5100_v13 = vld [vmem:[#allocation5 + $0x30] sm:$0xff] }
 0x30d   : > { %7402 = vst [vmem:[#allocation40_spill] sm:$0xff] %v7401_v45  ;;  %v1262_v11 = vrot.slane %v1148_v3, 5  ;;  %v7413_v38 = vshll.u32 %v5746_v36, 16  ;;  %v1747_v16 = vor.u32 %v6322_v50, %v6320_v47  ;;  %v1499_v19 = vor.u32 %v6336_v5, %v6333_v35  ;;  %v5091_v5 = vld [vmem:[#allocation5 + $0x58] sm:$0xff] }
 0x30e   : > { %7408 = vst [vmem:[#allocation41_spill] sm:$0xff] %v7407_v33  ;;  %v7216_v26 = vrot.slane %v6398_v24, 5  ;;  %v6408_v55 = vor.u32 %v1506_v37, %v1503_v25  ;;  %v6410_v3 = vor.u32 %v1250_v4, %v1249_v21  ;;  %vm7414_vm6 = vsmask.f32 256  ;;  %2552 = vmatpush.msra.mxu2 %v5091_v5  ;;  %v5092_v25 = vld [vmem:[#allocation7 + $0x50] sm:$0xff] }
 0x30f   : > { %7411 = vst [vmem:[#allocation42_spill] sm:$0xff] %v7410_v17  ;;  %v1115_v52 = vor.u32 %v6340_v23, %v7413_v38  ;;  %v1510_v62 = vshrl.u32 %v1262_v11, 16  ;;  %v1513_v50 = vshll.u32 %v1262_v11, 16  ;;  %2573 = vmatpush.msrb.mxu3 %v5092_v25  ;;  %v7415_v37 = vor.u32 %v6305_v48, %v6303_v46  ;;  %v5094_v46 = vld [vmem:[#allocation7 + $0x48] sm:$0xff] }
 0x310   : > { %v1264_v47 = vsel %vm7213_vm5, %v1262_v11, %v7216_v26  ;;  %v1160_v11 = vsel %vm5935_vm0, %v5959_v8, 0  ;;  %v7418_v7 = vmov 0  ;;  %2553 = vmatpush.msra.mxu2 %v5093_v57  ;;  %vm7423_vm12 = vsmask.f32 3328  ;;  %v4894_v57 = vld [vmem:[#allocation8 + $0x218] sm:$0xff] }
 0x311   : > { %v1116_v36 = vsel %vm7414_vm6, %v6318_v41, %v1115_v52  ;;  %vm7416_vm6 = vsmask.f32 4352  ;;  %v1518_v21 = vshrl.u32 %v1264_v47, 16  ;;  %v1521_v4 = vshll.u32 %v1264_v47, 16  ;;  %2574 = vmatpush.msrb.mxu3 %v5094_v46  ;;  %v5099_v26 = vld [vmem:[#allocation7 + $0x38] sm:$0xff] }
 0x312   : > { %v1134_v35 = vunpack.c.l.b16 %v1116_v36  ;;  %v1739_v41 = vsel %vm7416_vm6, %v6288_v40, %v7415_v37  ;;  %vm7417_vm4 = vmmov %vm7416_vm6  ;;  %v1135_v52 = vunpack.c.h.b16 %v1116_v36  ;;  %v1512_v48 = vrot.slane %v1510_v62, 3 }
 0x313   : > { %v1748_v38 = vsel %vm7417_vm4, %v6293_v12, %v1747_v16  ;;  %vm7421_vm6 = vmmov %vm7417_vm4  ;;  %v1252_v16 = vsel %vm7423_vm12, %v6296_v22, %v6410_v3  ;;  %2333 = vmatmul.bf16.gmra.mxu3 %v1739_v41  ;;  %v1515_v36 = vrot.slane %v1513_v50, 4  ;;  %v1520_v47 = vrot.slane %v1518_v21, 3  ;;  %v4895_v22 = vld [vmem:[#allocation8 + $0x220] sm:$0xff] }
 0x314   : > { %vm6432_vm5 = vcmp.ne.s32.totalorder %v1134_v35, %v5754_v44  ;;  %v1508_v40 = vsel %vm7421_vm6, %v1499_v19, %v6408_v55  ;;  %vm7422_vm4 = vmpackc.low %vm6378_vm15, %vm6373_vm8  ;;  %v1523_v35 = vrot.slane %v1521_v4, 4  ;;  %vm6448_vm11 = vcmp.ne.s32.totalorder %v1135_v52, %v5795_v29  ;;  %v5095_v19 = vld [vmem:[#allocation5 + $0x48] sm:$0xff]  ;;  %2362 = vmatmul.bf16.gmra.mxu1 %v1748_v38  ;;  %v5096_v21 = vld [vmem:[#allocation5 + $0x40] sm:$0xff]  ;;  %2487 = vmatpush.bf16.msrb.mxu0 %v4895_v22 }
 0x315   : > { %v7419_v7 = vsel %vm6432_vm5, 4294967295, %v7418_v7  ;;  %v1159_v12 = vsel %vm7422_vm4, %v5961_v32, 0  ;;  %v7424_v5 = vmov 0  ;;  %2554 = vmatpush.msra.mxu2 %v5095_v19  ;;  %2376 = vmatmul.bf16.vlgmr.msra.gmra.mxu0 %v1508_v40  ;;  %v1535_v25 = vshrl.u32 %v1160_v11, 16  ;;  %vm7221_vm6 = vmpackc.low %vm6448_vm11, %vm6432_vm5  ;;  %v5097_v4 = vld [vmem:[#allocation7 + $0x40] sm:$0xff]  ;;  %v5098_v19 = vld [vmem:[#allocation5 + $0x38] sm:$0xff] }
 0x316   : > { %7420 = vst [vmem:[#allocation43_spill] sm:$0xff] %v7419_v7  ;;  %v7425_v5 = vsel %vm6448_vm11, 4294967295, %v7424_v5  ;;  %v1527_v62 = vshrl.u32 %v1159_v12, 16  ;;  %v1530_v50 = vshll.u32 %v1159_v12, 16  ;;  %v1538_v37 = vshll.u32 %v1160_v11, 16  ;;  %2575 = vmatpush.msrb.mxu3 %v5097_v4 }
 0x317   : > { %7426 = vst [vmem:[#allocation44_spill] sm:$0xff] %v7425_v5  ;;  %v6462_v41 = vsel %vm7221_vm6, %v5966_v58, 0  ;;  %2555 = vmatpush.msra.mxu2 %v5096_v21  ;;  %v1597_v38 = vshrl.u32 %v1252_v16, 16  ;;  %v1600_v52 = vshll.u32 %v1252_v16, 16  ;;  %v1516_v46 = vor.u32 %v1515_v36, %v1512_v48  ;;  %v5101_v48 = vld [vmem:[#allocation7 + $0x30] sm:$0xff] }
 0x318   : > { %v6464_v40 = vor.u32 %v1523_v35, %v1520_v47  ;;  %v7427_v11 = vshrl.u32 %v6086_v61, 16  ;;  %2576 = vmatpush.msrb.mxu3 %v5099_v26  ;;  %v1537_v54 = vrot.slane %v1535_v25, 3  ;;  %v1265_v7 = vrot.slane %v6462_v41, 5  ;;  %2488 = vmatpush.bf16.msrb.mxu0 %v4894_v57 }
 0x319   : > { %2556 = vmatpush.msra.mxu2 %v5098_v19  ;;  %v1529_v21 = vrot.slane %v1527_v62, 3  ;;  %v1532_v5 = vrot.slane %v1530_v50, 4  ;;  %v1540_v4 = vrot.slane %v1538_v37, 4  ;;  %v7428_v16 = vshrl.u32 %v5968_v9, 16  ;;  %v5102_v50 = vld [vmem:[#allocation5 + $0x28] sm:$0xff]  ;;  %v5105_v19 = vld [vmem:[#allocation7 + $0x20] sm:$0xff] }
 0x31a   : > { %v1117_v12 = vrot.slane %v7427_v11, 7  ;;  %2577 = vmatpush.msrb.mxu3 %v5101_v48  ;;  %v1599_v36 = vrot.slane %v1597_v38, 3  ;;  %v1602_v47 = vrot.slane %v1600_v52, 4  ;;  %v7429_v35 = vshll.u32 %v5968_v9, 16  ;;  %v5103_v37 = vld [vmem:[#allocation7 + $0x28] sm:$0xff] }
 0x31b   : > { %v1253_v22 = vrot.slane %v7428_v16, 4  ;;  %2557 = vmatpush.msra.mxu2 %v5100_v13  ;;  %v7430_v26 = vshll.u32 %v6086_v61, 16  ;;  %vm7431_vm12 = vsmask.f32 4352  ;;  %v7432_v13 = vrot.slane %v6398_v24, 5 }
 0x31c   : > { %v1254_v11 = vrot.slane %v7429_v35, 5  ;;  %v1525_v62 = vsel %vm7431_vm12, %v1516_v46, %v6464_v40  ;;  %2578 = vmatpush.msrb.mxu3 %v5103_v37  ;;  %vm7433_vm4 = vcmask 1042432   ;;  %vm7434_vm6 = vsmask.f32 256  ;;  %v5110_v37 = vld [vmem:[#allocation5 + $0x8] sm:$0xff] }
 0x31d   : > { %v1118_v25 = vor.u32 %v1117_v12, %v7430_v26  ;;  %2558 = vmatpush.msra.mxu2 %v5102_v50  ;;  %v1266_v38 = vsel %vm7433_vm4, %v7432_v13, %v1265_v7  ;;  %v5104_v12 = vld [vmem:[#allocation5 + $0x20] sm:$0xff]  ;;  %v1533_v46 = vor.u32 %v1532_v5, %v1529_v21  ;;  %v1541_v16 = vor.u32 %v1540_v4, %v1537_v54  ;;  %v5107_v50 = vld [vmem:[#allocation7 + $0x18] sm:$0xff]  ;;  %v5108_v54 = vld [vmem:[#allocation5 + $0x10] sm:$0xff] }
 0x31e   : > { %2405 = vmatmul.bf16.vlgmr.msrb.gmra.mxu2 %v1525_v62  ;;  %2579 = vmatpush.msrb.mxu3 %v5105_v19  ;;  %v1603_v48 = vor.u32 %v1602_v47, %v1599_v36  ;;  %v6484_v35 = vor.u32 %v1254_v11, %v1253_v22  ;;  %v1606_v26 = vshrl.u32 %v1266_v38, 16  ;;  %v1609_v62 = vshll.u32 %v1266_v38, 16  ;;  %v5109_v5 = vld [vmem:[#allocation7 + $0x10] sm:$0xff]  ;;  %v4892_v19 = vld [vmem:[#allocation8 + $0x208] sm:$0xff] }
 0x31f   : > { %v1119_v52 = vsel %vm7434_vm6, %v6340_v23, %v1118_v25  ;;  %2559 = vmatpush.msra.mxu2 %v5104_v12  ;;  %v7435_v24 = vmov 0  ;;  %v7438_v23 = vmov 0  ;;  %v5106_v25 = vld [vmem:[#allocation5 + $0x18] sm:$0xff]  ;;  %vm7441_vm4 = vsmask.f32 4352  ;;  %v4893_v13 = vld [vmem:[#allocation8 + $0x210] sm:$0xff] }
 0x320   : > { %v1141_v57 = vunpack.c.l.b16 %v1119_v52  ;;  %v1142_v61 = vunpack.c.h.b16 %v1119_v52  ;;  %2580 = vmatpush.msrb.mxu3 %v5107_v50  ;;  %v1542_v21 = vsel %vm7441_vm4, %v1533_v46, %v1541_v16  ;;  %v1161_v4 = vsel %vm6049_vm14, %v5966_v58, 0  ;;  %vm7442_vm11 = vmmov %vm7441_vm4  ;;  %v5112_v52 = vld [vmem:[#allocation7 + $0x8] sm:$0xff]  ;;  %2489 = vmatpush.bf16.msrb.mxu0 %v4893_v13  ;;  %v5113_v46 = vld [vmem:[#allocation7] sm:$0xff] }
 0x321   : > { %2560 = vmatpush.msra.mxu2 %v5106_v25  ;;  %v1604_v22 = vsel %vm7442_vm11, %v6408_v55, %v1603_v48  ;;  %v1608_v36 = vrot.slane %v1606_v26, 3  ;;  %v1611_v47 = vrot.slane %v1609_v62, 4  ;;  %vm7443_vm3 = vsmask.f32 3328  ;;  %v5111_v55 = vld [vmem:[#allocation5] sm:$0xff] }
 0x322   : > { %vm6487_vm12 = vcmp.ne.s32.totalorder %v1141_v57, %v5754_v44  ;;  %vm6492_vm6 = vcmp.ne.s32.totalorder %v1142_v61, %v5795_v29  ;;  %2581 = vmatpush.msrb.mxu3 %v5109_v5  ;;  %v1256_v11 = vsel %vm7443_vm3, %v6410_v3, %v6484_v35  ;;  %v1615_v57 = vshrl.u32 %v1161_v4, 16  ;;  %vm7444_vm3 = vmmov %vm7441_vm4 }
 0x323   : > { %v7436_v24 = vsel %vm6487_vm12, 4294967295, %v7435_v24  ;;  %v7439_v23 = vsel %vm6492_vm6, 4294967295, %v7438_v23  ;;  %2561 = vmatpush.msra.mxu2 %v5108_v54  ;;  %vm7225_vm5 = vmpackc.low %vm6492_vm6, %vm6487_vm12  ;;  %2434 = vmatmul.bf16.vlgmr.msra.gmra.mxu3 %v1542_v21  ;;  %v1618_v61 = vshll.u32 %v1161_v4, 16  ;;  %v1669_v3 = vshrl.u32 %v1256_v11, 16 }
 0x324   : > { %7437 = vst [vmem:[#allocation45_spill] sm:$0xff] %v7436_v24  ;;  %2463 = vmatmul.bf16.vlgmr.msra.gmra.mxu1 %v6174_v49  ;;  %v1151_v38 = vsel %vm7225_vm5, %v5968_v9, 0  ;;  %2582 = vmatpush.msrb.mxu3 %v5112_v52  ;;  %v1672_v12 = vshll.u32 %v1256_v11, 16  ;;  %v1612_v49 = vor.u32 %v1611_v47, %v1608_v36  ;;  %v1617_v62 = vrot.slane %v1615_v57, 3  ;;  %vm7446_vm4 = vmmov %vm7444_vm3 }
 0x325   : > { %7440 = vst [vmem:[#allocation46_spill] sm:$0xff] %v7439_v23  ;;  %2562 = vmatpush.msra.mxu2 %v5110_v37  ;;  %2381 = vmatmul.bf16.gmra.mxu0 %v1604_v22  ;;  %v1267_v26 = vrot.slane %v1151_v38, 5  ;;  %v1620_v25 = vrot.slane %v1618_v61, 4  ;;  %v1671_v50 = vrot.slane %v1669_v3, 3  ;;  %vm7445_vm11 = vcmask 1042432   ;;  %vm7447_vm5 = vmmov %vm7444_vm3 }
 0x326   : > { %2583 = vmatpush.msrb.mxu3 %v5113_v46  ;;  %v1674_v54 = vrot.slane %v1672_v12, 4  ;;  %2490 = vmatpush.bf16.msrb.mxu0 %v4892_v19  ;;  %v1613_v5 = vsel %vm7444_vm3, %v6464_v40, %v1612_v49  ;;  %v1162_v13 = vsel %vm6176_vm7, %v5968_v9, 0  ;;  %vm7448_vm3 = vsmask.f32 7424 }
 0x327   : > { %2563 = vmatpush.msra.mxu2 %v5111_v55  ;;  %v1268_v21 = vsel %vm7445_vm11, %v1265_v7, %v1267_v26  ;;  %v1621_v4 = vor.u32 %v1620_v25, %v1617_v62  ;;  %v1271_v40 = vsel %vm7448_vm3, %v6274_v6, %v5850_v53  ;;  %v1163_v7 = vunpack.c.l.b16 %v5790_v2 }
 0x328   : > { %v1675_v22 = vor.u32 %v1674_v54, %v1671_v50  ;;  %v1678_v11 = vshrl.u32 %v1268_v21, 16  ;;  %v1681_v36 = vshll.u32 %v1268_v21, 16  ;;  %v1164_v55 = vunpack.c.h.b16 %v5790_v2 }
 0x329   : > { %v1622_v47 = vsel %vm7446_vm4, %v1541_v16, %v1621_v4  ;;  %v4891_v16 = vld [vmem:[#allocation8 + $0x200] sm:$0xff]  ;;  %v1690_v52 = vshll.u32 %v1162_v13, 16  ;;  %v1696_v57 = vshrl.u32 %v1271_v40, 16  ;;  %v1699_v61 = vshll.u32 %v1271_v40, 16 }
 0x32a   : > { %v1676_v37 = vsel %vm7447_vm5, %v1603_v48, %v1675_v22  ;;  %v1680_v41 = vrot.slane %v1678_v11, 3  ;;  %v1683_v38 = vrot.slane %v1681_v36, 4  ;;  %v1687_v48 = vshrl.u32 %v1162_v13, 16  ;;  %2491 = vmatpush.bf16.msrb.mxu0 %v4891_v16 }
 0x32b   : > { %v1750_v3 = vshrl.u32 %v6484_v35, 16  ;;  %v1753_v12 = vshll.u32 %v6484_v35, 16  ;;  %vm6535_vm5 = vcmp.ne.s32.totalorder %v1163_v7, %v5754_v44  ;;  %v7449_v19 = vmov 0 }
 0x32c   : > { %v1684_v6 = vor.u32 %v1683_v38, %v1680_v41  ;;  %v7450_v19 = vsel %vm6535_vm5, 4294967295, %v7449_v19  ;;  %vm6540_vm11 = vcmp.ne.s32.totalorder %v1164_v55, %v5795_v29  ;;  %v7452_v2 = vmov 0 }
 0x32d   : > { %7451 = vst [vmem:[#allocation47_spill] sm:$0xff] %v7450_v19  ;;  %v7453_v2 = vsel %vm6540_vm11, 4294967295, %v7452_v2  ;;  %v1689_v62 = vrot.slane %v1687_v48, 3  ;;  %v1692_v25 = vrot.slane %v1690_v52, 4  ;;  %v1698_v50 = vrot.slane %v1696_v57, 3  ;;  %vm7229_vm4 = vmpackc.low %vm6540_vm11, %vm6535_vm5 }
 0x32e   : > { %2410 = vmatmul.bf16.gmra.mxu2 %v1613_v5  ;;  %7454 = vst [vmem:[#allocation48_spill] sm:$0xff] %v7453_v2  ;;  %v1701_v54 = vrot.slane %v1699_v61, 4  ;;  %v1752_v35 = vrot.slane %v1750_v3, 3  ;;  %v1755_v5 = vrot.slane %v1753_v12, 4  ;;  %vm7457_vm3 = vsmask.f32 4352 }
 0x32f   : > { %v1685_v44 = vsel %vm7457_vm3, %v1612_v49, %v1684_v6  ;;  %vm7458_vm12 = vcmask 1042432   ;;  %v1171_v21 = vsel %vm5943_vm1, %v5959_v8, 0  ;;  %v1172_v11 = vsel %vm5951_vm2, %v5966_v58, 0  ;;  %vm7460_vm6 = vmmov %vm7457_vm3 }
 0x330   : > { %v1170_v36 = vsel %vm7229_vm4, %v5961_v32, 0  ;;  %v1693_v49 = vor.u32 %v1692_v25, %v1689_v62  ;;  %v1277_v40 = vrot.slane %v1171_v21, 1  ;;  %v1279_v41 = vrot.slane %v1172_v11, 1 }
 0x331   : > { %v1276_v38 = vrot.slane %v1170_v36, 1  ;;  %vm7461_vm5 = vcmask 1046528  }
 0x332   : > { %v1280_v32 = vsel %vm7461_vm5, %v1277_v40, %v1279_v41  ;;  %vm7462_vm4 = vmmov %vm7461_vm5 }
 0x333   : > { %2439 = vmatmul.bf16.gmra.mxu3 %v1622_v47  ;;  %v1702_v47 = vor.u32 %v1701_v54, %v1698_v50  ;;  %v1278_v48 = vsel %vm7462_vm4, %v1276_v38, %v1277_v40  ;;  %v1561_v52 = vshrl.u32 %v1280_v32, 16  ;;  %v1564_v12 = vshll.u32 %v1280_v32, 16  ;;  %vm7466_vm5 = vmmov %vm7457_vm3 }
 0x334   : > { %2468 = vmatmul.bf16.gmra.mxu1 %v6283_v20  ;;  %v7455_v20 = vmov 0   ;;  %v1553_v61 = vshrl.u32 %v1278_v48, 16  ;;  %v1556_v3 = vshll.u32 %v1278_v48, 16  ;;  %vm7467_vm4 = vmmov %vm7457_vm3 }
 0x335   : > { %2386 = vmatmul.bf16.gmra.mxu0 %v1676_v37  ;;  %v6545_v46 = vrot.slane %v7455_v20, 5  ;;  %v1756_v37 = vor.u32 %v1755_v5, %v1752_v35  ;;  %v1703_v58 = vsel %vm7457_vm3, %v6266_v30, %v1702_v47  ;;  %v1772_v30 = vshll.u32 %v5850_v53, 16 }
 0x336   : > { %v1563_v20 = vrot.slane %v1561_v52, 3  ;;  %v1555_v25 = vrot.slane %v1553_v61, 3  ;;  %v1558_v50 = vrot.slane %v1556_v3, 4  ;;  %v1566_v54 = vrot.slane %v1564_v12, 4 }
 0x337   : > { %7456 = vst [vmem:[#allocation49_spill] sm:$0xff] %v6545_v46  ;;  %v1270_v29 = vsel %vm7458_vm12, %v1267_v26, %v6545_v46  ;;  %vm7459_vm12 = vmmov %vm7457_vm3  ;;  %v1757_v7 = vsel %vm7460_vm6, %v1675_v22, %v1756_v37  ;;  %v1774_v5 = vrot.slane %v1772_v30, 4 }
 0x338   : > { %v1759_v13 = vshrl.u32 %v1270_v29, 16  ;;  %v1762_v26 = vshll.u32 %v1270_v29, 16  ;;  %v1694_v8 = vsel %vm7459_vm12, %v1621_v4, %v1693_v49  ;;  %v1769_v4 = vshrl.u32 %v5850_v53, 16  ;;  %vm7463_vm12 = vmmov %vm7457_vm3 }
 0x339   : > { %v1559_v29 = vor.u32 %v1558_v50, %v1555_v25  ;;  %v1567_v21 = vor.u32 %v1566_v54, %v1563_v20  ;;  %vm7465_vm6 = vmmov %vm7457_vm3  ;;  %vm7468_vm3 = vcmask 1046528  }
 0x33a   : > { %v1761_v55 = vrot.slane %v1759_v13, 3  ;;  %v1764_v16 = vrot.slane %v1762_v26, 4  ;;  %v1771_v35 = vrot.slane %v1769_v4, 3  ;;  %v1767_v37 = vsel %vm7465_vm6, %v1693_v49, %v5799_v15  ;;  %vm7470_vm6 = vmmov %vm7468_vm3 }
 0x33b   : > { %v1568_v13 = vsel %vm7467_vm4, %v1559_v29, %v1567_v21 }
 0x33c   : > { %v1765_v57 = vor.u32 %v1764_v16, %v1761_v55  ;;  %v6578_v36 = vor.u32 %v1774_v5, %v1771_v35 }
 0x33e   : > { %2415 = vmatmul.bf16.gmra.mxu2 %v1685_v44  ;;  %v1766_v22 = vsel %vm7463_vm12, %v1684_v6, %v1765_v57  ;;  %v1173_v44 = vsel %vm6140_vm9, %v5968_v9, 0  ;;  %7464 = vst [vmem:[#allocation50_spill] sm:$0xff] %v6578_v36  ;;  %v1776_v6 = vsel %vm7466_vm5, %v1702_v47, %v6578_v36  ;;  %vm7469_vm12 = vmmov %vm7467_vm4  ;;  %v6590_v47 = vld [vmem:[%s7160_s5] sm:$0xff] }
 0x33f   : > { %v1281_v11 = vrot.slane %v1173_v44, 1  ;;  %v6593_v48 = vperm.slane %v6590_v47, 3  ;;  %vm7471_vm5 = vmmov %vm7467_vm4 }
 0x341   : > { %v1282_v40 = vsel %vm7468_vm3, %v1279_v41, %v1281_v11  ;;  %v1283_v41 = vsel %vm7470_vm6, %v1281_v11, %v5850_v53  ;;  %vm7472_vm3 = vcmask 1040384  }
 0x342   : > { %v1633_v9 = vshrl.u32 %v1282_v40, 16  ;;  %v1636_v38 = vshll.u32 %v1282_v40, 16  ;;  %v1705_v3 = vshrl.u32 %v1283_v41, 16  ;;  %v1708_v12 = vshll.u32 %v1283_v41, 16 }
 0x343   : > { %2444 = vmatmul.bf16.gmra.mxu3 %v1694_v8 }
 0x344   : > { %2473 = vmatmul.bf16.gmra.mxu1 %v1703_v58  ;;  %v1635_v8 = vrot.slane %v1633_v9, 3  ;;  %v1638_v58 = vrot.slane %v1636_v38, 4  ;;  %v1710_v25 = vrot.slane %v1708_v12, 4 }
 0x345   : > { %2391 = vmatmul.bf16.gmra.mxu0 %v1757_v7  ;;  %v2261_v62 = vpop.f32.mrf.mxu0 }
 0x346   : > { %v1639_v32 = vor.u32 %v1638_v58, %v1635_v8  ;;  %v2262_v50 = vadd.f32 %v2261_v62, %v6593_v48 }
 0x348   : > { %v1640_v49 = vsel %vm7469_vm12, %v1567_v21, %v1639_v32 }
 0x34c   : > { %v2348_v5 = vpop.f32.mrf.mxu1 }
 0x34d   : > { %v2263_v26 = vpop.f32.mrf.mxu0 }
 0x34e   : > { %2420 = vmatmul.bf16.gmra.mxu2 %v1766_v22  ;;  %v2319_v55 = vpop.f32.mrf.mxu3  ;;  %v2264_v52 = vadd.f32 %v2263_v26, %v6593_v48  ;;  %v1707_v22 = vrot.slane %v1705_v3, 3 }
 0x350   : > { %v1711_v35 = vor.u32 %v1710_v25, %v1707_v22 }
 0x352   : > { %v1712_v21 = vsel %vm7471_vm5, %v1639_v32, %v1711_v35 }
 0x353   : > { %2449 = vmatmul.bf16.gmra.mxu3 %v1767_v37 }
 0x354   : > { %2478 = vmatmul.bf16.gmra.mxu1 %v1776_v6  ;;  %v6603_v9 = vpop.f32.mrf.mxu1 }
 0x355   : > { %2492 = vmatmul.bf16.vlgmr.msrb.gmra.mxu0 %v1568_v13 }
 0x356   : > { %v2266_v7 = vpop.f32.mrf.mxu0  ;;  %v2321_v30 = vpop.f32.mrf.mxu3 }
 0x357   : > { %v2267_v62 = vadd.f32 %v2266_v7, %v6593_v48 }
 0x359   : > { %v2290_v16 = vpop.f32.mrf.mxu2 }
 0x35a   : > { %v2291_v44 = vadd.f32 %v2290_v16, %v2262_v50 }
 0x35c   : > { %v2320_v11 = vadd.f32 %v2319_v55, %v2291_v44  ;;  %v1785_v55 = vsel %vm7467_vm4, %v1711_v35, %v6578_v36 }
 0x35e   : > { %v2268_v61 = vpop.f32.mrf.mxu0  ;;  %v2349_v40 = vadd.f32 %v2348_v5, %v2320_v11 }
 0x35f   : > { %v2269_v13 = vadd.f32 %v2268_v61, %v6593_v48 }
 0x361   : > { %v2292_v57 = vpop.f32.mrf.mxu2 }
 0x362   : > { %v2293_v4 = vadd.f32 %v2292_v57, %v2264_v52 }
 0x364   : > { %v6598_v20 = vadd.f32 %v2321_v30, %v2293_v4 }
 0x365   : > { %2497 = vmatmul.bf16.gmra.mxu0 %v1640_v49 }
 0x366   : > { %v2351_v17 = vadd.f32 %v6603_v9, %v6598_v20 }
 0x369   : > { %v2295_v54 = vpop.f32.mrf.mxu2 }
 0x36a   : > { %v2296_v49 = vadd.f32 %v2295_v54, %v2267_v62 }
 0x36f   : > { %v2353_v32 = vpop.f32.mrf.mxu1 }
 0x370   : > { %v2271_v29 = vpop.f32.mrf.mxu0 }
 0x371   : > { %v2297_v6 = vpop.f32.mrf.mxu2  ;;  %v2272_v25 = vadd.f32 %v2271_v29, %v6593_v48 }
 0x372   : > { %v2298_v38 = vadd.f32 %v2297_v6, %v2269_v13 }
 0x374   : > { %v2324_v37 = vpop.f32.mrf.mxu3 }
 0x375   : > { %2502 = vmatmul.bf16.gmra.mxu0 %v1712_v21  ;;  %v2325_v52 = vadd.f32 %v2324_v37, %v2296_v49 }
 0x377   : > { %v2354_v4 = vadd.f32 %v2353_v32, %v2325_v52  ;;  %v2355_v22 = vpop.f32.mrf.mxu1 }
 0x378   : > { %v2273_v26 = vpop.f32.mrf.mxu0 }
 0x379   : > { %v2274_v3 = vadd.f32 %v2273_v26, %v6593_v48 }
 0x37c   : > { %v2326_v8 = vpop.f32.mrf.mxu3  ;;  %v2300_v16 = vpop.f32.mrf.mxu2 }
 0x37d   : > { %v6606_v58 = vadd.f32 %v2326_v8, %v2298_v38  ;;  %v2301_v54 = vadd.f32 %v2300_v16, %v2272_v25 }
 0x37f   : > { %v2358_v35 = vpop.f32.mrf.mxu1  ;;  %v2356_v43 = vadd.f32 %v2355_v22, %v6606_v58 }
 0x380   : > { %v2276_v41 = vpop.f32.mrf.mxu0 }
 0x381   : > { %v2277_v60 = vadd.f32 %v2276_v41, %v6593_v48 }
 0x384   : > { %v2329_v57 = vpop.f32.mrf.mxu3  ;;  %v2302_v61 = vpop.f32.mrf.mxu2 }
 0x385   : > { %2507 = vmatmul.bf16.gmra.mxu0 %v1785_v55  ;;  %v2303_v30 = vadd.f32 %v2302_v61, %v2274_v3  ;;  %v2330_v21 = vadd.f32 %v2329_v57, %v2301_v54 }
 0x387   : > { %v2359_v6 = vadd.f32 %v2358_v35, %v2330_v21  ;;  %v2360_v8 = vpop.f32.mrf.mxu1 }
 0x388   : > { %v2278_v12 = vpop.f32.mrf.mxu0 }
 0x389   : > { %v2279_v1 = vadd.f32 %v2278_v12, %v6593_v48 }
 0x38c   : > { %v2331_v7 = vpop.f32.mrf.mxu3 }
 0x38d   : > { %v2332_v50 = vadd.f32 %v2331_v7, %v2303_v30  ;;  %v2305_v13 = vpop.f32.mrf.mxu2 }
 0x38e   : > { %v2306_v10 = vadd.f32 %v2305_v13, %v2277_v60 }
 0x38f   : > { %v2361_v9 = vadd.f32 %v2360_v8, %v2332_v50 }
 0x391   : > { %v2363_v55 = vpop.f32.mrf.mxu1 }
 0x392   : > { %v2377_v5 = vpop.f32.mrf.mxu0 }
 0x393   : > { %v2378_v44 = vadd.f32 %v2377_v5, %v2349_v40 }
 0x395   : > { %v2307_v49 = vpop.f32.mrf.mxu2 }
 0x396   : > { %v2334_v26 = vpop.f32.mrf.mxu3  ;;  %v2308_v27 = vadd.f32 %v2307_v49, %v2279_v1 }
 0x397   : > { %v2335_v15 = vadd.f32 %v2334_v26, %v2306_v10 }
 0x399   : > { %v2365_v3 = vpop.f32.mrf.mxu1 }
 0x39a   : > { %v2379_v11 = vpop.f32.mrf.mxu0 }
 0x39b   : > { %v2380_v56 = vadd.f32 %v2379_v11, %v2351_v17 }
 0x39e   : > { %v2336_v52 = vpop.f32.mrf.mxu3 }
 0x39f   : > { %v2337_v13 = vadd.f32 %v2336_v52, %v2308_v27 }
 0x3a1   : > { %v2406_v29 = vpop.f32.mrf.mxu2  ;;  %v2464_v57 = vpop.f32.mrf.mxu1 }
 0x3a2   : > { %v2382_v37 = vpop.f32.mrf.mxu0  ;;  %v2407_v18 = vadd.f32 %v2406_v29, %v2378_v44 }
 0x3a3   : > { %v2383_v38 = vadd.f32 %v2382_v37, %v2354_v4 }
 0x3a6   : > { %v2435_v30 = vpop.f32.mrf.mxu3 }
 0x3a7   : > { %v2436_v41 = vadd.f32 %v2435_v30, %v2407_v18 }
 0x3a9   : > { %v2408_v40 = vpop.f32.mrf.mxu2  ;;  %v2466_v21 = vpop.f32.mrf.mxu1  ;;  %v2465_v10 = vadd.f32 %v2464_v57, %v2436_v41 }
 0x3aa   : > { %v2384_v62 = vpop.f32.mrf.mxu0  ;;  %v2409_v63 = vadd.f32 %v2408_v40, %v2380_v56  ;;  %v2364_v56 = vadd.f32 %v2363_v55, %v2335_v15 }
 0x3ab   : > { %v2385_v0 = vadd.f32 %v2384_v62, %v2356_v43 }
 0x3ae   : > { %v2437_v25 = vpop.f32.mrf.mxu3 }
 0x3af   : > { %v2438_v14 = vadd.f32 %v2437_v25, %v2409_v63 }
 0x3b1   : > { %v2411_v5 = vpop.f32.mrf.mxu2  ;;  %v2469_v36 = vpop.f32.mrf.mxu1  ;;  %v2467_v58 = vadd.f32 %v2466_v21, %v2438_v14 }
 0x3b2   : > { %v2387_v32 = vpop.f32.mrf.mxu0  ;;  %v2412_v53 = vadd.f32 %v2411_v5, %v2383_v38 }
 0x3b3   : > { %v2388_v61 = vadd.f32 %v2387_v32, %v2359_v6 }
 0x3b6   : > { %v2440_v4 = vpop.f32.mrf.mxu3 }
 0x3b7   : > { %v2441_v17 = vadd.f32 %v2440_v4, %v2412_v53 }
 0x3b9   : > { %v2413_v37 = vpop.f32.mrf.mxu2  ;;  %v2471_v24 = vpop.f32.mrf.mxu1  ;;  %v2470_v26 = vadd.f32 %v2469_v36, %v2441_v17 }
 0x3ba   : > { %v2389_v16 = vpop.f32.mrf.mxu0  ;;  %v2414_v20 = vadd.f32 %v2413_v37, %v2385_v0  ;;  %v2366_v0 = vadd.f32 %v2365_v3, %v2337_v13 }
 0x3bb   : > { %v2390_v60 = vadd.f32 %v2389_v16, %v2361_v9 }
 0x3be   : > { %v2442_v2 = vpop.f32.mrf.mxu3 }
 0x3bf   : > { %v2443_v22 = vadd.f32 %v2442_v2, %v2414_v20 }
 0x3c1   : > { %v2416_v46 = vpop.f32.mrf.mxu2  ;;  %v2474_v45 = vpop.f32.mrf.mxu1  ;;  %v2472_v15 = vadd.f32 %v2471_v24, %v2443_v22 }
 0x3c2   : > { %v2392_v7 = vpop.f32.mrf.mxu0  ;;  %v2417_v11 = vadd.f32 %v2416_v46, %v2388_v61 }
 0x3c3   : > { %v2393_v48 = vadd.f32 %v2392_v7, %v2364_v56 }
 0x3c6   : > { %v2445_v32 = vpop.f32.mrf.mxu3 }
 0x3c7   : > { %v2446_v1 = vadd.f32 %v2445_v32, %v2417_v11 }
 0x3c9   : > { %v2418_v23 = vpop.f32.mrf.mxu2  ;;  %v2476_v28 = vpop.f32.mrf.mxu1  ;;  %v2475_v8 = vadd.f32 %v2474_v45, %v2446_v1 }
 0x3ca   : > { %v2394_v54 = vpop.f32.mrf.mxu0  ;;  %v2419_v12 = vadd.f32 %v2418_v23, %v2390_v60 }
 0x3cb   : > { %v2395_v27 = vadd.f32 %v2394_v54, %v2366_v0  ;;  %v4906_v0 = vld [vmem:[#allocation10 + $0x38] sm:$0xff] }
 0x3cc   : > { %3746 = vmatpush.bf16.msrb.mxu1 %v4906_v0 }
 0x3ce   : > { %v2447_v42 = vpop.f32.mrf.mxu3 }
 0x3cf   : > { %v2448_v53 = vadd.f32 %v2447_v42, %v2419_v12 }
 0x3d1   : > { %v2421_v39 = vpop.f32.mrf.mxu2  ;;  %v2479_v14 = vpop.f32.mrf.mxu1  ;;  %v2477_v49 = vadd.f32 %v2476_v28, %v2448_v53  ;;  %v4905_v53 = vld [vmem:[#allocation10 + $0x30] sm:$0xff] }
 0x3d2   : > { %v2493_v35 = vpop.f32.mrf.mxu0  ;;  %v2422_v63 = vadd.f32 %v2421_v39, %v2393_v48  ;;  %3747 = vmatpush.bf16.msrb.mxu1 %v4905_v53  ;;  %v4909_v53 = vld [vmem:[#allocation10 + $0x50] sm:$0xff] }
 0x3d3   : > { %v6619_v50 = vadd.f32 %v2493_v35, %v2465_v10 }
 0x3d5   : > { %v2526_v39 = vmul.f32 %v6619_v50, %v6619_v50 }
 0x3d6   : > { %v2450_v44 = vpop.f32.mrf.mxu3 }
 0x3d7   : > { %v2451_v2 = vadd.f32 %v2450_v44, %v2422_v63 }
 0x3d9   : > { %v2423_v18 = vpop.f32.mrf.mxu2  ;;  %v2480_v3 = vadd.f32 %v2479_v14, %v2451_v2  ;;  %v2481_v54 = vpop.f32.mrf.mxu1 }
 0x3da   : > { %v2495_v19 = vpop.f32.mrf.mxu0  ;;  %v2424_v36 = vadd.f32 %v2423_v18, %v2395_v27 }
 0x3db   : > { %v6617_v43 = vadd.f32 %v2495_v19, %v2467_v58 }
 0x3dd   : > { %v2527_v23 = vmul.f32 %v6617_v43, %v6617_v43  ;;  %v2513_v42 = vadd.f32 %v6617_v43, %v6619_v50 }
 0x3de   : > { %v2452_v61 = vpop.f32.mrf.mxu3 }
 0x3df   : > { %v2534_v55 = vadd.f32 %v2527_v23, %v2526_v39  ;;  %v2453_v16 = vadd.f32 %v2452_v61, %v2424_v36  ;;  %v4904_v36 = vld [vmem:[#allocation10 + $0x28] sm:$0xff]  ;;  %v4929_v61 = vld [vmem:[#allocation10 + $0xf0] sm:$0xff] }
 0x3e0   : > { %3748 = vmatpush.bf16.msrb.mxu1 %v4904_v36 }
 0x3e1   : > { %v2482_v35 = vadd.f32 %v2481_v54, %v2453_v16  ;;  %v4902_v16 = vld [vmem:[#allocation10 + $0x18] sm:$0xff]  ;;  %v4919_v54 = vld [vmem:[#allocation10 + $0xa0] sm:$0xff] }
 0x3e2   : > { %v2498_v6 = vpop.f32.mrf.mxu0 }
 0x3e3   : > { %v6621_v46 = vadd.f32 %v2498_v6, %v2470_v26 }
 0x3e5   : > { %v2528_v62 = vmul.f32 %v6621_v46, %v6621_v46 }
 0x3e7   : > { %v2535_v30 = vadd.f32 %v2534_v55, %v2528_v62  ;;  %v4930_v62 = vld [vmem:[#allocation10 + $0xf8] sm:$0xff]  ;;  %v4903_v55 = vld [vmem:[#allocation10 + $0x20] sm:$0xff] }
 0x3e8   : > { %3833 = vmatpush.bf16.msra.mxu0 %v4930_v62  ;;  %3749 = vmatpush.bf16.msrb.mxu1 %v4903_v55 }
 0x3ea   : > { %v2500_v33 = vpop.f32.mrf.mxu0 }
 0x3eb   : > { %v6625_v19 = vadd.f32 %v2500_v33, %v2472_v15  ;;  %v2514_v33 = vadd.f32 %v2513_v42, %v6621_v46  ;;  %v4922_v42 = vld [vmem:[#allocation10 + $0xb8] sm:$0xff] }
 0x3ec   : > { %3804 = vmatpush.bf16.msra.mxu3 %v4922_v42  ;;  %3834 = vmatpush.bf16.msra.mxu0 %v4929_v61  ;;  %v4924_v42 = vld [vmem:[#allocation10 + $0xc8] sm:$0xff] }
 0x3ed   : > { %v2529_v45 = vmul.f32 %v6625_v19, %v6625_v19  ;;  %v2515_v40 = vadd.f32 %v2514_v33, %v6625_v19  ;;  %v4913_v33 = vld [vmem:[#allocation10 + $0x70] sm:$0xff]  ;;  %3750 = vmatpush.bf16.msrb.mxu1 %v4902_v16  ;;  %v4908_v61 = vld [vmem:[#allocation10 + $0x48] sm:$0xff] }
 0x3ef   : > { %v2536_v28 = vadd.f32 %v2535_v30, %v2529_v45  ;;  %v4920_v30 = vld [vmem:[#allocation10 + $0xa8] sm:$0xff] }
 0x3f2   : > { %v2503_v59 = vpop.f32.mrf.mxu0 }
 0x3f3   : > { %v6633_v24 = vadd.f32 %v2503_v59, %v2475_v8 }
 0x3f5   : > { %v2530_v59 = vmul.f32 %v6633_v24, %v6633_v24  ;;  %v2516_v7 = vadd.f32 %v2515_v40, %v6633_v24  ;;  %v4928_v40 = vld [vmem:[#allocation10 + $0xe8] sm:$0xff] }
 0x3f6   : > { %3835 = vmatpush.bf16.msra.mxu0 %v4928_v40 }
 0x3f7   : > { %v2537_v5 = vadd.f32 %v2536_v28, %v2530_v59  ;;  %v4912_v28 = vld [vmem:[#allocation10 + $0x68] sm:$0xff] }
 0x3fa   : > { %v2505_v38 = vpop.f32.mrf.mxu0 }
 0x3fb   : > { %v6638_v29 = vadd.f32 %v2505_v38, %v2477_v49  ;;  %v4914_v49 = vld [vmem:[#allocation10 + $0x78] sm:$0xff] }
 0x3fc   : > { %3775 = vmatpush.bf16.msrb.mxu2 %v4914_v49 }
 0x3fd   : > { %v2531_v25 = vmul.f32 %v6638_v29, %v6638_v29  ;;  %v2517_v21 = vadd.f32 %v2516_v7, %v6638_v29 }
 0x3ff   : > { %v2538_v6 = vadd.f32 %v2537_v5, %v2531_v25  ;;  %v4901_v25 = vld [vmem:[#allocation10 + $0x10] sm:$0xff]  ;;  %v4927_v5 = vld [vmem:[#allocation10 + $0xe0] sm:$0xff] }
 0x400   : > { %3776 = vmatpush.bf16.msrb.mxu2 %v4913_v33  ;;  %3751 = vmatpush.bf16.msrb.mxu1 %v4901_v25  ;;  %v4937_v33 = vld [vmem:[#allocation10 + $0x130] sm:$0xff] }
 0x401   : > { %3836 = vmatpush.bf16.msra.mxu0 %v4927_v5 }
 0x402   : > { %v2508_v52 = vpop.f32.mrf.mxu0 }
 0x403   : > { %v6643_v57 = vadd.f32 %v2508_v52, %v2480_v3  ;;  %v4921_v52 = vld [vmem:[#allocation10 + $0xb0] sm:$0xff] }
 0x404   : > { %3805 = vmatpush.bf16.msra.mxu3 %v4921_v52  ;;  %3777 = vmatpush.bf16.msrb.mxu2 %v4912_v28  ;;  %v4915_v28 = vld [vmem:[#allocation10 + $0x80] sm:$0xff] }
 0x405   : > { %v2532_v4 = vmul.f32 %v6643_v57, %v6643_v57  ;;  %v2518_v32 = vadd.f32 %v2517_v21, %v6643_v57 }
 0x407   : > { %v2539_v9 = vadd.f32 %v2538_v6, %v2532_v4  ;;  %v4911_v4 = vld [vmem:[#allocation10 + $0x60] sm:$0xff] }
 0x408   : > { %3806 = vmatpush.bf16.msra.mxu3 %v4920_v30  ;;  %3778 = vmatpush.bf16.msrb.mxu2 %v4911_v4 }
 0x40a   : > { %v2510_v37 = vpop.f32.mrf.mxu0 }
 0x40b   : > { %v6652_v20 = vadd.f32 %v2510_v37, %v2482_v35  ;;  %v2616_v35 = vrot.slane %v6590_v47, 3 }
 0x40c   : > { %3807 = vmatpush.bf16.msra.mxu3 %v4919_v54 }
 0x40d   : > { %v2519_v41 = vadd.f32 %v2518_v32, %v6652_v20  ;;  %v2533_v17 = vmul.f32 %v6652_v20, %v6652_v20  ;;  %v4900_v32 = vld [vmem:[#allocation10 + $0x8] sm:$0xff] }
 0x40e   : > { %3752 = vmatpush.bf16.msrb.mxu1 %v4900_v32  ;;  %v4907_v32 = vld [vmem:[#allocation10 + $0x40] sm:$0xff] }
 0x40f   : > { %v2520_v60 = vrot.slane %v2519_v41, 4  ;;  %v2540_v11 = vadd.f32 %v2539_v9, %v2533_v17  ;;  %v4918_v9 = vld [vmem:[#allocation10 + $0x98] sm:$0xff] }
 0x410   : > { %3808 = vmatpush.bf16.msra.mxu3 %v4918_v9  ;;  %v4936_v9 = vld [vmem:[#allocation10 + $0x128] sm:$0xff] }
 0x411   : > { %v2521_v56 = vadd.f32 %v2520_v60, %v2519_v41  ;;  %v2541_v13 = vrot.slane %v2540_v11, 4  ;;  %v4926_v41 = vld [vmem:[#allocation10 + $0xd8] sm:$0xff] }
 0x412   : > { %v4910_v60 = vld [vmem:[#allocation10 + $0x58] sm:$0xff]  ;;  %3837 = vmatpush.bf16.msra.mxu0 %v4926_v41 }
 0x413   : > { %v2522_v58 = vrot.slane %v2521_v56, 2  ;;  %v2542_v22 = vadd.f32 %v2541_v13, %v2540_v11  ;;  %v2628_v13 = vperm.slane %v6590_v47, 5  ;;  %3779 = vmatpush.bf16.msrb.mxu2 %v4910_v60 }
 0x415   : > { %v2523_v48 = vadd.f32 %v2522_v58, %v2521_v56  ;;  %v2543_v12 = vrot.slane %v2542_v22, 2  ;;  %v4899_v58 = vld [vmem:[#allocation10] sm:$0xff] }
 0x416   : > { %3753 = vmatpush.bf16.msrb.mxu1 %v4899_v58 }
 0x417   : > { %v2524_v44 = vrot.slane %v2523_v48, 1  ;;  %v2544_v10 = vadd.f32 %v2543_v12, %v2542_v22  ;;  %3780 = vmatpush.bf16.msrb.mxu2 %v4909_v53 }
 0x419   : > { %v2545_v38 = vrot.slane %v2544_v10, 1  ;;  %v2525_v1 = vadd.f32 %v2524_v44, %v2523_v48 }
 0x41b   : > { %v2546_v63 = vadd.f32 %v2545_v38, %v2544_v10  ;;  %v4917_v10 = vld [vmem:[#allocation10 + $0x90] sm:$0xff]  ;;  %3781 = vmatpush.bf16.msrb.mxu2 %v4908_v61  ;;  %v4935_v61 = vld [vmem:[#allocation10 + $0x120] sm:$0xff] }
 0x41c   : > { %3809 = vmatpush.bf16.msra.mxu3 %v4917_v10  ;;  %v7474_v10 = vld [vmem:[#allocation22_spill] sm:$0xff] }
 0x41d   : > { %v2547_v26 = vsel %vm7472_vm3, %v2525_v1, %v2546_v63  ;;  %v4925_v63 = vld [vmem:[#allocation10 + $0xd0] sm:$0xff]  ;;  %vm7475_vm4 = vnez %v7474_v10 }
 0x41e   : > { %2564 = vmatmul.f32.vlgmr.msra.gmra.mxu2 %v2547_v26  ;;  %3838 = vmatpush.bf16.msra.mxu0 %v4925_v63  ;;  %vm7476_vm3 = vmpackc.low %vm5879_vm10, %vm7475_vm4  ;;  %vm7483_vm10 = vcmask 1046528  }
 0x41f   : > { %3782 = vmatpush.bf16.msrb.mxu2 %v4907_v32  ;;  %vm7484_vm4 = vmmov %vm7483_vm10 }
 0x422   : > { %3839 = vmatpush.bf16.msra.mxu0 %v4924_v42 }
 0x4a1   : > { %v2565_v18 = vpop.f32.mrf.mxu2 }
 0x4a2   : > { %2584 = vmatmul.f32.vlgmr.msrb.gmra.mxu3 %v2565_v18 }
 0x525   : > { %v2585_v15 = vpop.f32.mrf.mxu3 }
 0x526   : > { %v2588_v14 = vmul.f32 0.0009765625, %v2585_v15 }
 0x528   : > { %v2589_v27 = vmul.f32 %v2588_v14, %v2588_v14  ;;  %v2595_v37 = vperm.slane %v2588_v14, 0 }
 0x52a   : > { %v2591_v23 = vrot.slane %v2589_v27, 7  ;;  %v2596_v56 = vsub.f32 %v6619_v50, %v2595_v37  ;;  %v2597_v22 = vsub.f32 %v6617_v43, %v2595_v37  ;;  %v2598_v48 = vsub.f32 %v6621_v46, %v2595_v37 }
 0x52b   : > { %v2599_v12 = vsub.f32 %v6625_v19, %v2595_v37  ;;  %v2600_v38 = vsub.f32 %v6633_v24, %v2595_v37  ;;  %v2601_v1 = vsub.f32 %v6638_v29, %v2595_v37  ;;  %v2602_v50 = vsub.f32 %v6643_v57, %v2595_v37  ;;  %v4938_v19 = vld [vmem:[#allocation10 + $0x138] sm:$0xff]  ;;  %v4916_v57 = vld [vmem:[#allocation10 + $0x88] sm:$0xff] }
 0x52c   : > { %v2593_v2 = vsub.f32 %v2588_v14, %v2591_v23  ;;  %v2603_v47 = vsub.f32 %v6652_v20, %v2595_v37  ;;  %3862 = vmatpush.bf16.msra.mxu1 %v4938_v19  ;;  %3810 = vmatpush.bf16.msra.mxu3 %v4916_v57 }
 0x52e   : > { %v2594_v8 = vmax.f32 %v2593_v2, 0.0 }
 0x530   : > { %v2604_v39 = vadd.f32 1e-05, %v2594_v8  ;;  %3863 = vmatpush.bf16.msra.mxu1 %v4937_v33  ;;  %3811 = vmatpush.bf16.msra.mxu3 %v4915_v28  ;;  %v7487_v33 = vld [vmem:[#allocation20_spill] sm:$0xff] }
 0x532   : > { %5080 = vrsqrt.f32 %v2604_v39  ;;  %vm2611_vm6 = vweird.f32 %v2604_v39 }
 0x534   : > { %3864 = vmatpush.bf16.msra.mxu1 %v4936_v9 }
 0x538   : > { %v5081_v45 = vpop.eup %5080  ;;  %3865 = vmatpush.bf16.msra.mxu1 %v4935_v61 }
 0x539   : > { %v2606_v3 = vmul.f32 %v5081_v45, %v2604_v39  ;;  %vm2612_vm12 = vweird.f32 %v5081_v45 }
 0x53a   : > { %vm2613_vm5 = vmor %vm2611_vm6, %vm2612_vm12 }
 0x53b   : > { %v2607_v59 = vmul.f32 %v5081_v45, %v2606_v3 }
 0x53d   : > { %v2608_v7 = vmul.f32 0.5, %v2607_v59 }
 0x53f   : > { %v2609_v21 = vsub.f32 1.5, %v2608_v7 }
 0x541   : > { %v2610_v6 = vmul.f32 %v5081_v45, %v2609_v21  ;;  %v4923_v21 = vld [vmem:[#allocation10 + $0xc0] sm:$0xff] }
 0x542   : > { %3840 = vmatpush.bf16.msra.mxu0 %v4923_v21 }
 0x543   : > { %v2614_v17 = vsel %vm2613_vm5, %v5081_v45, %v2610_v6 }
 0x544   : > { %v2618_v11 = vmul.f32 %v2616_v35, %v2614_v17 }
 0x546   : > { %v2619_v44 = vperm.slane %v2618_v11, 1 }
 0x548   : > { %v2620_v26 = vmul.f32 %v2619_v44, %v2596_v56  ;;  %v2621_v43 = vmul.f32 %v2619_v44, %v2597_v22  ;;  %v2622_v0 = vmul.f32 %v2619_v44, %v2598_v48  ;;  %v2623_v46 = vmul.f32 %v2619_v44, %v2599_v12 }
 0x549   : > { %v2624_v18 = vmul.f32 %v2619_v44, %v2600_v38  ;;  %v2625_v15 = vmul.f32 %v2619_v44, %v2601_v1  ;;  %v2626_v14 = vmul.f32 %v2619_v44, %v2602_v50  ;;  %v2627_v27 = vmul.f32 %v2619_v44, %v2603_v47 }
 0x54a   : > { %v2629_v24 = vadd.f32 %v2628_v13, %v2620_v26  ;;  %v2630_v23 = vadd.f32 %v2628_v13, %v2621_v43  ;;  %v2631_v29 = vadd.f32 %v2628_v13, %v2622_v0  ;;  %v2632_v2 = vadd.f32 %v2628_v13, %v2623_v46  ;;  %v7477_v26 = vld [vmem:[#allocation25_spill] sm:$0xff]  ;;  %v7479_v43 = vld [vmem:[#allocation24_spill] sm:$0xff] }
 0x54b   : > { %v2633_v20 = vadd.f32 %v2628_v13, %v2624_v18  ;;  %v2634_v8 = vadd.f32 %v2628_v13, %v2625_v15  ;;  %v2635_v39 = vadd.f32 %v2628_v13, %v2626_v14  ;;  %v2636_v36 = vadd.f32 %v2628_v13, %v2627_v27  ;;  %v7482_v14 = vld [vmem:[#allocation21_spill] sm:$0xff] }
 0x54c   : > { %v2637_v62 = vmax.f32 %v2629_v24, 0.0  ;;  %v2638_v49 = vmax.f32 %v2630_v23, 0.0  ;;  %v2639_v55 = vmax.f32 %v2631_v29, 0.0  ;;  %v2640_v52 = vmax.f32 %v2632_v2, 0.0 }
 0x54d   : > { %v2641_v45 = vmax.f32 %v2633_v20, 0.0  ;;  %v2642_v3 = vmax.f32 %v2634_v8, 0.0  ;;  %v2643_v7 = vmax.f32 %v2635_v39, 0.0  ;;  %v2644_v25 = vmax.f32 %v2636_v36, 0.0  ;;  %v7485_v8 = vld [vmem:[#allocation19_spill] sm:$0xff] }
 0x54e   : > { %v2645_v16 = vpack.c.bf16 %v2637_v62, %v2637_v62  ;;  %v2646_v30 = vpack.c.bf16 %v2638_v49, %v2638_v49  ;;  %v2647_v40 = vpack.c.bf16 %v2639_v55, %v2639_v55  ;;  %v2648_v59 = vpack.c.bf16 %v2640_v52, %v2640_v52 }
 0x54f   : > { %v2649_v54 = vpack.c.bf16 %v2641_v45, %v2641_v45  ;;  %v2650_v5 = vpack.c.bf16 %v2642_v3, %v2642_v3  ;;  %v6672_v56 = vpack.c.bf16 %v2643_v7, %v2643_v7  ;;  %v6674_v13 = vpack.c.bf16 %v2644_v25, %v2644_v25 }
 0x550   : > { %v2661_v4 = vunpack.c.l.b16 %v2645_v16  ;;  %v2662_v35 = vunpack.c.l.b16 %v2646_v30  ;;  %v2663_v37 = vunpack.c.l.b16 %v2647_v40  ;;  %v2664_v6 = vunpack.c.l.b16 %v2648_v59 }
 0x551   : > { %v2665_v41 = vunpack.c.l.b16 %v2649_v54  ;;  %v2666_v17 = vunpack.c.l.b16 %v2650_v5  ;;  %vm7478_vm12 = vnez %v7477_v26  ;;  %vm7480_vm6 = vnez %v7479_v43 }
 0x552   : > { %v6668_v60 = vpack.c.b16 %v2664_v6, %v2663_v37  ;;  %v6670_v11 = vpack.c.b16 %v2662_v35, %v2661_v4  ;;  %vm7481_vm5 = vmpackc.low %vm7478_vm12, %vm7480_vm6  ;;  %vm7488_vm12 = vsmask.f32 4352  ;;  %v4934_v4 = vld [vmem:[#allocation10 + $0x118] sm:$0xff] }
 0x553   : > { %v6676_v58 = vpack.c.b16 %v2666_v17, %v2665_v41  ;;  %3866 = vmatpush.bf16.msra.mxu1 %v4934_v4 }
 0x554   : > { %v2677_v22 = vsel %vm5935_vm0, %v6670_v11, 0  ;;  %v2681_v48 = vsel %vm5943_vm1, %v6670_v11, 0  ;;  %v2682_v12 = vsel %vm5951_vm2, %v6668_v60, 0  ;;  %v2685_v38 = vsel %vm7476_vm3, %v6670_v11, 0 }
 0x555   : > { %v2943_v1 = vshrl.u32 %v2677_v22, 16  ;;  %v2946_v50 = vshll.u32 %v2677_v22, 16  ;;  %v2737_v47 = vrot.slane %v2681_v48, 1  ;;  %v6693_v63 = vrot.slane %v2682_v12, 1 }
 0x556   : > { %v6701_v0 = vsel %vm7481_vm5, %v6668_v60, 0  ;;  %v2749_v46 = vrot.slane %v2685_v38, 4  ;;  %v2702_v53 = vshll.u32 %v6670_v11, 16  ;;  %v2706_v19 = vshrl.u32 %v6670_v11, 16 }
 0x557   : > { %v2945_v18 = vrot.slane %v2943_v1, 3  ;;  %v2948_v15 = vrot.slane %v2946_v50, 4  ;;  %v2738_v27 = vsel %vm7483_vm10, %v7482_v14, %v2737_v47  ;;  %v2740_v24 = vsel %vm7484_vm4, %v2737_v47, %v6693_v63  ;;  %vm7491_vm10 = vmmov %vm7488_vm12 }
 0x558   : > { %v2969_v23 = vshrl.u32 %v2738_v27, 16  ;;  %v2972_v29 = vshll.u32 %v2738_v27, 16  ;;  %v2977_v2 = vshrl.u32 %v2740_v24, 16  ;;  %v2980_v57 = vshll.u32 %v2740_v24, 16  ;;  %vm7494_vm4 = vmmov %vm7491_vm10 }
 0x559   : > { %v6709_v20 = vor.u32 %v2948_v15, %v2945_v18  ;;  %vm7486_vm3 = vcmask 1043456   ;;  %v2751_v36 = vrot.slane %v6701_v0, 4  ;;  %v2704_v42 = vrot.slane %v2702_v53, 1  ;;  %v4946_v0 = vld [vmem:[#allocation10 + $0x178] sm:$0xff] }
 0x55a   : > { %v2750_v39 = vsel %vm7486_vm3, %v7485_v8, %v2749_v46  ;;  %v2971_v62 = vrot.slane %v2969_v23, 3  ;;  %v2974_v49 = vrot.slane %v2972_v29, 4  ;;  %v2979_v55 = vrot.slane %v2977_v2, 3  ;;  %vm7489_vm6 = vmmov %vm7486_vm3  ;;  %v6746_v2 = vld [vmem:[#allocation10 + $0x1f8] sm:$0xff]  ;;  %v7497_v8 = vld [vmem:[#allocation29_spill] sm:$0xff]  ;;  %3891 = vmatpush.bf16.msra.mxu2 %v4946_v0 }
 0x55b   : > { %v2982_v52 = vrot.slane %v2980_v57, 4  ;;  %v2950_v45 = vsel %vm7488_vm12, %v7487_v33, %v6709_v20  ;;  %v2752_v3 = vsel %vm7489_vm6, %v2749_v46, %v2751_v36  ;;  %v2986_v16 = vshrl.u32 %v2750_v39, 16  ;;  %3949 = vmatpush.bf16.msrb.mxu0 %v6746_v2 }
 0x55c   : > { %v2989_v30 = vshll.u32 %v2750_v39, 16  ;;  %3754 = vmatmul.bf16.vlgmr.msrb.gmra.mxu1 %v2950_v45  ;;  %v2975_v40 = vor.u32 %v2974_v49, %v2971_v62  ;;  %v2994_v28 = vshrl.u32 %v2752_v3, 16  ;;  %v2997_v7 = vshll.u32 %v2752_v3, 16  ;;  %v7499_v39 = vld [vmem:[#allocation28_spill] sm:$0xff] }
 0x55d   : > { %v6722_v59 = vor.u32 %v2982_v52, %v2979_v55  ;;  %v2988_v25 = vrot.slane %v2986_v16, 3  ;;  %vm7490_vm5 = vsmask.f32 7424  ;;  %v2708_v21 = vor.u32 %v2706_v19, %v2704_v42 }
 0x55e   : > { %v2991_v54 = vrot.slane %v2989_v30, 4  ;;  %v2705_v5 = vsel %vm7490_vm5, %v7482_v14, %v2704_v42  ;;  %v2996_v37 = vrot.slane %v2994_v28, 3  ;;  %v2999_v6 = vrot.slane %v2997_v7, 4  ;;  %vm7495_vm3 = vmmov %vm7490_vm5 }
 0x55f   : > { %v2984_v35 = vsel %vm7491_vm10, %v2975_v40, %v6722_v59  ;;  %v2710_v32 = vshll.u32 %v6668_v60, 16  ;;  %v2952_v41 = vshrl.u32 %v2705_v5, 16  ;;  %v2955_v17 = vshll.u32 %v2705_v5, 16 }
 0x560   : > { %3812 = vmatmul.bf16.vlgmr.msra.gmra.mxu3 %v2984_v35  ;;  %v2992_v9 = vor.u32 %v2991_v54, %v2988_v25  ;;  %v2678_v48 = vsel %vm6049_vm14, %v6668_v60, 0  ;;  %v2667_v12 = vunpack.c.l.b16 %v6672_v56  ;;  %v6735_v44 = vor.u32 %v2999_v6, %v2996_v37 }
 0x561   : > { %v2712_v10 = vrot.slane %v2710_v32, 1  ;;  %v3080_v38 = vshrl.u32 %v2678_v48, 16  ;;  %v2668_v1 = vunpack.c.l.b16 %v6674_v13  ;;  %v2954_v50 = vrot.slane %v2952_v41, 3  ;;  %v4954_v13 = vld [vmem:[#allocation10 + $0x1b8] sm:$0xff]  ;;  %v4933_v41 = vld [vmem:[#allocation10 + $0x110] sm:$0xff] }
 0x562   : > { %v3083_v47 = vshll.u32 %v2678_v48, 16  ;;  %v2683_v43 = vsel %vm6140_vm9, %v6676_v58, 0  ;;  %v3001_v46 = vsel %vm7494_vm4, %v2992_v9, %v6735_v44  ;;  %v2957_v27 = vrot.slane %v2955_v17, 4  ;;  %3920 = vmatpush.bf16.msrb.mxu3 %v4954_v13  ;;  %3867 = vmatpush.bf16.msra.mxu1 %v4933_v41  ;;  %v4950_v41 = vld [vmem:[#allocation10 + $0x198] sm:$0xff] }
 0x563   : > { %v2713_v56 = vsel %vm7495_vm3, %v2708_v21, %v2712_v10  ;;  %v3082_v18 = vrot.slane %v3080_v38, 3  ;;  %v2741_v15 = vrot.slane %v2683_v43, 1  ;;  %3841 = vmatmul.bf16.vlgmr.msra.gmra.mxu0 %v3001_v46  ;;  %vm7496_vm12 = vcmask 1046528   ;;  %v7507_v38 = vld [vmem:[#allocation31_spill] sm:$0xff] }
 0x564   : > { %v2960_v24 = vshrl.u32 %v2713_v56, 16  ;;  %v2963_v23 = vshll.u32 %v2713_v56, 16  ;;  %v3085_v29 = vrot.slane %v3083_v47, 4  ;;  %vm7498_vm6 = vnez %v7497_v8  ;;  %v4945_v47 = vld [vmem:[#allocation10 + $0x170] sm:$0xff] }
 0x565   : > { %v2742_v57 = vsel %vm7496_vm12, %v6693_v63, %v2741_v15  ;;  %vm7500_vm5 = vnez %v7499_v39  ;;  %v2714_v62 = vshrl.u32 %v6668_v60, 16  ;;  %v2718_v49 = vshll.u32 %v6676_v58, 16  ;;  %v6808_v39 = vld [vmem:[#allocation10 + $0x1e8] sm:$0xff]  ;;  %3892 = vmatpush.bf16.msra.mxu2 %v4945_v47 }
 0x566   : > { %vm7501_vm10 = vmpackc.low %vm7498_vm6, %vm7500_vm5  ;;  %v2962_v55 = vrot.slane %v2960_v24, 3  ;;  %v2965_v52 = vrot.slane %v2963_v23, 4  ;;  %v3089_v61 = vshrl.u32 %v2742_v57, 16  ;;  %v6761_v45 = vor.u32 %v3085_v29, %v3082_v18  ;;  %v7512_v18 = vld [vmem:[#allocation34_spill] sm:$0xff]  ;;  %v4952_v23 = vld [vmem:[#allocation10 + $0x1a8] sm:$0xff] }
 0x567   : > { %v6756_v42 = vsel %vm7501_vm10, %v6676_v58, 0  ;;  %v3092_v63 = vshll.u32 %v2742_v57, 16  ;;  %v2716_v16 = vor.u32 %v2714_v62, %v2712_v10  ;;  %v6766_v30 = vpack.c.b16 %v2668_v1, %v2667_v12  ;;  %v7509_v1 = vld [vmem:[#allocation27_spill] sm:$0xff]  ;;  %v4932_v29 = vld [vmem:[#allocation10 + $0x108] sm:$0xff] }
 0x568   : > { %v2753_v3 = vrot.slane %v6756_v42, 4  ;;  %v2958_v40 = vor.u32 %v2957_v27, %v2954_v50  ;;  %v6768_v28 = vor.u32 %v2965_v52, %v2962_v55  ;;  %v3091_v7 = vrot.slane %v3089_v61, 3  ;;  %v6792_v50 = vld [vmem:[#allocation10 + $0x1f0] sm:$0xff]  ;;  %v4944_v61 = vld [vmem:[#allocation10 + $0x168] sm:$0xff]  ;;  %3868 = vmatpush.bf16.msra.mxu1 %v4932_v29 }
 0x569   : > { %v3094_v25 = vrot.slane %v3092_v63, 4  ;;  %vm7502_vm4 = vcmask 1043456   ;;  %v2720_v5 = vrot.slane %v2718_v49, 1  ;;  %vm7503_vm3 = vsmask.f32 4352  ;;  %v7514_v27 = vld [vmem:[#allocation33_spill] sm:$0xff]  ;;  %3950 = vmatpush.bf16.msrb.mxu0 %v6792_v50  ;;  %3893 = vmatpush.bf16.msra.mxu2 %v4944_v61 }
 0x56a   : > { %v2754_v54 = vsel %vm7502_vm4, %v2751_v36, %v2753_v3  ;;  %v2967_v21 = vsel %vm7503_vm3, %v2958_v40, %v6768_v28  ;;  %vm7504_vm12 = vmmov %vm7503_vm3  ;;  %vm7505_vm6 = vsmask.f32 7424  ;;  %v4953_v36 = vld [vmem:[#allocation10 + $0x1b0] sm:$0xff]  ;;  %v2679_v10 = vsel %vm6176_vm7, %v6676_v58, 0  ;;  %v7523_v47 = vld [vmem:[#allocation36_spill] sm:$0xff] }
 0x56b   : > { %v3098_v4 = vshrl.u32 %v2754_v54, 16  ;;  %v3101_v35 = vshll.u32 %v2754_v54, 16  ;;  %3783 = vmatmul.bf16.vlgmr.msrb.gmra.mxu2 %v2967_v21  ;;  %v3087_v37 = vsel %vm7504_vm12, %v6709_v20, %v6761_v45  ;;  %v6780_v6 = vor.u32 %v3094_v25, %v3091_v7  ;;  %3921 = vmatpush.bf16.msrb.mxu3 %v4953_v36  ;;  %v6818_v21 = vld [vmem:[#allocation10 + $0x1e0] sm:$0xff]  ;;  %v4949_v29 = vld [vmem:[#allocation10 + $0x190] sm:$0xff] }
 0x56c   : > { %v2721_v9 = vsel %vm7505_vm6, %v2716_v16, %v2720_v5  ;;  %vm7508_vm5 = vnez %v7507_v38  ;;  %vm7510_vm10 = vnez %v7509_v1  ;;  %3759 = vmatmul.bf16.gmra.mxu1 %v3087_v37  ;;  %vm7513_vm3 = vnez %v7512_v18  ;;  %v4941_v61 = vld [vmem:[#allocation10 + $0x150] sm:$0xff] }
 0x56d   : > { %v3100_v17 = vrot.slane %v3098_v4, 3  ;;  %v3103_v48 = vrot.slane %v3101_v35, 4  ;;  %vm7511_vm4 = vmpackc.low %vm7508_vm5, %vm7510_vm10  ;;  %v3054_v43 = vshrl.u32 %v2721_v9, 16  ;;  %v3057_v46 = vshll.u32 %v2721_v9, 16  ;;  %3951 = vmatpush.bf16.msrb.mxu0 %v6808_v39  ;;  %v4943_v9 = vld [vmem:[#allocation10 + $0x160] sm:$0xff] }
 0x56e   : > { %v2684_v20 = vsel %vm7511_vm4, %v6766_v30, 0  ;;  %vm7515_vm12 = vnez %v7514_v27  ;;  %vm7517_vm5 = vsmask.f32 4352  ;;  %v3152_v8 = vshrl.u32 %v2679_v10, 16  ;;  %3894 = vmatpush.bf16.msra.mxu2 %v4943_v9 }
 0x56f   : > { %v6794_v56 = vrot.slane %v2684_v20, 1  ;;  %vm7516_vm6 = vmpackc.low %vm7513_vm3, %vm7515_vm12  ;;  %v3096_v13 = vsel %vm7517_vm5, %v6722_v59, %v6780_v6  ;;  %v6805_v57 = vor.u32 %v3103_v48, %v3100_v17  ;;  %v3155_v42 = vshll.u32 %v2679_v10, 16  ;;  %3922 = vmatpush.bf16.msrb.mxu3 %v4952_v23  ;;  %v4951_v59 = vld [vmem:[#allocation10 + $0x1a0] sm:$0xff] }
 0x570   : > { %v2688_v24 = vsel %vm7516_vm6, %v6766_v30, 0  ;;  %3817 = vmatmul.bf16.gmra.mxu3 %v3096_v13  ;;  %vm7518_vm10 = vcmask 1046528   ;;  %v3056_v63 = vrot.slane %v3054_v43, 3  ;;  %v3059_v16 = vrot.slane %v3057_v46, 4  ;;  %vm7519_vm4 = vmmov %vm7517_vm5  ;;  %v7525_v43 = vld [vmem:[#allocation35_spill] sm:$0xff] }
 0x571   : > { %v2744_v55 = vsel %vm7518_vm10, %v2741_v15, %v6794_v56  ;;  %v6812_v52 = vrot.slane %v2688_v24, 4  ;;  %v3105_v40 = vsel %vm7519_vm4, %v6735_v44, %v6805_v57  ;;  %v3154_v7 = vrot.slane %v3152_v8, 3  ;;  %3952 = vmatpush.bf16.msrb.mxu0 %v6818_v21  ;;  %vm7521_vm12 = vmmov %vm7519_vm4  ;;  %v4931_v23 = vld [vmem:[#allocation10 + $0x100] sm:$0xff]  ;;  %v6854_v8 = vld [vmem:[#allocation10 + $0x1d0] sm:$0xff] }
 0x572   : > { %v3161_v25 = vshrl.u32 %v2744_v55, 16  ;;  %v3164_v54 = vshll.u32 %v2744_v55, 16  ;;  %v3157_v15 = vrot.slane %v3155_v42, 4  ;;  %vm7520_vm3 = vcmask 1043456   ;;  %3869 = vmatpush.bf16.msra.mxu1 %v4931_v23 }
 0x573   : > { %3846 = vmatmul.bf16.gmra.mxu0 %v3105_v40  ;;  %v2756_v4 = vsel %vm7520_vm3, %v2753_v3, %v6812_v52  ;;  %v2722_v35 = vshrl.u32 %v6676_v58, 16  ;;  %v2726_v37 = vshll.u32 %v6766_v30, 16  ;;  %v6824_v0 = vor.u32 %v3059_v16, %v3056_v63  ;;  %3923 = vmatpush.bf16.msrb.mxu3 %v4951_v59  ;;  %v6829_v3 = vld [vmem:[#allocation10 + $0x1d8] sm:$0xff]  ;;  %vm7528_vm3 = vmmov %vm7521_vm12  ;;  %v4948_v59 = vld [vmem:[#allocation10 + $0x188] sm:$0xff] }
 0x574   : > { %v3163_v36 = vrot.slane %v3161_v25, 3  ;;  %v3166_v17 = vrot.slane %v3164_v54, 4  ;;  %v3170_v48 = vshrl.u32 %v2756_v4, 16  ;;  %v3173_v10 = vshll.u32 %v2756_v4, 16  ;;  %v4970_v40 = vld [vmem:[#allocation10 + $0x238] sm:$0xff] }
 0x575   : > { %v2724_v44 = vor.u32 %v2722_v35, %v2720_v5  ;;  %v6831_v38 = vor.u32 %v3157_v15, %v3154_v7  ;;  %v2728_v1 = vrot.slane %v2726_v37, 1  ;;  %v6838_v5 = vsel %vm7521_vm12, %v6768_v28, %v6824_v0  ;;  %3953 = vmatpush.bf16.msrb.mxu0 %v6829_v3  ;;  %v4942_v28 = vld [vmem:[#allocation10 + $0x158] sm:$0xff]  ;;  %vm7529_vm12 = vmmov %vm7528_vm3  ;;  %v6862_v15 = vld [vmem:[#allocation10 + $0x1c8] sm:$0xff] }
 0x576   : > { %vm7522_vm6 = vsmask.f32 7424  ;;  %vm7524_vm5 = vnez %v7523_v47  ;;  %vm7526_vm10 = vnez %v7525_v43  ;;  %v6848_v18 = vor.u32 %v3166_v17, %v3163_v36  ;;  %3895 = vmatpush.bf16.msra.mxu2 %v4942_v28  ;;  %3978 = vmatpush.bf16.msrb.mxu1 %v4970_v40 }
 0x577   : > { %v2729_v20 = vsel %vm7522_vm6, %v2724_v44, %v2728_v1  ;;  %vm7527_vm4 = vmpackc.low %vm7524_vm5, %vm7526_vm10  ;;  %3924 = vmatpush.bf16.msrb.mxu3 %v4950_v41  ;;  %v3172_v27 = vrot.slane %v3170_v48, 3  ;;  %v3175_v24 = vrot.slane %v3173_v10, 4  ;;  %v3159_v13 = vsel %vm7528_vm3, %v6761_v45, %v6831_v38 }
 0x578   : > { %v2680_v46 = vsel %vm7527_vm4, %v6766_v30, 0  ;;  %v3134_v42 = vshrl.u32 %v2729_v20, 16  ;;  %v3137_v63 = vshll.u32 %v2729_v20, 16  ;;  %v3168_v7 = vsel %vm7529_vm12, %v6780_v6, %v6848_v18  ;;  %v4947_v20 = vld [vmem:[#allocation10 + $0x180] sm:$0xff]  ;;  %vm7530_vm6 = vmmov %vm7528_vm3 }
 0x579   : > { %v3224_v55 = vshrl.u32 %v2680_v46, 16  ;;  %v3227_v16 = vshll.u32 %v2680_v46, 16  ;;  %v3176_v25 = vor.u32 %v3175_v24, %v3172_v27  ;;  %v3242_v45 = vshrl.u32 %v6794_v56, 16  ;;  %3954 = vmatpush.bf16.msrb.mxu0 %v6854_v8  ;;  %v6878_v46 = vld [vmem:[#allocation10 + $0x1c0] sm:$0xff]  ;;  %vm7533_vm5 = vmpackc.low %vm6378_vm15, %vm6373_vm8 }
 0x57a   : > { %v3245_v54 = vshll.u32 %v6794_v56, 16  ;;  %v3251_v4 = vshrl.u32 %v6812_v52, 16  ;;  %v3254_v9 = vshll.u32 %v6812_v52, 16  ;;  %v2761_v44 = vrot.slane %v2710_v32, 5  ;;  %3896 = vmatpush.bf16.msra.mxu2 %v4941_v61  ;;  %v4940_v56 = vld [vmem:[#allocation10 + $0x148] sm:$0xff]  ;;  %vm7534_vm10 = vmmov %vm7528_vm3 }
 0x57b   : > { %3788 = vmatmul.bf16.gmra.mxu2 %v6838_v5  ;;  %3925 = vmatpush.bf16.msrb.mxu3 %v4949_v29  ;;  %v2760_v6 = vrot.slane %v2714_v62, 4  ;;  %v3136_v41 = vrot.slane %v3134_v42, 3  ;;  %v3226_v36 = vrot.slane %v3224_v55, 3  ;;  %v3139_v17 = vrot.slane %v3137_v63, 4  ;;  %vm7536_vm15 = vmmov %vm7528_vm3  ;;  %v7544_v42 = vld [vmem:[#allocation43_spill] sm:$0xff] }
 0x57c   : > { %3764 = vmatmul.bf16.gmra.mxu1 %v3159_v13  ;;  %v2730_v48 = vshrl.u32 %v6766_v30, 16  ;;  %v2757_v10 = vrot.slane %v2706_v19, 4  ;;  %v2758_v52 = vrot.slane %v2702_v53, 5  ;;  %v3177_v32 = vsel %vm7530_vm6, %v6805_v57, %v3176_v25  ;;  %v4939_v53 = vld [vmem:[#allocation10 + $0x140] sm:$0xff]  ;;  %vm7537_vm8 = vmmov %vm7528_vm3 }
 0x57d   : > { %v3229_v47 = vrot.slane %v3227_v16, 4  ;;  %v3244_v62 = vrot.slane %v3242_v45, 3  ;;  %v3247_v43 = vrot.slane %v3245_v54, 4  ;;  %3955 = vmatpush.bf16.msrb.mxu0 %v6862_v15  ;;  %v3253_v27 = vrot.slane %v3251_v4, 3 }
 0x57e   : > { %v3256_v24 = vrot.slane %v3254_v9, 4  ;;  %v6882_v19 = vor.u32 %v2730_v48, %v2728_v1  ;;  %3897 = vmatpush.bf16.msra.mxu2 %v4940_v56  ;;  %v6884_v28 = vor.u32 %v3139_v17, %v3136_v41  ;;  %v2759_v23 = vor.u32 %v2758_v52, %v2757_v10  ;;  %v4969_v9 = vld [vmem:[#allocation10 + $0x230] sm:$0xff]  ;;  %v4968_v52 = vld [vmem:[#allocation10 + $0x228] sm:$0xff] }
 0x57f   : > { %3926 = vmatpush.bf16.msrb.mxu3 %v4948_v59  ;;  %v6886_v57 = vor.u32 %v2761_v44, %v2760_v6  ;;  %v3230_v29 = vor.u32 %v3229_v47, %v3226_v36  ;;  %v3248_v13 = vor.u32 %v3247_v43, %v3244_v62  ;;  %v2693_v1 = vsel %vm7533_vm5, %v6670_v11, 0  ;;  %3979 = vmatpush.bf16.msrb.mxu1 %v4969_v9 }
 0x580   : > { %3822 = vmatmul.bf16.gmra.mxu3 %v3168_v7  ;;  %v3257_v61 = vor.u32 %v3256_v24, %v3253_v27  ;;  %v3233_v63 = vshrl.u32 %v6882_v19, 16  ;;  %v3236_v16 = vshll.u32 %v6882_v19, 16  ;;  %v6901_v59 = vsel %vm7534_vm10, %v6824_v0, %v6884_v28 }
 0x581   : > { %3956 = vmatpush.bf16.msrb.mxu0 %v6878_v46  ;;  %vm7535_vm4 = vsmask.f32 3328  ;;  %v3037_v7 = vshrl.u32 %v2693_v1, 16  ;;  %v3249_v45 = vsel %vm7537_vm8, %v6848_v18, %v3248_v13  ;;  %v3003_v54 = vshrl.u32 %v2759_v23, 16  ;;  %v7539_v18 = vld [vmem:[#allocation39_spill] sm:$0xff]  ;;  %v7542_v13 = vld [vmem:[#allocation44_spill] sm:$0xff] }
 0x582   : > { %3898 = vmatpush.bf16.msra.mxu2 %v4939_v53  ;;  %v2763_v40 = vsel %vm7535_vm4, %v2759_v23, %v6886_v57  ;;  %v3040_v4 = vshll.u32 %v2693_v1, 16  ;;  %v3258_v0 = vsel %vm7528_vm3, %v3176_v25, %v3257_v61  ;;  %v3235_v44 = vrot.slane %v3233_v63, 3  ;;  %v7547_v1 = vld [vmem:[#allocation38_spill] sm:$0xff]  ;;  %v7549_v61 = vld [vmem:[#allocation37_spill] sm:$0xff] }
 0x583   : > { %3851 = vmatmul.bf16.gmra.mxu0 %v3177_v32  ;;  %3927 = vmatpush.bf16.msrb.mxu3 %v4947_v20  ;;  %v3006_v6 = vshll.u32 %v2759_v23, 16  ;;  %v2694_v41 = vsel %vm5935_vm0, %v6668_v60, 0  ;;  %v3238_v36 = vrot.slane %v3236_v16, 4  ;;  %v3011_v56 = vshrl.u32 %v2763_v40, 16 }
 0x584   : > { %vm7540_vm12 = vnez %v7539_v18  ;;  %v3014_v25 = vshll.u32 %v2763_v40, 16  ;;  %v3039_v10 = vrot.slane %v3037_v7, 3  ;;  %v3005_v32 = vrot.slane %v3003_v54, 3  ;;  %3980 = vmatpush.bf16.msrb.mxu1 %v4968_v52 }
 0x585   : > { %vm7541_vm6 = vmpackc.low %vm6362_vm13, %vm7540_vm12  ;;  %v3042_v47 = vrot.slane %v3040_v4, 4  ;;  %v3045_v62 = vshrl.u32 %v2694_v41, 16  ;;  %v3048_v43 = vshll.u32 %v2694_v41, 16  ;;  %v3008_v27 = vrot.slane %v3006_v6, 4 }
 0x586   : > { %v2690_v17 = vsel %vm7541_vm6, %v6668_v60, 0  ;;  %v2764_v22 = vrot.slane %v2722_v35, 4  ;;  %vm7545_vm0 = vnez %v7544_v42  ;;  %vm7548_vm5 = vnez %v7547_v1 }
 0x587   : > { %4973 = vmatpush.bf16.msra.mxu3 %v6746_v2  ;;  %v3231_v2 = vsel %vm7536_vm15, %v6831_v38, %v3230_v29  ;;  %v2777_v24 = vrot.slane %v2690_v17, 5  ;;  %v2765_v29 = vrot.slane %v2718_v49, 5  ;;  %vm7550_vm10 = vnez %v7549_v61 }
 0x588   : > { %vm7551_vm4 = vmpackc.low %vm7548_vm5, %vm7550_vm10  ;;  %v3013_v40 = vrot.slane %v3011_v56, 3  ;;  %v3016_v7 = vrot.slane %v3014_v25, 4  ;;  %v3239_v6 = vor.u32 %v3238_v36, %v3235_v44  ;;  %v7553_v56 = vld [vmem:[#allocation46_spill] sm:$0xff]  ;;  %v7555_v25 = vld [vmem:[#allocation45_spill] sm:$0xff]  ;;  %v3043_v44 = vor.u32 %v3042_v47, %v3039_v10 }
 0x589   : > { %v2689_v35 = vsel %vm7551_vm4, %v6670_v11, 0  ;;  %v6948_v38 = vor.u32 %v2765_v29, %v2764_v22  ;;  %vm7554_vm15 = vnez %v7553_v56  ;;  %vm7556_vm8 = vnez %v7555_v25 }
 0x58a   : > { %v2776_v41 = vrot.slane %v2689_v35, 5  ;;  %vm7557_vm3 = vmpackc.low %vm7554_vm15, %vm7556_vm8  ;;  %v6958_v52 = vor.u32 %v3016_v7, %v3013_v40  ;;  %vm7558_vm12 = vsmask.f32 4352  ;;  %v2698_v61 = vsel %vm5943_vm1, %v6668_v60, 0 }
 0x58b   : > { %3793 = vmatmul.bf16.gmra.mxu2 %v6901_v59  ;;  %4974 = vmatpush.bf16.msra.mxu3 %v6792_v50  ;;  %v2695_v50 = vsel %vm6049_vm14, %v6676_v58, 0  ;;  %vm7543_vm14 = vnez %v7542_v13  ;;  %vm7564_vm10 = vmmov %vm7558_vm12  ;;  %v2700_v51 = vsel %vm6140_vm9, %v6766_v30, 0 }
 0x58c   : > { %3769 = vmatmul.bf16.gmra.mxu1 %v3231_v2  ;;  %v3125_v31 = vshrl.u32 %v2695_v50, 16  ;;  %v3128_v20 = vshll.u32 %v2695_v50, 16  ;;  %vm7546_vm13 = vmpackc.low %vm7543_vm14, %vm7545_vm0  ;;  %v3047_v2 = vrot.slane %v3045_v62, 3  ;;  %vm7561_vm0 = vsmask.f32 3328 }
 0x58d   : > { %v2691_v55 = vsel %vm7546_vm13, %v6676_v58, 0  ;;  %vm7560_vm14 = vmmov %vm7558_vm12  ;;  %v3020_v47 = vshrl.u32 %v2776_v41, 16 }
 0x58e   : > { %v3127_v53 = vrot.slane %v3125_v31, 3  ;;  %v3130_v23 = vrot.slane %v3128_v20, 4  ;;  %v2779_v49 = vrot.slane %v2691_v55, 5  ;;  %vm7562_vm13 = vmmov %vm7558_vm12 }
 0x58f   : > { %4975 = vmatpush.bf16.msra.mxu3 %v6808_v39  ;;  %v2696_v39 = vsel %vm6176_vm7, %v6766_v30, 0  ;;  %vm7552_vm7 = vcmask 1042432   ;;  %v3022_v40 = vrot.slane %v3020_v47, 3  ;;  %vm7567_vm1 = vmmov %vm7564_vm10 }
 0x590   : > { %3827 = vmatmul.bf16.gmra.mxu3 %v3249_v45  ;;  %v3197_v63 = vshrl.u32 %v2696_v39, 16  ;;  %v3200_v16 = vshll.u32 %v2696_v39, 16  ;;  %v3050_v45 = vrot.slane %v3048_v43, 4  ;;  %v6945_v12 = vor.u32 %v3130_v23, %v3127_v53  ;;  %vm7559_vm6 = vmmov %vm7552_vm7  ;;  %v4967_v23 = vld [vmem:[#allocation10 + $0x220] sm:$0xff]  ;;  %v7565_v39 = vld [vmem:[#allocation49_spill] sm:$0xff] }
 0x591   : > { %v2780_v54 = vsel %vm7552_vm7, %v2777_v24, %v2779_v49  ;;  %v2778_v20 = vsel %vm7559_vm6, %v2776_v41, %v2777_v24  ;;  %v3240_v43 = vsel %vm7560_vm14, %v6884_v28, %v3239_v6  ;;  %v3023_v53 = vshll.u32 %v2776_v41, 16  ;;  %vm7563_vm5 = vmmov %vm7559_vm6  ;;  %3981 = vmatpush.bf16.msrb.mxu1 %v4967_v23 }
 0x592   : > { %v3199_v4 = vrot.slane %v3197_v63, 3  ;;  %v3202_v9 = vrot.slane %v3200_v16, 4  ;;  %v3116_v18 = vshrl.u32 %v2780_v54, 16  ;;  %v3119_v17 = vshll.u32 %v2780_v54, 16  ;;  %vm7566_vm4 = vmmov %vm7563_vm5 }
 0x593   : > { %4976 = vmatpush.bf16.msra.mxu3 %v6818_v21  ;;  %3856 = vmatmul.bf16.gmra.mxu0 %v3258_v0  ;;  %v2692_v21 = vsel %vm7557_vm3, %v6766_v30, 0  ;;  %v3009_v0 = vor.u32 %v3008_v27, %v3005_v32  ;;  %v6961_v36 = vor.u32 %v3050_v45, %v3047_v2  ;;  %v2767_v32 = vsel %vm7561_vm0, %v6886_v57, %v6948_v38  ;;  %vm7569_vm9 = vmmov %vm7567_vm1 }
 0x594   : > { %v6950_v50 = vor.u32 %v3202_v9, %v3199_v4  ;;  %v2781_v62 = vrot.slane %v2692_v21, 5  ;;  %v3118_v27 = vrot.slane %v3116_v18, 3  ;;  %v3028_v29 = vshrl.u32 %v2778_v20, 16  ;;  %vm7572_vm8 = vmmov %vm7567_vm1 }
 0x595   : > { %v3018_v10 = vsel %vm7562_vm13, %v3009_v0, %v6958_v52  ;;  %v3052_v24 = vsel %vm7564_vm10, %v3043_v44, %v6961_v36  ;;  %v3031_v57 = vshll.u32 %v2778_v20, 16  ;;  %v3107_v55 = vshrl.u32 %v2767_v32, 16  ;;  %vm7573_vm3 = vmmov %vm7567_vm1 }
 0x596   : > { %v6966_v31 = vsel %vm7558_vm12, %v6945_v12, %v6950_v50  ;;  %v2782_v22 = vsel %vm7563_vm5, %v2779_v49, %v2781_v62  ;;  %v2783_v1 = vsel %vm7566_vm4, %v2781_v62, %v7565_v39  ;;  %v3110_v7 = vshll.u32 %v2767_v32, 16  ;;  %vm7574_vm12 = vmmov %vm7561_vm0 }
 0x597   : > { %4977 = vmatpush.bf16.msra.mxu3 %v6829_v3  ;;  %v3121_v3 = vrot.slane %v3119_v17, 4  ;;  %v3188_v13 = vshrl.u32 %v2782_v22, 16  ;;  %v3191_v42 = vshll.u32 %v2782_v22, 16  ;;  %v3269_v16 = vshrl.u32 %v2783_v1, 16  ;;  %vm7575_vm6 = vmmov %vm7567_vm1 }
 0x598   : > { %v3272_v2 = vshll.u32 %v2783_v1, 16  ;;  %v2699_v45 = vsel %vm5951_vm2, %v6676_v58, 0  ;;  %v3025_v54 = vrot.slane %v3023_v53, 4  ;;  %v6991_v4 = vrot.slane %v2698_v61, 1  ;;  %vm7576_vm14 = vmmov %vm7567_vm1 }
 0x599   : > { %v6985_v35 = vor.u32 %v3121_v3, %v3118_v27  ;;  %v3190_v49 = vrot.slane %v3188_v13, 3  ;;  %v3193_v63 = vrot.slane %v3191_v42, 4  ;;  %v3271_v60 = vrot.slane %v3269_v16, 3  ;;  %vm7577_vm0 = vmmov %vm7567_vm1 }
 0x59a   : > { %v3030_v9 = vrot.slane %v3028_v29, 3  ;;  %v3033_v6 = vrot.slane %v3031_v57, 4  ;;  %v3274_v41 = vrot.slane %v3272_v2, 4  ;;  %v2792_v18 = vrot.slane %v2699_v45, 1  ;;  %v4965_v57 = vld [vmem:[#allocation10 + $0x210] sm:$0xff]  ;;  %vm7579_vm5 = vmmov %vm7577_vm0 }
 0x59b   : > { %3798 = vmatmul.bf16.gmra.mxu2 %v3240_v43  ;;  %4978 = vmatpush.bf16.msra.mxu3 %v6854_v8  ;;  %v4966_v8 = vld [vmem:[#allocation10 + $0x218] sm:$0xff]  ;;  %v3194_v34 = vor.u32 %v3193_v63, %v3190_v49  ;;  %v3109_v17 = vrot.slane %v3107_v55, 3  ;;  %v3112_v58 = vrot.slane %v3110_v7, 4  ;;  %vm7568_vm2 = vcmask 1046528   ;;  %v4964_v49 = vld [vmem:[#allocation10 + $0x208] sm:$0xff]  ;;  %vm7580_vm10 = vmmov %vm7577_vm0 }
 0x59c   : > { %3870 = vmatmul.bf16.vlgmr.msra.gmra.mxu1 %v3018_v10  ;;  %v3275_v25 = vor.u32 %v3274_v41, %v3271_v60  ;;  %v2793_v21 = vsel %vm7568_vm2, %v6991_v4, %v2792_v18  ;;  %v2769_v0 = vrot.slane %v2726_v37, 5  ;;  %v2794_v62 = vrot.slane %v2700_v51, 1  ;;  %vm7570_vm7 = vmmov %vm7568_vm2  ;;  %v7583_v51 = vld [vmem:[#allocation47_spill] sm:$0xff] }
 0x59d   : > { %3982 = vmatpush.bf16.msrb.mxu1 %v4966_v8  ;;  %v6995_v56 = vsel %vm7567_vm1, %v6985_v35, %v3194_v34  ;;  %v3071_v44 = vshrl.u32 %v2793_v21, 16  ;;  %v3074_v20 = vshll.u32 %v2793_v21, 16  ;;  %v3026_v26 = vor.u32 %v3025_v54, %v3022_v40  ;;  %vm7571_vm15 = vmmov %vm7568_vm2 }
 0x59e   : > { %v3034_v43 = vor.u32 %v3033_v6, %v3030_v9  ;;  %v7009_v32 = vsel %vm7569_vm9, %v3194_v34, %v3275_v25  ;;  %v2796_v3 = vsel %vm7571_vm15, %v2794_v62, %v7482_v14  ;;  %v3113_v30 = vor.u32 %v3112_v58, %v3109_v17  ;;  %v4963_v9 = vld [vmem:[#allocation10 + $0x200] sm:$0xff]  ;;  %vm7581_vm4 = vmmov %vm7577_vm0 }
 0x59f   : > { %4979 = vmatpush.bf16.msra.mxu3 %v6862_v15  ;;  %v2768_v15 = vrot.slane %v2730_v48, 4  ;;  %v3073_v48 = vrot.slane %v3071_v44, 3  ;;  %v3076_v27 = vrot.slane %v3074_v20, 4  ;;  %v3215_v47 = vshrl.u32 %v2796_v3, 16  ;;  %vm7586_vm9 = vmmov %vm7577_vm0 }
 0x5a0   : > { %3928 = vmatmul.bf16.vlgmr.msrb.gmra.mxu3 %v3052_v24  ;;  %v3218_v53 = vshll.u32 %v2796_v3, 16  ;;  %v3035_v13 = vsel %vm7572_vm8, %v3026_v26, %v3034_v43  ;;  %v3114_v39 = vsel %vm7573_vm3, %v6958_v52, %v3113_v30  ;;  %v3132_v16 = vsel %vm7577_vm0, %v6961_v36, %v6945_v12  ;;  %vm7587_vm15 = vmmov %vm7577_vm0 }
 0x5a1   : > { %v2770_v37 = vor.u32 %v2769_v0, %v2768_v15  ;;  %v3077_v23 = vor.u32 %v3076_v27, %v3073_v48  ;;  %v3217_v29 = vrot.slane %v3215_v47, 3  ;;  %3983 = vmatpush.bf16.msrb.mxu1 %v4965_v57  ;;  %vm7578_vm13 = vsmask.f32 7424  ;;  %vm7590_vm8 = vmmov %vm7577_vm0 }
 0x5a2   : > { %v3220_v42 = vrot.slane %v3218_v53, 4  ;;  %v2784_v2 = vsel %vm7578_vm13, %v6882_v19, %v7482_v14  ;;  %v3123_v60 = vsel %vm7579_vm5, %v3034_v43, %v6985_v35  ;;  %vm7584_vm1 = vnez %v7583_v51  ;;  %v7589_v43 = vld [vmem:[#allocation50_spill] sm:$0xff]  ;;  %vm7591_vm3 = vmmov %vm7577_vm0 }
 0x5a3   : > { %4980 = vmatpush.bf16.msra.mxu3 %v6878_v46  ;;  %3957 = vmatmul.bf16.vlgmr.msrb.gmra.mxu0 %v6838_v5  ;;  %v2795_v46 = vsel %vm7570_vm7, %v2792_v18, %v2794_v62  ;;  %v2771_v61 = vsel %vm7574_vm12, %v6948_v38, %v2770_v37  ;;  %v3206_v45 = vshrl.u32 %v2784_v2, 16  ;;  %v3209_v54 = vshll.u32 %v2784_v2, 16  ;;  %vm7585_vm2 = vmpackc.low %vm6540_vm11, %vm7584_vm1 }
 0x5a4   : > { %v3143_v10 = vshrl.u32 %v2795_v46, 16  ;;  %v3146_v5 = vshll.u32 %v2795_v46, 16  ;;  %v7017_v1 = vor.u32 %v3220_v42, %v3217_v29  ;;  %v3179_v52 = vshrl.u32 %v2771_v61, 16  ;;  %vm7588_vm11 = vmmov %vm7577_vm0 }
 0x5a5   : > { %v3182_v40 = vshll.u32 %v2771_v61, 16  ;;  %3984 = vmatpush.bf16.msrb.mxu1 %v4964_v49  ;;  %v3208_v12 = vrot.slane %v3206_v45, 3  ;;  %v3211_v36 = vrot.slane %v3209_v54, 4  ;;  %v3260_v41 = vshrl.u32 %v2770_v37, 16 }
 0x5a6   : > { %v3145_v22 = vrot.slane %v3143_v10, 3  ;;  %v3148_v24 = vrot.slane %v3146_v5, 4  ;;  %v3181_v7 = vrot.slane %v3179_v52, 3  ;;  %v3263_v18 = vshll.u32 %v2770_v37, 16 }
 0x5a7   : > { %v3184_v38 = vrot.slane %v3182_v40, 4  ;;  %v3262_v19 = vrot.slane %v3260_v41, 3  ;;  %v2697_v58 = vsel %vm7585_vm2, %v6670_v11, 0  ;;  %v3277_v21 = vsel %vm7587_vm15, %v6950_v50, %v7487_v33  ;;  %v5115_v33 = vld [vmem:[%s7160_s5] sm:$0xff] }
 0x5a8   : > { %v3149_v55 = vor.u32 %v3148_v24, %v3145_v22  ;;  %v3265_v17 = vrot.slane %v3263_v18, 4  ;;  %v2789_v25 = vrot.slane %v2697_v58, 1  ;;  %v2941_v50 = vperm.slane %v5115_v33, 6 }
 0x5a9   : > { %v3185_v34 = vor.u32 %v3184_v38, %v3181_v7  ;;  %3985 = vmatpush.bf16.msrb.mxu1 %v4963_v9  ;;  %v3279_v45 = vsel %vm7591_vm3, %v7017_v1, %v7589_v43 }
 0x5aa   : > { %v3150_v8 = vsel %vm7575_vm6, %v3077_v23, %v3149_v55  ;;  %v7024_v63 = vsel %vm7576_vm14, %v3149_v55, %v7017_v1  ;;  %v3266_v15 = vor.u32 %v3265_v17, %v3262_v19 }
 0x5ab   : > { %3899 = vmatmul.bf16.vlgmr.msra.gmra.mxu2 %v3035_v13  ;;  %v3186_v6 = vsel %vm7580_vm10, %v3113_v30, %v3185_v34 }
 0x5ac   : > { %3875 = vmatmul.bf16.gmra.mxu1 %v3114_v39 }
 0x5b0   : > { %3933 = vmatmul.bf16.gmra.mxu3 %v3132_v16 }
 0x5b3   : > { %3962 = vmatmul.bf16.gmra.mxu0 %v6901_v59  ;;  %v3212_v59 = vor.u32 %v3211_v36, %v3208_v12 }
 0x5b5   : > { %v3213_v14 = vsel %vm7581_vm4, %v6884_v28, %v3212_v59  ;;  %v2791_v28 = vsel %vm7570_vm7, %v2789_v25, %v6991_v4  ;;  %v3278_v48 = vsel %vm7590_vm8, %v3212_v59, %v7589_v43 }
 0x5b6   : > { %v3063_v0 = vshrl.u32 %v2791_v28, 16  ;;  %v3066_v44 = vshll.u32 %v2791_v28, 16 }
 0x5b8   : > { %v3065_v20 = vrot.slane %v3063_v0, 3  ;;  %v3068_v62 = vrot.slane %v3066_v44, 4 }
 0x5ba   : > { %v3069_v11 = vor.u32 %v3068_v62, %v3065_v20 }
 0x5bb   : > { %3904 = vmatmul.bf16.gmra.mxu2 %v3123_v60 }
 0x5bc   : > { %3880 = vmatmul.bf16.gmra.mxu1 %v3186_v6 }
 0x5c0   : > { %3938 = vmatmul.bf16.gmra.mxu3 %v6966_v31  ;;  %v3267_v31 = vsel %vm7586_vm9, %v3185_v34, %v3266_v15 }
 0x5c3   : > { %3967 = vmatmul.bf16.gmra.mxu0 %v3213_v14 }
 0x5cb   : > { %3909 = vmatmul.bf16.gmra.mxu2 %v6995_v56  ;;  %v3078_v56 = vsel %vm7588_vm11, %v3069_v11, %v3077_v23 }
 0x5cc   : > { %3885 = vmatmul.bf16.gmra.mxu1 %v3267_v31 }
 0x5d0   : > { %3943 = vmatmul.bf16.gmra.mxu3 %v3277_v21 }
 0x5d9   : > { %v3755_v26 = vpop.f32.mrf.mxu1 }
 0x5da   : > { %v3756_v10 = vadd.f32 %v3755_v26, %v2941_v50 }
 0x5db   : > { %3914 = vmatmul.bf16.gmra.mxu2 %v7009_v32 }
 0x5dc   : > { %3986 = vmatmul.bf16.vlgmr.msrb.gmra.mxu1 %v3078_v56 }
 0x5e0   : > { %3972 = vmatmul.bf16.vlgmr.msra.gmra.mxu3 %v3278_v48  ;;  %v3842_v42 = vpop.f32.mrf.mxu0 }
 0x5e1   : > { %v3757_v4 = vpop.f32.mrf.mxu1 }
 0x5e2   : > { %v3758_v37 = vadd.f32 %v3757_v4, %v2941_v50 }
 0x5e3   : > { %v3813_v27 = vpop.f32.mrf.mxu3 }
 0x5e8   : > { %v3844_v40 = vpop.f32.mrf.mxu0 }
 0x5e9   : > { %v3760_v46 = vpop.f32.mrf.mxu1 }
 0x5ea   : > { %v3761_v13 = vadd.f32 %v3760_v46, %v2941_v50 }
 0x5eb   : > { %v3815_v3 = vpop.f32.mrf.mxu3 }
 0x5ec   : > { %3991 = vmatmul.bf16.gmra.mxu1 %v3150_v8 }
 0x5ee   : > { %v3784_v5 = vpop.f32.mrf.mxu2 }
 0x5ef   : > { %v3785_v32 = vadd.f32 %v3784_v5, %v3756_v10 }
 0x5f0   : > { %v3847_v12 = vpop.f32.mrf.mxu0 }
 0x5f1   : > { %v7059_v47 = vadd.f32 %v3813_v27, %v3785_v32  ;;  %v3762_v30 = vpop.f32.mrf.mxu1 }
 0x5f2   : > { %v3763_v49 = vadd.f32 %v3762_v30, %v2941_v50 }
 0x5f3   : > { %v3818_v23 = vpop.f32.mrf.mxu3  ;;  %v3843_v10 = vadd.f32 %v3842_v42, %v7059_v47  ;;  %v4007_v42 = vld [vmem:[%s5527_s26] sm:$0xff] }
 0x5f6   : > { %v3786_v53 = vpop.f32.mrf.mxu2 }
 0x5f7   : > { %v3787_v22 = vadd.f32 %v3786_v53, %v3758_v37 }
 0x5f8   : > { %v3849_v19 = vpop.f32.mrf.mxu0 }
 0x5f9   : > { %v7061_v24 = vadd.f32 %v3815_v3, %v3787_v22  ;;  %v3765_v29 = vpop.f32.mrf.mxu1 }
 0x5fb   : > { %v3820_v39 = vpop.f32.mrf.mxu3 }
 0x5fc   : > { %3996 = vmatmul.bf16.gmra.mxu1 %v7024_v63  ;;  %v3766_v63 = vadd.f32 %v3765_v29, %v2941_v50 }
 0x5fe   : > { %v3789_v57 = vpop.f32.mrf.mxu2 }
 0x5ff   : > { %v3790_v55 = vadd.f32 %v3789_v57, %v3761_v13 }
 0x600   : > { %v3852_v31 = vpop.f32.mrf.mxu0 }
 0x601   : > { %v7064_v61 = vadd.f32 %v3818_v23, %v3790_v55  ;;  %v3767_v8 = vpop.f32.mrf.mxu1  ;;  %v3845_v23 = vadd.f32 %v3844_v40, %v7061_v24 }
 0x602   : > { %v3768_v6 = vadd.f32 %v3767_v8, %v2941_v50 }
 0x603   : > { %v3823_v38 = vpop.f32.mrf.mxu3 }
 0x606   : > { %v3791_v16 = vpop.f32.mrf.mxu2 }
 0x607   : > { %v3792_v52 = vadd.f32 %v3791_v16, %v3763_v49  ;;  %v3848_v16 = vadd.f32 %v3847_v12, %v7064_v61 }
 0x608   : > { %v7079_v62 = vpop.f32.mrf.mxu0 }
 0x609   : > { %v7066_v7 = vadd.f32 %v3820_v39, %v3792_v52  ;;  %v3770_v2 = vpop.f32.mrf.mxu1 }
 0x60a   : > { %v3771_v17 = vadd.f32 %v3770_v2, %v2941_v50 }
 0x60b   : > { %v3825_v9 = vpop.f32.mrf.mxu3 }
 0x60c   : > { %4001 = vmatmul.bf16.gmra.mxu1 %v3279_v45 }
 0x60e   : > { %v3794_v54 = vpop.f32.mrf.mxu2 }
 0x60f   : > { %v3795_v34 = vadd.f32 %v3794_v54, %v3766_v63 }
 0x610   : > { %v7081_v56 = vpop.f32.mrf.mxu0 }
 0x611   : > { %v7071_v60 = vadd.f32 %v3823_v38, %v3795_v34  ;;  %v3772_v36 = vpop.f32.mrf.mxu1 }
 0x612   : > { %v3773_v25 = vadd.f32 %v3772_v36, %v2941_v50  ;;  %v4008_v36 = vld [vmem:[%s5527_s26 + $0x8] sm:$0xff] }
 0x613   : > { %v3828_v35 = vpop.f32.mrf.mxu3 }
 0x616   : > { %v3796_v59 = vpop.f32.mrf.mxu2 }
 0x617   : > { %v3797_v41 = vadd.f32 %v3796_v59, %v3768_v6 }
 0x618   : > { %v7085_v33 = vpop.f32.mrf.mxu0 }
 0x619   : > { %v7073_v18 = vadd.f32 %v3825_v9, %v3797_v41  ;;  %v3871_v14 = vpop.f32.mrf.mxu1  ;;  %v3850_v9 = vadd.f32 %v3849_v19, %v7066_v7 }
 0x61a   : > { %v3872_v32 = vadd.f32 %v3871_v14, %v3843_v10 }
 0x61b   : > { %v3830_v0 = vpop.f32.mrf.mxu3 }
 0x61e   : > { %v3799_v51 = vpop.f32.mrf.mxu2 }
 0x61f   : > { %v3800_v1 = vadd.f32 %v3799_v51, %v3771_v17 }
 0x620   : > { %v3958_v5 = vpop.f32.mrf.mxu0 }
 0x621   : > { %v7075_v58 = vadd.f32 %v3828_v35, %v3800_v1  ;;  %v3873_v15 = vpop.f32.mrf.mxu1 }
 0x622   : > { %v3874_v13 = vadd.f32 %v3873_v15, %v3845_v23  ;;  %v4009_v15 = vld [vmem:[%s5527_s26 + $0x10] sm:$0xff]  ;;  %v4011_v23 = vld [vmem:[%s5527_s26 + $0x20] sm:$0xff] }
 0x623   : > { %v3929_v26 = vpop.f32.mrf.mxu3 }
 0x626   : > { %v3801_v28 = vpop.f32.mrf.mxu2 }
 0x627   : > { %v3802_v21 = vadd.f32 %v3801_v28, %v3773_v25  ;;  %v3853_v25 = vadd.f32 %v3852_v31, %v7071_v60 }
 0x628   : > { %v3960_v57 = vpop.f32.mrf.mxu0 }
 0x629   : > { %v7077_v44 = vadd.f32 %v3830_v0, %v3802_v21  ;;  %v3876_v20 = vpop.f32.mrf.mxu1 }
 0x62a   : > { %v3877_v2 = vadd.f32 %v3876_v20, %v3848_v16 }
 0x62b   : > { %v3931_v48 = vpop.f32.mrf.mxu3  ;;  %v3860_v16 = vadd.f32 %v7085_v33, %v7077_v44 }
 0x62e   : > { %v3900_v4 = vpop.f32.mrf.mxu2 }
 0x62f   : > { %v3901_v30 = vadd.f32 %v3900_v4, %v3872_v32  ;;  %v4010_v4 = vld [vmem:[%s5527_s26 + $0x18] sm:$0xff] }
 0x630   : > { %v3963_v63 = vpop.f32.mrf.mxu0 }
 0x631   : > { %v3878_v11 = vpop.f32.mrf.mxu1  ;;  %v3930_v22 = vadd.f32 %v3929_v26, %v3901_v30 }
 0x632   : > { %v3879_v61 = vadd.f32 %v3878_v11, %v3850_v9 }
 0x633   : > { %v3934_v50 = vpop.f32.mrf.mxu3  ;;  %v3959_v39 = vadd.f32 %v3958_v5, %v3930_v22 }
 0x636   : > { %v3902_v3 = vpop.f32.mrf.mxu2 }
 0x637   : > { %v3903_v55 = vadd.f32 %v3902_v3, %v3874_v13 }
 0x638   : > { %v3965_v1 = vpop.f32.mrf.mxu0 }
 0x639   : > { %v3881_v43 = vpop.f32.mrf.mxu1  ;;  %v3932_v52 = vadd.f32 %v3931_v48, %v3903_v55 }
 0x63a   : > { %v3882_v7 = vadd.f32 %v3881_v43, %v3853_v25 }
 0x63b   : > { %v3936_v37 = vpop.f32.mrf.mxu3  ;;  %v3961_v40 = vadd.f32 %v3960_v57, %v3932_v52 }
 0x63e   : > { %v3905_v29 = vpop.f32.mrf.mxu2 }
 0x63f   : > { %v3906_v24 = vadd.f32 %v3905_v29, %v3877_v2 }
 0x640   : > { %v3968_v60 = vpop.f32.mrf.mxu0 }
 0x641   : > { %v7083_v27 = vpop.f32.mrf.mxu1  ;;  %v3935_v6 = vadd.f32 %v3934_v50, %v3906_v24  ;;  %v3855_v50 = vadd.f32 %v7079_v62, %v7073_v18  ;;  %v3858_v18 = vadd.f32 %v7081_v56, %v7075_v58  ;;  %v4013_v24 = vld [vmem:[%s5527_s26 + $0x30] sm:$0xff] }
 0x643   : > { %v3939_v47 = vpop.f32.mrf.mxu3  ;;  %v3964_v14 = vadd.f32 %v3963_v63, %v3935_v6  ;;  %v3884_v31 = vadd.f32 %v7083_v27, %v3855_v50 }
 0x646   : > { %v3907_v45 = vpop.f32.mrf.mxu2 }
 0x647   : > { %v3908_v12 = vadd.f32 %v3907_v45, %v3879_v61 }
 0x648   : > { %v3970_v62 = vpop.f32.mrf.mxu0 }
 0x649   : > { %v7087_v46 = vpop.f32.mrf.mxu1  ;;  %v3937_v28 = vadd.f32 %v3936_v37, %v3908_v12 }
 0x64a   : > { %v3887_v57 = vadd.f32 %v7087_v46, %v3858_v18 }
 0x64b   : > { %v3941_v41 = vpop.f32.mrf.mxu3  ;;  %v3966_v20 = vadd.f32 %v3965_v1, %v3937_v28 }
 0x64e   : > { %v3910_v17 = vpop.f32.mrf.mxu2 }
 0x64f   : > { %v3911_v0 = vadd.f32 %v3910_v17, %v3882_v7 }
 0x651   : > { %v7090_v53 = vpop.f32.mrf.mxu1  ;;  %v3940_v3 = vadd.f32 %v3939_v47, %v3911_v0  ;;  %v4012_v47 = vld [vmem:[%s5527_s26 + $0x28] sm:$0xff] }
 0x652   : > { %v3889_v56 = vadd.f32 %v7090_v53, %v3860_v16 }
 0x653   : > { %v3944_v19 = vpop.f32.mrf.mxu3  ;;  %v3969_v5 = vadd.f32 %v3968_v60, %v3940_v3 }
 0x656   : > { %v3912_v48 = vpop.f32.mrf.mxu2 }
 0x657   : > { %v3913_v43 = vadd.f32 %v3912_v48, %v3884_v31 }
 0x659   : > { %v3987_v8 = vpop.f32.mrf.mxu1  ;;  %v3942_v22 = vadd.f32 %v3941_v41, %v3913_v43 }
 0x65a   : > { %v3988_v49 = vadd.f32 %v3987_v8, %v3959_v39 }
 0x65b   : > { %v3946_v32 = vpop.f32.mrf.mxu3  ;;  %v3971_v27 = vadd.f32 %v3970_v62, %v3942_v22 }
 0x65c   : > { %v4015_v38 = vadd.f32 %v4007_v42, %v3988_v49 }
 0x65e   : > { %4023 = vst [vmem:[%s5527_s26] sm:$0xff] %v4015_v38  ;;  %v3915_v13 = vpop.f32.mrf.mxu2 }
 0x65f   : > { %v3916_v39 = vadd.f32 %v3915_v13, %v3887_v57 }
 0x661   : > { %v3989_v54 = vpop.f32.mrf.mxu1  ;;  %v3945_v52 = vadd.f32 %v3944_v19, %v3916_v39 }
 0x662   : > { %v3990_v34 = vadd.f32 %v3989_v54, %v3961_v40 }
 0x663   : > { %v3973_v49 = vpop.f32.mrf.mxu3 }
 0x664   : > { %v4016_v59 = vadd.f32 %v4008_v36, %v3990_v34  ;;  %v3974_v46 = vadd.f32 %v3973_v49, %v3945_v52  ;;  %v4014_v34 = vld [vmem:[%s5527_s26 + $0x38] sm:$0xff] }
 0x666   : > { %4024 = vst [vmem:[%s5527_s26 + $0x8] sm:$0xff] %v4016_v59  ;;  %v3917_v58 = vpop.f32.mrf.mxu2 }
 0x667   : > { %v3918_v2 = vadd.f32 %v3917_v58, %v3889_v56 }
 0x669   : > { %v3992_v35 = vpop.f32.mrf.mxu1  ;;  %v3947_v44 = vadd.f32 %v3946_v32, %v3918_v2 }
 0x66a   : > { %v3993_v51 = vadd.f32 %v3992_v35, %v3964_v14 }
 0x66b   : > { %v3975_v63 = vpop.f32.mrf.mxu3 }
 0x66c   : > { %v4017_v21 = vadd.f32 %v4009_v15, %v3993_v51  ;;  %v3976_v33 = vadd.f32 %v3975_v63, %v3947_v44 }
 0x66e   : > { %4025 = vst [vmem:[%s5527_s26 + $0x10] sm:$0xff] %v4017_v21 }
 0x671   : > { %v3994_v11 = vpop.f32.mrf.mxu1 }
 0x672   : > { %v3995_v26 = vadd.f32 %v3994_v11, %v3966_v20 }
 0x674   : > { %v4018_v10 = vadd.f32 %v4010_v4, %v3995_v26 }
 0x676   : > { %4026 = vst [vmem:[%s5527_s26 + $0x18] sm:$0xff] %v4018_v10 }
 0x679   : > { %v3997_v30 = vpop.f32.mrf.mxu1 }
 0x67a   : > { %v3998_v37 = vadd.f32 %v3997_v30, %v3969_v5 }
 0x67c   : > { %v4019_v29 = vadd.f32 %v4011_v23, %v3998_v37 }
 0x67e   : > { %4027 = vst [vmem:[%s5527_s26 + $0x20] sm:$0xff] %v4019_v29 }
 0x681   : > { %v3999_v55 = vpop.f32.mrf.mxu1 }
 0x682   : > { %v4000_v8 = vadd.f32 %v3999_v55, %v3971_v27 }
 0x684   : > { %v4020_v42 = vadd.f32 %v4012_v47, %v4000_v8 }
 0x686   : > { %4028 = vst [vmem:[%s5527_s26 + $0x28] sm:$0xff] %v4020_v42 }
 0x689   : > { %v4002_v38 = vpop.f32.mrf.mxu1 }
 0x68a   : > { %v4003_v45 = vadd.f32 %v4002_v38, %v3974_v46 }
 0x68c   : > { %v4021_v40 = vadd.f32 %v4013_v24, %v4003_v45 }
 0x68e   : > { %4029 = vst [vmem:[%s5527_s26 + $0x30] sm:$0xff] %v4021_v40 }
 0x691   : > { %v4004_v53 = vpop.f32.mrf.mxu1 }
 0x692   : > { %v4005_v54 = vadd.f32 %v4004_v53, %v3976_v33 }
 0x694   : > { %v4022_v36 = vadd.f32 %v4014_v34, %v4005_v54 }
 0x696   : > { %4030 = vst [vmem:[%s5527_s26 + $0x38] sm:$0xff] %v4022_v36 }
 0x697   : > { %5293 = shalt.err (!%p5290_p8)
}
 0x698   : > { %s5352_s19 = smov 128   ;;  %s5353_s26 = smov 8  }
 0x699   : > { %5001 = dma.vmem_to_hbm [thread:$0]  (%p5437_p5), %s4045_s10, 1024, %s4047_s12, %s4032_s9, %s5352_s19, %s5352_s19, %s5353_s26  }
 0x69a PF: > { %p5033_p9 = scmp.ge.s32.totalorder %s5340_s30, 2  ;;  %s4061_s6 = sand.u32 1, %s5328_s27  }
 0x69b   : > { %s4062_s1 = scalar_lea.sflag [#allocation4], %s4061_s6 }
 0x69c   : > { %p5020_p10 = pnand %p5033_p9, %p5441_p6 }
 0x69e   : > { %p5021_p11 = pneg %p5020_p10 }
 0x6a0   : > { %5323 = dma.done.wait (%p5021_p11), %s4062_s1, 1024  }
 0x6a1   : > { %5325 = vsyncadd (%p5021_p11), %s4062_s1, 4294966272  ;;  %s7592_s30 = sld [smem:[#allocation17_spill]]  ;;  %s7595_s27 = smov %s5332_s28 }
 0x6a2   : > { %s7593_s3 = sld [smem:[#allocation16_spill]] }
 0x6a3   : > { %s7594_s29 = sld [smem:[#allocation18_spill]] }
 0x6a7   : > { %p21_p12 = scmp.ge.s32.totalorder %s7592_s30, 4  }
 0x6a8   : > { %s7596_s28 = smov %s7593_s3 }
 0x6a9   :  { %23 = sbr.rel (!%p21_p12) target bundleno = 10 (0xa), region = 108 }
 0x6ae   :  { %4068 = vsyncpa [#allocation3], 1 }
 0x6af   :  { %4070 = vsyncpa [#allocation3 + $0x1], 1 }
 0x6b0   :  { %4071 = vsyncpa [#allocation6], 1 }
 0x6b1   :  { %4072 = vsyncpa [#allocation9], 1 }
 0x6b2   :  { %4073 = vsyncpa [#allocation4], 1 }
 0x6b3   :  { %4075 = vsyncpa [#allocation4 + $0x1], 1 }

</bundles_post_ra>
